<compile_context>
chip_gen: v7x
topology: tpu7x:2x2x1
jax: 0.10.0
libtpu: 0.0.40
codegen_flags: <defaults>
</compile_context>

<pallas_src>
import jax
import jax.numpy as jnp
from jax.experimental import pallas as pl
from jax.experimental.pallas import tpu as pltpu


def _sigmoid(v):
    return 1.0 / (1.0 + jnp.exp(-v))


def _make_gru_kernel(num_layers, seq_len, hidden_dim):
    T = seq_len
    H = hidden_dim

    def kernel(*refs):
        x_ref = refs[0]                           # (T, TB, I)   time-major input tile
        layer_refs = refs[1:1 + 3 * num_layers]   # per layer: Wi (3,I_l,H), Wh (3,H,H), b (4,H)
        fcw_ref = refs[1 + 3 * num_layers]        # (H, O)
        fcb_ref = refs[2 + 3 * num_layers]        # (1, O)
        out_ref = refs[3 + 3 * num_layers]        # (TB, O)
        seq_ref = refs[4 + 3 * num_layers]        # scratch (T, TB, H): layer output sequence
        gir_ref = refs[5 + 3 * num_layers]        # scratch (T, TB, H): batched input-proj, r gate
        giz_ref = refs[6 + 3 * num_layers]        # scratch (T, TB, H): batched input-proj, z gate
        gin_ref = refs[7 + 3 * num_layers]        # scratch (T, TB, H): batched input-proj, n gate

        tb = x_ref.shape[1]

        h_last = None
        for l in range(num_layers):
            wi_ref = layer_refs[3 * l]
            wh_ref = layer_refs[3 * l + 1]
            b_ref = layer_refs[3 * l + 2]
            w_ir, w_iz, w_in = wi_ref[0], wi_ref[1], wi_ref[2]        # each (I_l, H)
            w_hr, w_hz, w_hn = wh_ref[0], wh_ref[1], wh_ref[2]        # each (H, H)
            b_r, b_z, b_in, b_hn = (b_ref[0:1, :], b_ref[1:2, :],
                                    b_ref[2:3, :], b_ref[3:4, :])     # each (1, H)

            # Batched input projections over the whole sequence: one wide MXU
            # matmul per gate instead of one small matmul per time step.
            inp_seq = x_ref[...] if l == 0 else seq_ref[...]          # (T, TB, I_l)
            in_dim = inp_seq.shape[-1]
            flat = inp_seq.reshape(T * tb, in_dim)
            gir_ref[...] = (jnp.dot(flat, w_ir, preferred_element_type=jnp.float32)
                            + b_r).reshape(T, tb, H)
            giz_ref[...] = (jnp.dot(flat, w_iz, preferred_element_type=jnp.float32)
                            + b_z).reshape(T, tb, H)
            gin_ref[...] = (jnp.dot(flat, w_in, preferred_element_type=jnp.float32)
                            + b_in).reshape(T, tb, H)

            not_last = l < num_layers - 1

            # Sequential recurrence: only the hidden-state matmuls + gate math.
            def step(t, h, _not_last=not_last, _w_hr=w_hr, _w_hz=w_hz,
                     _w_hn=w_hn, _b_hn=b_hn):
                gh_r = jnp.dot(h, _w_hr, preferred_element_type=jnp.float32)
                gh_z = jnp.dot(h, _w_hz, preferred_element_type=jnp.float32)
                gh_n = jnp.dot(h, _w_hn, preferred_element_type=jnp.float32)
                r = _sigmoid(gir_ref[t] + gh_r)
                z = _sigmoid(giz_ref[t] + gh_z)
                n = jnp.tanh(gin_ref[t] + r * (gh_n + _b_hn))
                h_new = (1.0 - z) * n + z * h
                if _not_last:
                    seq_ref[t] = h_new        # becomes the next layer's input
                return h_new

            h_last = jax.lax.fori_loop(0, T, step,
                                       jnp.zeros((tb, H), jnp.float32),
                                       unroll=bool(T <= 16))

        # Fused final Linear on the last time step of the top layer.
        out = jnp.dot(h_last, fcw_ref[...],
                      preferred_element_type=jnp.float32) + fcb_ref[...]
        out_ref[...] = out.astype(out_ref.dtype)

    return kernel


def _pick_batch_tile(B, batch_tile):
    for cand in (batch_tile, 512, 256, 128, 64, 32, 16, 8):
        if cand and 0 < cand <= B and B % cand == 0 and cand % 8 == 0:
            return cand
    return B  # fall back to a single full-batch tile


def gru_forward(x, layer_params, fc_w, fc_b, *, hidden_dim, num_layers,
                batch_tile=256):
    """x: (B, T, input_dim) f32 (batch_first, like the PyTorch module).
    layer_params: list of (w_ih (3H, I_l), w_hh (3H, H), b_ih (3H,), b_hh (3H,))
    with PyTorch gate order (r, z, n).  fc_w: (O, H), fc_b: (O,). Returns (B, O)."""
    B, T, I = x.shape
    H = hidden_dim
    O = fc_w.shape[0]
    assert len(layer_params) == num_layers

    tb = _pick_batch_tile(B, batch_tile)

    # Time-major input so the in-kernel time loop indexes the leading axis.
    x_tm = jnp.transpose(x, (1, 0, 2))                               # (T, B, I)

    flat_inputs = [x_tm]
    in_specs = [pl.BlockSpec((T, tb, I), lambda i: (0, i, 0))]

    for l, (w_ih, w_hh, b_ih, b_hh) in enumerate(layer_params):
        in_l = I if l == 0 else H
        # PyTorch stacks gates (r, z, n) along rows; split + transpose per gate.
        wi_stack = jnp.transpose(w_ih.reshape(3, H, in_l), (0, 2, 1))    # (3, I_l, H)
        wh_stack = jnp.transpose(w_hh.reshape(3, H, H), (0, 2, 1))       # (3, H, H)
        b_i = b_ih.reshape(3, H)
        b_h = b_hh.reshape(3, H)
        # r/z biases pre-summed; n-gate biases kept separate (needed inside r*(...)).
        b_stack = jnp.stack(
            [b_i[0] + b_h[0], b_i[1] + b_h[1], b_i[2], b_h[2]], axis=0)  # (4, H)
        flat_inputs += [wi_stack, wh_stack, b_stack]
        in_specs += [
            pl.BlockSpec((3, in_l, H), lambda i: (0, 0, 0)),
            pl.BlockSpec((3, H, H), lambda i: (0, 0, 0)),
            pl.BlockSpec((4, H), lambda i: (0, 0)),
        ]

    flat_inputs += [fc_w.T, fc_b.reshape(1, O)]
    in_specs += [
        pl.BlockSpec((H, O), lambda i: (0, 0)),
        pl.BlockSpec((1, O), lambda i: (0, 0)),
    ]

    scratch_shapes = [
        pltpu.VMEM((T, tb, H), jnp.float32),   # layer output sequence
        pltpu.VMEM((T, tb, H), jnp.float32),   # input projection, r gate
        pltpu.VMEM((T, tb, H), jnp.float32),   # input projection, z gate
        pltpu.VMEM((T, tb, H), jnp.float32),   # input projection, n gate
    ]

    kernel = _make_gru_kernel(num_layers, T, H)
    out = pl.pallas_call(
        kernel,
        grid=(B // tb,),
        in_specs=in_specs,
        out_specs=pl.BlockSpec((tb, O), lambda i: (i, 0)),
        out_shape=jax.ShapeDtypeStruct((B, O), jnp.float32),
        scratch_shapes=scratch_shapes,
        compiler_params=pltpu.CompilerParams(dimension_semantics=("parallel",)),
    )(*flat_inputs)
    return out


def gru_reference(x, layer_params, fc_w, fc_b, *, hidden_dim, num_layers):
    """Pure-JAX mirror of the PyTorch GRUModel.forward (h0 = 0) for verification."""
    B, T, _ = x.shape
    H = hidden_dim
    seq = x
    for w_ih, w_hh, b_ih, b_hh in layer_params:
        h = jnp.zeros((B, H), jnp.float32)
        outs = []
        for t in range(T):
            x_t = seq[:, t, :]
            gi = x_t @ w_ih.T + b_ih
            gh = h @ w_hh.T + b_hh
            i_r, i_z, i_n = jnp.split(gi, 3, axis=1)
            h_r, h_z, h_n = jnp.split(gh, 3, axis=1)
            r = _sigmoid(i_r + h_r)
            z = _sigmoid(i_z + h_z)
            n = jnp.tanh(i_n + r * h_n)
            h = (1.0 - z) * n + z * h
            outs.append(h)
        seq = jnp.stack(outs, axis=1)                                # (B, T, H)
    return seq[:, -1, :] @ fc_w.T + fc_b


if __name__ == "__main__":
    # Small shapes consistent with the module's forward.
    B, T = 8, 8                 # batch, sequence length
    INPUT_DIM = 16
    HIDDEN_DIM = 32
    OUTPUT_DIM = 8
    NUM_LAYERS = 2

    key = jax.random.PRNGKey(0)
    key_iter = iter(jax.random.split(key, 4 * NUM_LAYERS + 3))

    # PyTorch-style uniform init: U(-1/sqrt(H), 1/sqrt(H)).
    bound = 1.0 / float(HIDDEN_DIM) ** 0.5
    layer_params = []
    for l in range(NUM_LAYERS):
        in_l = INPUT_DIM if l == 0 else HIDDEN_DIM
        w_ih = jax.random.uniform(next(key_iter), (3 * HIDDEN_DIM, in_l),
                                  jnp.float32, -bound, bound)
        w_hh = jax.random.uniform(next(key_iter), (3 * HIDDEN_DIM, HIDDEN_DIM),
                                  jnp.float32, -bound, bound)
        b_ih = jax.random.uniform(next(key_iter), (3 * HIDDEN_DIM,),
                                  jnp.float32, -bound, bound)
        b_hh = jax.random.uniform(next(key_iter), (3 * HIDDEN_DIM,),
                                  jnp.float32, -bound, bound)
        layer_params.append((w_ih, w_hh, b_ih, b_hh))
    fc_w = jax.random.uniform(next(key_iter), (OUTPUT_DIM, HIDDEN_DIM),
                              jnp.float32, -bound, bound)
    fc_b = jax.random.uniform(next(key_iter), (OUTPUT_DIM,),
                              jnp.float32, -bound, bound)
    x = jax.random.normal(next(key_iter), (B, T, INPUT_DIM), dtype=jnp.float32)

    out = gru_forward(x, layer_params, fc_w, fc_b,
                      hidden_dim=HIDDEN_DIM, num_layers=NUM_LAYERS)
    out = jax.block_until_ready(out)

    ref = gru_reference(x, layer_params, fc_w, fc_b,
                        hidden_dim=HIDDEN_DIM, num_layers=NUM_LAYERS)
    assert out.shape == (B, OUTPUT_DIM)
    max_err = float(jnp.max(jnp.abs(out - ref)))
    assert jnp.allclose(out, ref, atol=1e-4, rtol=1e-4), max_err

    print("KERNEL_OK")
</pallas_src>

<mosaic_0001>
module attributes {stable_mosaic.version = 11 : i64} {
  func.func @kernel(%arg0: i32, %arg1: memref<8x8x16xf32, #tpu.memory_space<vmem>>, %arg2: memref<3x16x32xf32, #tpu.memory_space<vmem>>, %arg3: memref<3x32x32xf32, #tpu.memory_space<vmem>>, %arg4: memref<4x32xf32, #tpu.memory_space<vmem>>, %arg5: memref<3x32x32xf32, #tpu.memory_space<vmem>>, %arg6: memref<3x32x32xf32, #tpu.memory_space<vmem>>, %arg7: memref<4x32xf32, #tpu.memory_space<vmem>>, %arg8: memref<32x8xf32, #tpu.memory_space<vmem>>, %arg9: memref<1x8xf32, #tpu.memory_space<vmem>>, %arg10: memref<8x8xf32, #tpu.memory_space<vmem>>, %arg11: memref<8x8x32xf32, #tpu.memory_space<vmem>>, %arg12: memref<8x8x32xf32, #tpu.memory_space<vmem>>, %arg13: memref<8x8x32xf32, #tpu.memory_space<vmem>>, %arg14: memref<8x8x32xf32, #tpu.memory_space<vmem>>) attributes {dimension_semantics = [#tpu.dimension_semantics<parallel>], iteration_bounds = array<i64: 1>, scalar_prefetch = 0 : i64, scratch_operands = 4 : i64, tpu.core_type = #tpu.core_type<tc>, window_params = [{transform_indices = @transform_0, window_bounds = array<i64: 8, 8, 16>}, {pipeline_mode = #tpu.pipeline_mode<synchronous>, transform_indices = @transform_1, window_bounds = array<i64: 3, 16, 32>}, {pipeline_mode = #tpu.pipeline_mode<synchronous>, transform_indices = @transform_2, window_bounds = array<i64: 3, 32, 32>}, {pipeline_mode = #tpu.pipeline_mode<synchronous>, transform_indices = @transform_3, window_bounds = array<i64: 4, 32>}, {pipeline_mode = #tpu.pipeline_mode<synchronous>, transform_indices = @transform_4, window_bounds = array<i64: 3, 32, 32>}, {pipeline_mode = #tpu.pipeline_mode<synchronous>, transform_indices = @transform_5, window_bounds = array<i64: 3, 32, 32>}, {pipeline_mode = #tpu.pipeline_mode<synchronous>, transform_indices = @transform_6, window_bounds = array<i64: 4, 32>}, {pipeline_mode = #tpu.pipeline_mode<synchronous>, transform_indices = @transform_7, window_bounds = array<i64: 32, 8>}, {pipeline_mode = #tpu.pipeline_mode<synchronous>, transform_indices = @transform_8, window_bounds = array<i64: 1, 8>}, {transform_indices = @transform_9, window_bounds = array<i64: 8, 8>}]} {
    %c0 = arith.constant 0 : index
    %c0_0 = arith.constant 0 : index
    %c0_1 = arith.constant 0 : index
    %0 = vector.load %arg2[%c0, %c0_0, %c0_1] : memref<3x16x32xf32, #tpu.memory_space<vmem>>, vector<1x16x32xf32>
    %1 = vector.shape_cast %0 : vector<1x16x32xf32> to vector<16x32xf32>
    %c1 = arith.constant 1 : index
    %c0_2 = arith.constant 0 : index
    %c0_3 = arith.constant 0 : index
    %2 = vector.load %arg2[%c1, %c0_2, %c0_3] : memref<3x16x32xf32, #tpu.memory_space<vmem>>, vector<1x16x32xf32>
    %3 = vector.shape_cast %2 : vector<1x16x32xf32> to vector<16x32xf32>
    %c2 = arith.constant 2 : index
    %c0_4 = arith.constant 0 : index
    %c0_5 = arith.constant 0 : index
    %4 = vector.load %arg2[%c2, %c0_4, %c0_5] : memref<3x16x32xf32, #tpu.memory_space<vmem>>, vector<1x16x32xf32>
    %5 = vector.shape_cast %4 : vector<1x16x32xf32> to vector<16x32xf32>
    %c0_6 = arith.constant 0 : index
    %c0_7 = arith.constant 0 : index
    %c0_8 = arith.constant 0 : index
    %6 = vector.load %arg3[%c0_6, %c0_7, %c0_8] : memref<3x32x32xf32, #tpu.memory_space<vmem>>, vector<1x32x32xf32>
    %7 = vector.shape_cast %6 : vector<1x32x32xf32> to vector<32x32xf32>
    %c1_9 = arith.constant 1 : index
    %c0_10 = arith.constant 0 : index
    %c0_11 = arith.constant 0 : index
    %8 = vector.load %arg3[%c1_9, %c0_10, %c0_11] : memref<3x32x32xf32, #tpu.memory_space<vmem>>, vector<1x32x32xf32>
    %9 = vector.shape_cast %8 : vector<1x32x32xf32> to vector<32x32xf32>
    %c2_12 = arith.constant 2 : index
    %c0_13 = arith.constant 0 : index
    %c0_14 = arith.constant 0 : index
    %10 = vector.load %arg3[%c2_12, %c0_13, %c0_14] : memref<3x32x32xf32, #tpu.memory_space<vmem>>, vector<1x32x32xf32>
    %11 = vector.shape_cast %10 : vector<1x32x32xf32> to vector<32x32xf32>
    %c0_15 = arith.constant 0 : index
    %c0_16 = arith.constant 0 : index
    %12 = vector.load %arg4[%c0_15, %c0_16] : memref<4x32xf32, #tpu.memory_space<vmem>>, vector<1x32xf32>
    %c1_17 = arith.constant 1 : index
    %c0_18 = arith.constant 0 : index
    %13 = vector.load %arg4[%c1_17, %c0_18] : memref<4x32xf32, #tpu.memory_space<vmem>>, vector<1x32xf32>
    %c2_19 = arith.constant 2 : index
    %c0_20 = arith.constant 0 : index
    %14 = vector.load %arg4[%c2_19, %c0_20] : memref<4x32xf32, #tpu.memory_space<vmem>>, vector<1x32xf32>
    %c3 = arith.constant 3 : index
    %c0_21 = arith.constant 0 : index
    %15 = vector.load %arg4[%c3, %c0_21] : memref<4x32xf32, #tpu.memory_space<vmem>>, vector<1x32xf32>
    %c0_22 = arith.constant 0 : index
    %c0_23 = arith.constant 0 : index
    %c0_24 = arith.constant 0 : index
    %16 = vector.load %arg1[%c0_22, %c0_23, %c0_24] : memref<8x8x16xf32, #tpu.memory_space<vmem>>, vector<8x8x16xf32>
    %17 = vector.shape_cast %16 : vector<8x8x16xf32> to vector<64x16xf32>
    %cst = arith.constant dense<0.000000e+00> : vector<64x32xf32>
    %18 = tpu.matmul %17, %1, %cst {dimension_numbers = #tpu.dot_dimension_numbers<[1], [0], [0], [1], [0, 0, 1, 1], [], []>} : vector<64x16xf32>, vector<16x32xf32>, vector<64x32xf32> -> vector<64x32xf32>
    %19 = vector.broadcast %12 : vector<1x32xf32> to vector<64x32xf32>
    %20 = arith.addf %18, %19 : vector<64x32xf32>
    %21 = vector.shape_cast %20 : vector<64x32xf32> to vector<8x8x32xf32>
    %c0_25 = arith.constant 0 : index
    %c0_26 = arith.constant 0 : index
    %c0_27 = arith.constant 0 : index
    %22 = vector.load %arg12[%c0_25, %c0_26, %c0_27] : memref<8x8x32xf32, #tpu.memory_space<vmem>>, vector<8x8x32xf32>
    tpu.vector_store %arg12[%c0_25, %c0_26, %c0_27], %21 {strides = array<i32>} : memref<8x8x32xf32, #tpu.memory_space<vmem>>, vector<8x8x32xf32>,
    %cst_28 = arith.constant dense<0.000000e+00> : vector<64x32xf32>
    %23 = tpu.matmul %17, %3, %cst_28 {dimension_numbers = #tpu.dot_dimension_numbers<[1], [0], [0], [1], [0, 0, 1, 1], [], []>} : vector<64x16xf32>, vector<16x32xf32>, vector<64x32xf32> -> vector<64x32xf32>
    %24 = vector.broadcast %13 : vector<1x32xf32> to vector<64x32xf32>
    %25 = arith.addf %23, %24 : vector<64x32xf32>
    %26 = vector.shape_cast %25 : vector<64x32xf32> to vector<8x8x32xf32>
    %c0_29 = arith.constant 0 : index
    %c0_30 = arith.constant 0 : index
    %c0_31 = arith.constant 0 : index
    %27 = vector.load %arg13[%c0_29, %c0_30, %c0_31] : memref<8x8x32xf32, #tpu.memory_space<vmem>>, vector<8x8x32xf32>
    tpu.vector_store %arg13[%c0_29, %c0_30, %c0_31], %26 {strides = array<i32>} : memref<8x8x32xf32, #tpu.memory_space<vmem>>, vector<8x8x32xf32>,
    %cst_32 = arith.constant dense<0.000000e+00> : vector<64x32xf32>
    %28 = tpu.matmul %17, %5, %cst_32 {dimension_numbers = #tpu.dot_dimension_numbers<[1], [0], [0], [1], [0, 0, 1, 1], [], []>} : vector<64x16xf32>, vector<16x32xf32>, vector<64x32xf32> -> vector<64x32xf32>
    %29 = vector.broadcast %14 : vector<1x32xf32> to vector<64x32xf32>
    %30 = arith.addf %28, %29 : vector<64x32xf32>
    %31 = vector.shape_cast %30 : vector<64x32xf32> to vector<8x8x32xf32>
    %c0_33 = arith.constant 0 : index
    %c0_34 = arith.constant 0 : index
    %c0_35 = arith.constant 0 : index
    %32 = vector.load %arg14[%c0_33, %c0_34, %c0_35] : memref<8x8x32xf32, #tpu.memory_space<vmem>>, vector<8x8x32xf32>
    tpu.vector_store %arg14[%c0_33, %c0_34, %c0_35], %31 {strides = array<i32>} : memref<8x8x32xf32, #tpu.memory_space<vmem>>, vector<8x8x32xf32>,
    %cst_36 = arith.constant 0.000000e+00 : f32
    %33 = vector.broadcast %cst_36 : f32 to vector<8x32xf32>
    %c0_i32 = arith.constant 0 : i32
    %cst_37 = arith.constant dense<0.000000e+00> : vector<8x32xf32>
    %34 = tpu.matmul %33, %7, %cst_37 {dimension_numbers = #tpu.dot_dimension_numbers<[1], [0], [0], [1], [0, 0, 1, 1], [], []>} : vector<8x32xf32>, vector<32x32xf32>, vector<8x32xf32> -> vector<8x32xf32>
    %cst_38 = arith.constant dense<0.000000e+00> : vector<8x32xf32>
    %35 = tpu.matmul %33, %9, %cst_38 {dimension_numbers = #tpu.dot_dimension_numbers<[1], [0], [0], [1], [0, 0, 1, 1], [], []>} : vector<8x32xf32>, vector<32x32xf32>, vector<8x32xf32> -> vector<8x32xf32>
    %cst_39 = arith.constant dense<0.000000e+00> : vector<8x32xf32>
    %36 = tpu.matmul %33, %11, %cst_39 {dimension_numbers = #tpu.dot_dimension_numbers<[1], [0], [0], [1], [0, 0, 1, 1], [], []>} : vector<8x32xf32>, vector<32x32xf32>, vector<8x32xf32> -> vector<8x32xf32>
    %37 = arith.index_cast %c0_i32 : i32 to index
    %c0_40 = arith.constant 0 : index
    %c0_41 = arith.constant 0 : index
    %38 = vector.load %arg12[%37, %c0_40, %c0_41] : memref<8x8x32xf32, #tpu.memory_space<vmem>>, vector<1x8x32xf32>
    %39 = vector.shape_cast %38 : vector<1x8x32xf32> to vector<8x32xf32>
    %40 = arith.addf %39, %34 : vector<8x32xf32>
    %cst_42 = arith.constant 0.000000e+00 : f32
    %41 = vector.broadcast %cst_42 : f32 to vector<8x32xf32>
    %42 = arith.subf %41, %40 : vector<8x32xf32>
    %43 = math.exp %42 : vector<8x32xf32>
    %cst_43 = arith.constant 1.000000e+00 : f32
    %44 = vector.broadcast %cst_43 : f32 to vector<8x32xf32>
    %45 = arith.addf %44, %43 : vector<8x32xf32>
    %cst_44 = arith.constant 1.000000e+00 : f32
    %46 = vector.broadcast %cst_44 : f32 to vector<8x32xf32>
    %47 = arith.divf %46, %45 : vector<8x32xf32>
    %48 = arith.index_cast %c0_i32 : i32 to index
    %c0_45 = arith.constant 0 : index
    %c0_46 = arith.constant 0 : index
    %49 = vector.load %arg13[%48, %c0_45, %c0_46] : memref<8x8x32xf32, #tpu.memory_space<vmem>>, vector<1x8x32xf32>
    %50 = vector.shape_cast %49 : vector<1x8x32xf32> to vector<8x32xf32>
    %51 = arith.addf %50, %35 : vector<8x32xf32>
    %cst_47 = arith.constant 0.000000e+00 : f32
    %52 = vector.broadcast %cst_47 : f32 to vector<8x32xf32>
    %53 = arith.subf %52, %51 : vector<8x32xf32>
    %54 = math.exp %53 : vector<8x32xf32>
    %cst_48 = arith.constant 1.000000e+00 : f32
    %55 = vector.broadcast %cst_48 : f32 to vector<8x32xf32>
    %56 = arith.addf %55, %54 : vector<8x32xf32>
    %cst_49 = arith.constant 1.000000e+00 : f32
    %57 = vector.broadcast %cst_49 : f32 to vector<8x32xf32>
    %58 = arith.divf %57, %56 : vector<8x32xf32>
    %59 = arith.index_cast %c0_i32 : i32 to index
    %c0_50 = arith.constant 0 : index
    %c0_51 = arith.constant 0 : index
    %60 = vector.load %arg14[%59, %c0_50, %c0_51] : memref<8x8x32xf32, #tpu.memory_space<vmem>>, vector<1x8x32xf32>
    %61 = vector.shape_cast %60 : vector<1x8x32xf32> to vector<8x32xf32>
    %62 = vector.broadcast %15 : vector<1x32xf32> to vector<8x32xf32>
    %63 = arith.addf %36, %62 : vector<8x32xf32>
    %64 = arith.mulf %47, %63 : vector<8x32xf32>
    %65 = arith.addf %61, %64 : vector<8x32xf32>
    %66 = math.tanh %65 : vector<8x32xf32>
    %cst_52 = arith.constant 1.000000e+00 : f32
    %67 = vector.broadcast %cst_52 : f32 to vector<8x32xf32>
    %68 = arith.subf %67, %58 : vector<8x32xf32>
    %69 = arith.mulf %68, %66 : vector<8x32xf32>
    %70 = arith.mulf %58, %33 : vector<8x32xf32>
    %71 = arith.addf %69, %70 : vector<8x32xf32>
    %72 = arith.index_cast %c0_i32 : i32 to index
    %c0_53 = arith.constant 0 : index
    %c0_54 = arith.constant 0 : index
    %73 = vector.load %arg11[%72, %c0_53, %c0_54] : memref<8x8x32xf32, #tpu.memory_space<vmem>>, vector<1x8x32xf32>
    %74 = vector.shape_cast %73 : vector<1x8x32xf32> to vector<8x32xf32>
    %75 = vector.shape_cast %71 : vector<8x32xf32> to vector<1x8x32xf32>
    tpu.vector_store %arg11[%72, %c0_53, %c0_54], %75 {strides = array<i32>} : memref<8x8x32xf32, #tpu.memory_space<vmem>>, vector<1x8x32xf32>,
    %c1_i32 = arith.constant 1 : i32
    %cst_55 = arith.constant dense<0.000000e+00> : vector<8x32xf32>
    %76 = tpu.matmul %71, %7, %cst_55 {dimension_numbers = #tpu.dot_dimension_numbers<[1], [0], [0], [1], [0, 0, 1, 1], [], []>} : vector<8x32xf32>, vector<32x32xf32>, vector<8x32xf32> -> vector<8x32xf32>
    %cst_56 = arith.constant dense<0.000000e+00> : vector<8x32xf32>
    %77 = tpu.matmul %71, %9, %cst_56 {dimension_numbers = #tpu.dot_dimension_numbers<[1], [0], [0], [1], [0, 0, 1, 1], [], []>} : vector<8x32xf32>, vector<32x32xf32>, vector<8x32xf32> -> vector<8x32xf32>
    %cst_57 = arith.constant dense<0.000000e+00> : vector<8x32xf32>
    %78 = tpu.matmul %71, %11, %cst_57 {dimension_numbers = #tpu.dot_dimension_numbers<[1], [0], [0], [1], [0, 0, 1, 1], [], []>} : vector<8x32xf32>, vector<32x32xf32>, vector<8x32xf32> -> vector<8x32xf32>
    %79 = arith.index_cast %c1_i32 : i32 to index
    %c0_58 = arith.constant 0 : index
    %c0_59 = arith.constant 0 : index
    %80 = vector.load %arg12[%79, %c0_58, %c0_59] : memref<8x8x32xf32, #tpu.memory_space<vmem>>, vector<1x8x32xf32>
    %81 = vector.shape_cast %80 : vector<1x8x32xf32> to vector<8x32xf32>
    %82 = arith.addf %81, %76 : vector<8x32xf32>
    %cst_60 = arith.constant 0.000000e+00 : f32
    %83 = vector.broadcast %cst_60 : f32 to vector<8x32xf32>
    %84 = arith.subf %83, %82 : vector<8x32xf32>
    %85 = math.exp %84 : vector<8x32xf32>
    %cst_61 = arith.constant 1.000000e+00 : f32
    %86 = vector.broadcast %cst_61 : f32 to vector<8x32xf32>
    %87 = arith.addf %86, %85 : vector<8x32xf32>
    %cst_62 = arith.constant 1.000000e+00 : f32
    %88 = vector.broadcast %cst_62 : f32 to vector<8x32xf32>
    %89 = arith.divf %88, %87 : vector<8x32xf32>
    %90 = arith.index_cast %c1_i32 : i32 to index
    %c0_63 = arith.constant 0 : index
    %c0_64 = arith.constant 0 : index
    %91 = vector.load %arg13[%90, %c0_63, %c0_64] : memref<8x8x32xf32, #tpu.memory_space<vmem>>, vector<1x8x32xf32>
    %92 = vector.shape_cast %91 : vector<1x8x32xf32> to vector<8x32xf32>
    %93 = arith.addf %92, %77 : vector<8x32xf32>
    %cst_65 = arith.constant 0.000000e+00 : f32
    %94 = vector.broadcast %cst_65 : f32 to vector<8x32xf32>
    %95 = arith.subf %94, %93 : vector<8x32xf32>
    %96 = math.exp %95 : vector<8x32xf32>
    %cst_66 = arith.constant 1.000000e+00 : f32
    %97 = vector.broadcast %cst_66 : f32 to vector<8x32xf32>
    %98 = arith.addf %97, %96 : vector<8x32xf32>
    %cst_67 = arith.constant 1.000000e+00 : f32
    %99 = vector.broadcast %cst_67 : f32 to vector<8x32xf32>
    %100 = arith.divf %99, %98 : vector<8x32xf32>
    %101 = arith.index_cast %c1_i32 : i32 to index
    %c0_68 = arith.constant 0 : index
    %c0_69 = arith.constant 0 : index
    %102 = vector.load %arg14[%101, %c0_68, %c0_69] : memref<8x8x32xf32, #tpu.memory_space<vmem>>, vector<1x8x32xf32>
    %103 = vector.shape_cast %102 : vector<1x8x32xf32> to vector<8x32xf32>
    %104 = vector.broadcast %15 : vector<1x32xf32> to vector<8x32xf32>
    %105 = arith.addf %78, %104 : vector<8x32xf32>
    %106 = arith.mulf %89, %105 : vector<8x32xf32>
    %107 = arith.addf %103, %106 : vector<8x32xf32>
    %108 = math.tanh %107 : vector<8x32xf32>
    %cst_70 = arith.constant 1.000000e+00 : f32
    %109 = vector.broadcast %cst_70 : f32 to vector<8x32xf32>
    %110 = arith.subf %109, %100 : vector<8x32xf32>
    %111 = arith.mulf %110, %108 : vector<8x32xf32>
    %112 = arith.mulf %100, %71 : vector<8x32xf32>
    %113 = arith.addf %111, %112 : vector<8x32xf32>
    %114 = arith.index_cast %c1_i32 : i32 to index
    %c0_71 = arith.constant 0 : index
    %c0_72 = arith.constant 0 : index
    %115 = vector.load %arg11[%114, %c0_71, %c0_72] : memref<8x8x32xf32, #tpu.memory_space<vmem>>, vector<1x8x32xf32>
    %116 = vector.shape_cast %115 : vector<1x8x32xf32> to vector<8x32xf32>
    %117 = vector.shape_cast %113 : vector<8x32xf32> to vector<1x8x32xf32>
    tpu.vector_store %arg11[%114, %c0_71, %c0_72], %117 {strides = array<i32>} : memref<8x8x32xf32, #tpu.memory_space<vmem>>, vector<1x8x32xf32>,
    %c2_i32 = arith.constant 2 : i32
    %cst_73 = arith.constant dense<0.000000e+00> : vector<8x32xf32>
    %118 = tpu.matmul %113, %7, %cst_73 {dimension_numbers = #tpu.dot_dimension_numbers<[1], [0], [0], [1], [0, 0, 1, 1], [], []>} : vector<8x32xf32>, vector<32x32xf32>, vector<8x32xf32> -> vector<8x32xf32>
    %cst_74 = arith.constant dense<0.000000e+00> : vector<8x32xf32>
    %119 = tpu.matmul %113, %9, %cst_74 {dimension_numbers = #tpu.dot_dimension_numbers<[1], [0], [0], [1], [0, 0, 1, 1], [], []>} : vector<8x32xf32>, vector<32x32xf32>, vector<8x32xf32> -> vector<8x32xf32>
    %cst_75 = arith.constant dense<0.000000e+00> : vector<8x32xf32>
    %120 = tpu.matmul %113, %11, %cst_75 {dimension_numbers = #tpu.dot_dimension_numbers<[1], [0], [0], [1], [0, 0, 1, 1], [], []>} : vector<8x32xf32>, vector<32x32xf32>, vector<8x32xf32> -> vector<8x32xf32>
    %121 = arith.index_cast %c2_i32 : i32 to index
    %c0_76 = arith.constant 0 : index
    %c0_77 = arith.constant 0 : index
    %122 = vector.load %arg12[%121, %c0_76, %c0_77] : memref<8x8x32xf32, #tpu.memory_space<vmem>>, vector<1x8x32xf32>
    %123 = vector.shape_cast %122 : vector<1x8x32xf32> to vector<8x32xf32>
    %124 = arith.addf %123, %118 : vector<8x32xf32>
    %cst_78 = arith.constant 0.000000e+00 : f32
    %125 = vector.broadcast %cst_78 : f32 to vector<8x32xf32>
    %126 = arith.subf %125, %124 : vector<8x32xf32>
    %127 = math.exp %126 : vector<8x32xf32>
    %cst_79 = arith.constant 1.000000e+00 : f32
    %128 = vector.broadcast %cst_79 : f32 to vector<8x32xf32>
    %129 = arith.addf %128, %127 : vector<8x32xf32>
    %cst_80 = arith.constant 1.000000e+00 : f32
    %130 = vector.broadcast %cst_80 : f32 to vector<8x32xf32>
    %131 = arith.divf %130, %129 : vector<8x32xf32>
    %132 = arith.index_cast %c2_i32 : i32 to index
    %c0_81 = arith.constant 0 : index
    %c0_82 = arith.constant 0 : index
    %133 = vector.load %arg13[%132, %c0_81, %c0_82] : memref<8x8x32xf32, #tpu.memory_space<vmem>>, vector<1x8x32xf32>
    %134 = vector.shape_cast %133 : vector<1x8x32xf32> to vector<8x32xf32>
    %135 = arith.addf %134, %119 : vector<8x32xf32>
    %cst_83 = arith.constant 0.000000e+00 : f32
    %136 = vector.broadcast %cst_83 : f32 to vector<8x32xf32>
    %137 = arith.subf %136, %135 : vector<8x32xf32>
    %138 = math.exp %137 : vector<8x32xf32>
    %cst_84 = arith.constant 1.000000e+00 : f32
    %139 = vector.broadcast %cst_84 : f32 to vector<8x32xf32>
    %140 = arith.addf %139, %138 : vector<8x32xf32>
    %cst_85 = arith.constant 1.000000e+00 : f32
    %141 = vector.broadcast %cst_85 : f32 to vector<8x32xf32>
    %142 = arith.divf %141, %140 : vector<8x32xf32>
    %143 = arith.index_cast %c2_i32 : i32 to index
    %c0_86 = arith.constant 0 : index
    %c0_87 = arith.constant 0 : index
    %144 = vector.load %arg14[%143, %c0_86, %c0_87] : memref<8x8x32xf32, #tpu.memory_space<vmem>>, vector<1x8x32xf32>
    %145 = vector.shape_cast %144 : vector<1x8x32xf32> to vector<8x32xf32>
    %146 = vector.broadcast %15 : vector<1x32xf32> to vector<8x32xf32>
    %147 = arith.addf %120, %146 : vector<8x32xf32>
    %148 = arith.mulf %131, %147 : vector<8x32xf32>
    %149 = arith.addf %145, %148 : vector<8x32xf32>
    %150 = math.tanh %149 : vector<8x32xf32>
    %cst_88 = arith.constant 1.000000e+00 : f32
    %151 = vector.broadcast %cst_88 : f32 to vector<8x32xf32>
    %152 = arith.subf %151, %142 : vector<8x32xf32>
    %153 = arith.mulf %152, %150 : vector<8x32xf32>
    %154 = arith.mulf %142, %113 : vector<8x32xf32>
    %155 = arith.addf %153, %154 : vector<8x32xf32>
    %156 = arith.index_cast %c2_i32 : i32 to index
    %c0_89 = arith.constant 0 : index
    %c0_90 = arith.constant 0 : index
    %157 = vector.load %arg11[%156, %c0_89, %c0_90] : memref<8x8x32xf32, #tpu.memory_space<vmem>>, vector<1x8x32xf32>
    %158 = vector.shape_cast %157 : vector<1x8x32xf32> to vector<8x32xf32>
    %159 = vector.shape_cast %155 : vector<8x32xf32> to vector<1x8x32xf32>
    tpu.vector_store %arg11[%156, %c0_89, %c0_90], %159 {strides = array<i32>} : memref<8x8x32xf32, #tpu.memory_space<vmem>>, vector<1x8x32xf32>,
    %c3_i32 = arith.constant 3 : i32
    %cst_91 = arith.constant dense<0.000000e+00> : vector<8x32xf32>
    %160 = tpu.matmul %155, %7, %cst_91 {dimension_numbers = #tpu.dot_dimension_numbers<[1], [0], [0], [1], [0, 0, 1, 1], [], []>} : vector<8x32xf32>, vector<32x32xf32>, vector<8x32xf32> -> vector<8x32xf32>
    %cst_92 = arith.constant dense<0.000000e+00> : vector<8x32xf32>
    %161 = tpu.matmul %155, %9, %cst_92 {dimension_numbers = #tpu.dot_dimension_numbers<[1], [0], [0], [1], [0, 0, 1, 1], [], []>} : vector<8x32xf32>, vector<32x32xf32>, vector<8x32xf32> -> vector<8x32xf32>
    %cst_93 = arith.constant dense<0.000000e+00> : vector<8x32xf32>
    %162 = tpu.matmul %155, %11, %cst_93 {dimension_numbers = #tpu.dot_dimension_numbers<[1], [0], [0], [1], [0, 0, 1, 1], [], []>} : vector<8x32xf32>, vector<32x32xf32>, vector<8x32xf32> -> vector<8x32xf32>
    %163 = arith.index_cast %c3_i32 : i32 to index
    %c0_94 = arith.constant 0 : index
    %c0_95 = arith.constant 0 : index
    %164 = vector.load %arg12[%163, %c0_94, %c0_95] : memref<8x8x32xf32, #tpu.memory_space<vmem>>, vector<1x8x32xf32>
    %165 = vector.shape_cast %164 : vector<1x8x32xf32> to vector<8x32xf32>
    %166 = arith.addf %165, %160 : vector<8x32xf32>
    %cst_96 = arith.constant 0.000000e+00 : f32
    %167 = vector.broadcast %cst_96 : f32 to vector<8x32xf32>
    %168 = arith.subf %167, %166 : vector<8x32xf32>
    %169 = math.exp %168 : vector<8x32xf32>
    %cst_97 = arith.constant 1.000000e+00 : f32
    %170 = vector.broadcast %cst_97 : f32 to vector<8x32xf32>
    %171 = arith.addf %170, %169 : vector<8x32xf32>
    %cst_98 = arith.constant 1.000000e+00 : f32
    %172 = vector.broadcast %cst_98 : f32 to vector<8x32xf32>
    %173 = arith.divf %172, %171 : vector<8x32xf32>
    %174 = arith.index_cast %c3_i32 : i32 to index
    %c0_99 = arith.constant 0 : index
    %c0_100 = arith.constant 0 : index
    %175 = vector.load %arg13[%174, %c0_99, %c0_100] : memref<8x8x32xf32, #tpu.memory_space<vmem>>, vector<1x8x32xf32>
    %176 = vector.shape_cast %175 : vector<1x8x32xf32> to vector<8x32xf32>
    %177 = arith.addf %176, %161 : vector<8x32xf32>
    %cst_101 = arith.constant 0.000000e+00 : f32
    %178 = vector.broadcast %cst_101 : f32 to vector<8x32xf32>
    %179 = arith.subf %178, %177 : vector<8x32xf32>
    %180 = math.exp %179 : vector<8x32xf32>
    %cst_102 = arith.constant 1.000000e+00 : f32
    %181 = vector.broadcast %cst_102 : f32 to vector<8x32xf32>
    %182 = arith.addf %181, %180 : vector<8x32xf32>
    %cst_103 = arith.constant 1.000000e+00 : f32
    %183 = vector.broadcast %cst_103 : f32 to vector<8x32xf32>
    %184 = arith.divf %183, %182 : vector<8x32xf32>
    %185 = arith.index_cast %c3_i32 : i32 to index
    %c0_104 = arith.constant 0 : index
    %c0_105 = arith.constant 0 : index
    %186 = vector.load %arg14[%185, %c0_104, %c0_105] : memref<8x8x32xf32, #tpu.memory_space<vmem>>, vector<1x8x32xf32>
    %187 = vector.shape_cast %186 : vector<1x8x32xf32> to vector<8x32xf32>
    %188 = vector.broadcast %15 : vector<1x32xf32> to vector<8x32xf32>
    %189 = arith.addf %162, %188 : vector<8x32xf32>
    %190 = arith.mulf %173, %189 : vector<8x32xf32>
    %191 = arith.addf %187, %190 : vector<8x32xf32>
    %192 = math.tanh %191 : vector<8x32xf32>
    %cst_106 = arith.constant 1.000000e+00 : f32
    %193 = vector.broadcast %cst_106 : f32 to vector<8x32xf32>
    %194 = arith.subf %193, %184 : vector<8x32xf32>
    %195 = arith.mulf %194, %192 : vector<8x32xf32>
    %196 = arith.mulf %184, %155 : vector<8x32xf32>
    %197 = arith.addf %195, %196 : vector<8x32xf32>
    %198 = arith.index_cast %c3_i32 : i32 to index
    %c0_107 = arith.constant 0 : index
    %c0_108 = arith.constant 0 : index
    %199 = vector.load %arg11[%198, %c0_107, %c0_108] : memref<8x8x32xf32, #tpu.memory_space<vmem>>, vector<1x8x32xf32>
    %200 = vector.shape_cast %199 : vector<1x8x32xf32> to vector<8x32xf32>
    %201 = vector.shape_cast %197 : vector<8x32xf32> to vector<1x8x32xf32>
    tpu.vector_store %arg11[%198, %c0_107, %c0_108], %201 {strides = array<i32>} : memref<8x8x32xf32, #tpu.memory_space<vmem>>, vector<1x8x32xf32>,
    %c4_i32 = arith.constant 4 : i32
    %cst_109 = arith.constant dense<0.000000e+00> : vector<8x32xf32>
    %202 = tpu.matmul %197, %7, %cst_109 {dimension_numbers = #tpu.dot_dimension_numbers<[1], [0], [0], [1], [0, 0, 1, 1], [], []>} : vector<8x32xf32>, vector<32x32xf32>, vector<8x32xf32> -> vector<8x32xf32>
    %cst_110 = arith.constant dense<0.000000e+00> : vector<8x32xf32>
    %203 = tpu.matmul %197, %9, %cst_110 {dimension_numbers = #tpu.dot_dimension_numbers<[1], [0], [0], [1], [0, 0, 1, 1], [], []>} : vector<8x32xf32>, vector<32x32xf32>, vector<8x32xf32> -> vector<8x32xf32>
    %cst_111 = arith.constant dense<0.000000e+00> : vector<8x32xf32>
    %204 = tpu.matmul %197, %11, %cst_111 {dimension_numbers = #tpu.dot_dimension_numbers<[1], [0], [0], [1], [0, 0, 1, 1], [], []>} : vector<8x32xf32>, vector<32x32xf32>, vector<8x32xf32> -> vector<8x32xf32>
    %205 = arith.index_cast %c4_i32 : i32 to index
    %c0_112 = arith.constant 0 : index
    %c0_113 = arith.constant 0 : index
    %206 = vector.load %arg12[%205, %c0_112, %c0_113] : memref<8x8x32xf32, #tpu.memory_space<vmem>>, vector<1x8x32xf32>
    %207 = vector.shape_cast %206 : vector<1x8x32xf32> to vector<8x32xf32>
    %208 = arith.addf %207, %202 : vector<8x32xf32>
    %cst_114 = arith.constant 0.000000e+00 : f32
    %209 = vector.broadcast %cst_114 : f32 to vector<8x32xf32>
    %210 = arith.subf %209, %208 : vector<8x32xf32>
    %211 = math.exp %210 : vector<8x32xf32>
    %cst_115 = arith.constant 1.000000e+00 : f32
    %212 = vector.broadcast %cst_115 : f32 to vector<8x32xf32>
    %213 = arith.addf %212, %211 : vector<8x32xf32>
    %cst_116 = arith.constant 1.000000e+00 : f32
    %214 = vector.broadcast %cst_116 : f32 to vector<8x32xf32>
    %215 = arith.divf %214, %213 : vector<8x32xf32>
    %216 = arith.index_cast %c4_i32 : i32 to index
    %c0_117 = arith.constant 0 : index
    %c0_118 = arith.constant 0 : index
    %217 = vector.load %arg13[%216, %c0_117, %c0_118] : memref<8x8x32xf32, #tpu.memory_space<vmem>>, vector<1x8x32xf32>
    %218 = vector.shape_cast %217 : vector<1x8x32xf32> to vector<8x32xf32>
    %219 = arith.addf %218, %203 : vector<8x32xf32>
    %cst_119 = arith.constant 0.000000e+00 : f32
    %220 = vector.broadcast %cst_119 : f32 to vector<8x32xf32>
    %221 = arith.subf %220, %219 : vector<8x32xf32>
    %222 = math.exp %221 : vector<8x32xf32>
    %cst_120 = arith.constant 1.000000e+00 : f32
    %223 = vector.broadcast %cst_120 : f32 to vector<8x32xf32>
    %224 = arith.addf %223, %222 : vector<8x32xf32>
    %cst_121 = arith.constant 1.000000e+00 : f32
    %225 = vector.broadcast %cst_121 : f32 to vector<8x32xf32>
    %226 = arith.divf %225, %224 : vector<8x32xf32>
    %227 = arith.index_cast %c4_i32 : i32 to index
    %c0_122 = arith.constant 0 : index
    %c0_123 = arith.constant 0 : index
    %228 = vector.load %arg14[%227, %c0_122, %c0_123] : memref<8x8x32xf32, #tpu.memory_space<vmem>>, vector<1x8x32xf32>
    %229 = vector.shape_cast %228 : vector<1x8x32xf32> to vector<8x32xf32>
    %230 = vector.broadcast %15 : vector<1x32xf32> to vector<8x32xf32>
    %231 = arith.addf %204, %230 : vector<8x32xf32>
    %232 = arith.mulf %215, %231 : vector<8x32xf32>
    %233 = arith.addf %229, %232 : vector<8x32xf32>
    %234 = math.tanh %233 : vector<8x32xf32>
    %cst_124 = arith.constant 1.000000e+00 : f32
    %235 = vector.broadcast %cst_124 : f32 to vector<8x32xf32>
    %236 = arith.subf %235, %226 : vector<8x32xf32>
    %237 = arith.mulf %236, %234 : vector<8x32xf32>
    %238 = arith.mulf %226, %197 : vector<8x32xf32>
    %239 = arith.addf %237, %238 : vector<8x32xf32>
    %240 = arith.index_cast %c4_i32 : i32 to index
    %c0_125 = arith.constant 0 : index
    %c0_126 = arith.constant 0 : index
    %241 = vector.load %arg11[%240, %c0_125, %c0_126] : memref<8x8x32xf32, #tpu.memory_space<vmem>>, vector<1x8x32xf32>
    %242 = vector.shape_cast %241 : vector<1x8x32xf32> to vector<8x32xf32>
    %243 = vector.shape_cast %239 : vector<8x32xf32> to vector<1x8x32xf32>
    tpu.vector_store %arg11[%240, %c0_125, %c0_126], %243 {strides = array<i32>} : memref<8x8x32xf32, #tpu.memory_space<vmem>>, vector<1x8x32xf32>,
    %c5_i32 = arith.constant 5 : i32
    %cst_127 = arith.constant dense<0.000000e+00> : vector<8x32xf32>
    %244 = tpu.matmul %239, %7, %cst_127 {dimension_numbers = #tpu.dot_dimension_numbers<[1], [0], [0], [1], [0, 0, 1, 1], [], []>} : vector<8x32xf32>, vector<32x32xf32>, vector<8x32xf32> -> vector<8x32xf32>
    %cst_128 = arith.constant dense<0.000000e+00> : vector<8x32xf32>
    %245 = tpu.matmul %239, %9, %cst_128 {dimension_numbers = #tpu.dot_dimension_numbers<[1], [0], [0], [1], [0, 0, 1, 1], [], []>} : vector<8x32xf32>, vector<32x32xf32>, vector<8x32xf32> -> vector<8x32xf32>
    %cst_129 = arith.constant dense<0.000000e+00> : vector<8x32xf32>
    %246 = tpu.matmul %239, %11, %cst_129 {dimension_numbers = #tpu.dot_dimension_numbers<[1], [0], [0], [1], [0, 0, 1, 1], [], []>} : vector<8x32xf32>, vector<32x32xf32>, vector<8x32xf32> -> vector<8x32xf32>
    %247 = arith.index_cast %c5_i32 : i32 to index
    %c0_130 = arith.constant 0 : index
    %c0_131 = arith.constant 0 : index
    %248 = vector.load %arg12[%247, %c0_130, %c0_131] : memref<8x8x32xf32, #tpu.memory_space<vmem>>, vector<1x8x32xf32>
    %249 = vector.shape_cast %248 : vector<1x8x32xf32> to vector<8x32xf32>
    %250 = arith.addf %249, %244 : vector<8x32xf32>
    %cst_132 = arith.constant 0.000000e+00 : f32
    %251 = vector.broadcast %cst_132 : f32 to vector<8x32xf32>
    %252 = arith.subf %251, %250 : vector<8x32xf32>
    %253 = math.exp %252 : vector<8x32xf32>
    %cst_133 = arith.constant 1.000000e+00 : f32
    %254 = vector.broadcast %cst_133 : f32 to vector<8x32xf32>
    %255 = arith.addf %254, %253 : vector<8x32xf32>
    %cst_134 = arith.constant 1.000000e+00 : f32
    %256 = vector.broadcast %cst_134 : f32 to vector<8x32xf32>
    %257 = arith.divf %256, %255 : vector<8x32xf32>
    %258 = arith.index_cast %c5_i32 : i32 to index
    %c0_135 = arith.constant 0 : index
    %c0_136 = arith.constant 0 : index
    %259 = vector.load %arg13[%258, %c0_135, %c0_136] : memref<8x8x32xf32, #tpu.memory_space<vmem>>, vector<1x8x32xf32>
    %260 = vector.shape_cast %259 : vector<1x8x32xf32> to vector<8x32xf32>
    %261 = arith.addf %260, %245 : vector<8x32xf32>
    %cst_137 = arith.constant 0.000000e+00 : f32
    %262 = vector.broadcast %cst_137 : f32 to vector<8x32xf32>
    %263 = arith.subf %262, %261 : vector<8x32xf32>
    %264 = math.exp %263 : vector<8x32xf32>
    %cst_138 = arith.constant 1.000000e+00 : f32
    %265 = vector.broadcast %cst_138 : f32 to vector<8x32xf32>
    %266 = arith.addf %265, %264 : vector<8x32xf32>
    %cst_139 = arith.constant 1.000000e+00 : f32
    %267 = vector.broadcast %cst_139 : f32 to vector<8x32xf32>
    %268 = arith.divf %267, %266 : vector<8x32xf32>
    %269 = arith.index_cast %c5_i32 : i32 to index
    %c0_140 = arith.constant 0 : index
    %c0_141 = arith.constant 0 : index
    %270 = vector.load %arg14[%269, %c0_140, %c0_141] : memref<8x8x32xf32, #tpu.memory_space<vmem>>, vector<1x8x32xf32>
    %271 = vector.shape_cast %270 : vector<1x8x32xf32> to vector<8x32xf32>
    %272 = vector.broadcast %15 : vector<1x32xf32> to vector<8x32xf32>
    %273 = arith.addf %246, %272 : vector<8x32xf32>
    %274 = arith.mulf %257, %273 : vector<8x32xf32>
    %275 = arith.addf %271, %274 : vector<8x32xf32>
    %276 = math.tanh %275 : vector<8x32xf32>
    %cst_142 = arith.constant 1.000000e+00 : f32
    %277 = vector.broadcast %cst_142 : f32 to vector<8x32xf32>
    %278 = arith.subf %277, %268 : vector<8x32xf32>
    %279 = arith.mulf %278, %276 : vector<8x32xf32>
    %280 = arith.mulf %268, %239 : vector<8x32xf32>
    %281 = arith.addf %279, %280 : vector<8x32xf32>
    %282 = arith.index_cast %c5_i32 : i32 to index
    %c0_143 = arith.constant 0 : index
    %c0_144 = arith.constant 0 : index
    %283 = vector.load %arg11[%282, %c0_143, %c0_144] : memref<8x8x32xf32, #tpu.memory_space<vmem>>, vector<1x8x32xf32>
    %284 = vector.shape_cast %283 : vector<1x8x32xf32> to vector<8x32xf32>
    %285 = vector.shape_cast %281 : vector<8x32xf32> to vector<1x8x32xf32>
    tpu.vector_store %arg11[%282, %c0_143, %c0_144], %285 {strides = array<i32>} : memref<8x8x32xf32, #tpu.memory_space<vmem>>, vector<1x8x32xf32>,
    %c6_i32 = arith.constant 6 : i32
    %cst_145 = arith.constant dense<0.000000e+00> : vector<8x32xf32>
    %286 = tpu.matmul %281, %7, %cst_145 {dimension_numbers = #tpu.dot_dimension_numbers<[1], [0], [0], [1], [0, 0, 1, 1], [], []>} : vector<8x32xf32>, vector<32x32xf32>, vector<8x32xf32> -> vector<8x32xf32>
    %cst_146 = arith.constant dense<0.000000e+00> : vector<8x32xf32>
    %287 = tpu.matmul %281, %9, %cst_146 {dimension_numbers = #tpu.dot_dimension_numbers<[1], [0], [0], [1], [0, 0, 1, 1], [], []>} : vector<8x32xf32>, vector<32x32xf32>, vector<8x32xf32> -> vector<8x32xf32>
    %cst_147 = arith.constant dense<0.000000e+00> : vector<8x32xf32>
    %288 = tpu.matmul %281, %11, %cst_147 {dimension_numbers = #tpu.dot_dimension_numbers<[1], [0], [0], [1], [0, 0, 1, 1], [], []>} : vector<8x32xf32>, vector<32x32xf32>, vector<8x32xf32> -> vector<8x32xf32>
    %289 = arith.index_cast %c6_i32 : i32 to index
    %c0_148 = arith.constant 0 : index
    %c0_149 = arith.constant 0 : index
    %290 = vector.load %arg12[%289, %c0_148, %c0_149] : memref<8x8x32xf32, #tpu.memory_space<vmem>>, vector<1x8x32xf32>
    %291 = vector.shape_cast %290 : vector<1x8x32xf32> to vector<8x32xf32>
    %292 = arith.addf %291, %286 : vector<8x32xf32>
    %cst_150 = arith.constant 0.000000e+00 : f32
    %293 = vector.broadcast %cst_150 : f32 to vector<8x32xf32>
    %294 = arith.subf %293, %292 : vector<8x32xf32>
    %295 = math.exp %294 : vector<8x32xf32>
    %cst_151 = arith.constant 1.000000e+00 : f32
    %296 = vector.broadcast %cst_151 : f32 to vector<8x32xf32>
    %297 = arith.addf %296, %295 : vector<8x32xf32>
    %cst_152 = arith.constant 1.000000e+00 : f32
    %298 = vector.broadcast %cst_152 : f32 to vector<8x32xf32>
    %299 = arith.divf %298, %297 : vector<8x32xf32>
    %300 = arith.index_cast %c6_i32 : i32 to index
    %c0_153 = arith.constant 0 : index
    %c0_154 = arith.constant 0 : index
    %301 = vector.load %arg13[%300, %c0_153, %c0_154] : memref<8x8x32xf32, #tpu.memory_space<vmem>>, vector<1x8x32xf32>
    %302 = vector.shape_cast %301 : vector<1x8x32xf32> to vector<8x32xf32>
    %303 = arith.addf %302, %287 : vector<8x32xf32>
    %cst_155 = arith.constant 0.000000e+00 : f32
    %304 = vector.broadcast %cst_155 : f32 to vector<8x32xf32>
    %305 = arith.subf %304, %303 : vector<8x32xf32>
    %306 = math.exp %305 : vector<8x32xf32>
    %cst_156 = arith.constant 1.000000e+00 : f32
    %307 = vector.broadcast %cst_156 : f32 to vector<8x32xf32>
    %308 = arith.addf %307, %306 : vector<8x32xf32>
    %cst_157 = arith.constant 1.000000e+00 : f32
    %309 = vector.broadcast %cst_157 : f32 to vector<8x32xf32>
    %310 = arith.divf %309, %308 : vector<8x32xf32>
    %311 = arith.index_cast %c6_i32 : i32 to index
    %c0_158 = arith.constant 0 : index
    %c0_159 = arith.constant 0 : index
    %312 = vector.load %arg14[%311, %c0_158, %c0_159] : memref<8x8x32xf32, #tpu.memory_space<vmem>>, vector<1x8x32xf32>
    %313 = vector.shape_cast %312 : vector<1x8x32xf32> to vector<8x32xf32>
    %314 = vector.broadcast %15 : vector<1x32xf32> to vector<8x32xf32>
    %315 = arith.addf %288, %314 : vector<8x32xf32>
    %316 = arith.mulf %299, %315 : vector<8x32xf32>
    %317 = arith.addf %313, %316 : vector<8x32xf32>
    %318 = math.tanh %317 : vector<8x32xf32>
    %cst_160 = arith.constant 1.000000e+00 : f32
    %319 = vector.broadcast %cst_160 : f32 to vector<8x32xf32>
    %320 = arith.subf %319, %310 : vector<8x32xf32>
    %321 = arith.mulf %320, %318 : vector<8x32xf32>
    %322 = arith.mulf %310, %281 : vector<8x32xf32>
    %323 = arith.addf %321, %322 : vector<8x32xf32>
    %324 = arith.index_cast %c6_i32 : i32 to index
    %c0_161 = arith.constant 0 : index
    %c0_162 = arith.constant 0 : index
    %325 = vector.load %arg11[%324, %c0_161, %c0_162] : memref<8x8x32xf32, #tpu.memory_space<vmem>>, vector<1x8x32xf32>
    %326 = vector.shape_cast %325 : vector<1x8x32xf32> to vector<8x32xf32>
    %327 = vector.shape_cast %323 : vector<8x32xf32> to vector<1x8x32xf32>
    tpu.vector_store %arg11[%324, %c0_161, %c0_162], %327 {strides = array<i32>} : memref<8x8x32xf32, #tpu.memory_space<vmem>>, vector<1x8x32xf32>,
    %c7_i32 = arith.constant 7 : i32
    %cst_163 = arith.constant dense<0.000000e+00> : vector<8x32xf32>
    %328 = tpu.matmul %323, %7, %cst_163 {dimension_numbers = #tpu.dot_dimension_numbers<[1], [0], [0], [1], [0, 0, 1, 1], [], []>} : vector<8x32xf32>, vector<32x32xf32>, vector<8x32xf32> -> vector<8x32xf32>
    %cst_164 = arith.constant dense<0.000000e+00> : vector<8x32xf32>
    %329 = tpu.matmul %323, %9, %cst_164 {dimension_numbers = #tpu.dot_dimension_numbers<[1], [0], [0], [1], [0, 0, 1, 1], [], []>} : vector<8x32xf32>, vector<32x32xf32>, vector<8x32xf32> -> vector<8x32xf32>
    %cst_165 = arith.constant dense<0.000000e+00> : vector<8x32xf32>
    %330 = tpu.matmul %323, %11, %cst_165 {dimension_numbers = #tpu.dot_dimension_numbers<[1], [0], [0], [1], [0, 0, 1, 1], [], []>} : vector<8x32xf32>, vector<32x32xf32>, vector<8x32xf32> -> vector<8x32xf32>
    %331 = arith.index_cast %c7_i32 : i32 to index
    %c0_166 = arith.constant 0 : index
    %c0_167 = arith.constant 0 : index
    %332 = vector.load %arg12[%331, %c0_166, %c0_167] : memref<8x8x32xf32, #tpu.memory_space<vmem>>, vector<1x8x32xf32>
    %333 = vector.shape_cast %332 : vector<1x8x32xf32> to vector<8x32xf32>
    %334 = arith.addf %333, %328 : vector<8x32xf32>
    %cst_168 = arith.constant 0.000000e+00 : f32
    %335 = vector.broadcast %cst_168 : f32 to vector<8x32xf32>
    %336 = arith.subf %335, %334 : vector<8x32xf32>
    %337 = math.exp %336 : vector<8x32xf32>
    %cst_169 = arith.constant 1.000000e+00 : f32
    %338 = vector.broadcast %cst_169 : f32 to vector<8x32xf32>
    %339 = arith.addf %338, %337 : vector<8x32xf32>
    %cst_170 = arith.constant 1.000000e+00 : f32
    %340 = vector.broadcast %cst_170 : f32 to vector<8x32xf32>
    %341 = arith.divf %340, %339 : vector<8x32xf32>
    %342 = arith.index_cast %c7_i32 : i32 to index
    %c0_171 = arith.constant 0 : index
    %c0_172 = arith.constant 0 : index
    %343 = vector.load %arg13[%342, %c0_171, %c0_172] : memref<8x8x32xf32, #tpu.memory_space<vmem>>, vector<1x8x32xf32>
    %344 = vector.shape_cast %343 : vector<1x8x32xf32> to vector<8x32xf32>
    %345 = arith.addf %344, %329 : vector<8x32xf32>
    %cst_173 = arith.constant 0.000000e+00 : f32
    %346 = vector.broadcast %cst_173 : f32 to vector<8x32xf32>
    %347 = arith.subf %346, %345 : vector<8x32xf32>
    %348 = math.exp %347 : vector<8x32xf32>
    %cst_174 = arith.constant 1.000000e+00 : f32
    %349 = vector.broadcast %cst_174 : f32 to vector<8x32xf32>
    %350 = arith.addf %349, %348 : vector<8x32xf32>
    %cst_175 = arith.constant 1.000000e+00 : f32
    %351 = vector.broadcast %cst_175 : f32 to vector<8x32xf32>
    %352 = arith.divf %351, %350 : vector<8x32xf32>
    %353 = arith.index_cast %c7_i32 : i32 to index
    %c0_176 = arith.constant 0 : index
    %c0_177 = arith.constant 0 : index
    %354 = vector.load %arg14[%353, %c0_176, %c0_177] : memref<8x8x32xf32, #tpu.memory_space<vmem>>, vector<1x8x32xf32>
    %355 = vector.shape_cast %354 : vector<1x8x32xf32> to vector<8x32xf32>
    %356 = vector.broadcast %15 : vector<1x32xf32> to vector<8x32xf32>
    %357 = arith.addf %330, %356 : vector<8x32xf32>
    %358 = arith.mulf %341, %357 : vector<8x32xf32>
    %359 = arith.addf %355, %358 : vector<8x32xf32>
    %360 = math.tanh %359 : vector<8x32xf32>
    %cst_178 = arith.constant 1.000000e+00 : f32
    %361 = vector.broadcast %cst_178 : f32 to vector<8x32xf32>
    %362 = arith.subf %361, %352 : vector<8x32xf32>
    %363 = arith.mulf %362, %360 : vector<8x32xf32>
    %364 = arith.mulf %352, %323 : vector<8x32xf32>
    %365 = arith.addf %363, %364 : vector<8x32xf32>
    %366 = arith.index_cast %c7_i32 : i32 to index
    %c0_179 = arith.constant 0 : index
    %c0_180 = arith.constant 0 : index
    %367 = vector.load %arg11[%366, %c0_179, %c0_180] : memref<8x8x32xf32, #tpu.memory_space<vmem>>, vector<1x8x32xf32>
    %368 = vector.shape_cast %367 : vector<1x8x32xf32> to vector<8x32xf32>
    %369 = vector.shape_cast %365 : vector<8x32xf32> to vector<1x8x32xf32>
    tpu.vector_store %arg11[%366, %c0_179, %c0_180], %369 {strides = array<i32>} : memref<8x8x32xf32, #tpu.memory_space<vmem>>, vector<1x8x32xf32>,
    %c8_i32 = arith.constant 8 : i32
    %c0_181 = arith.constant 0 : index
    %c0_182 = arith.constant 0 : index
    %c0_183 = arith.constant 0 : index
    %370 = vector.load %arg5[%c0_181, %c0_182, %c0_183] : memref<3x32x32xf32, #tpu.memory_space<vmem>>, vector<1x32x32xf32>
    %371 = vector.shape_cast %370 : vector<1x32x32xf32> to vector<32x32xf32>
    %c1_184 = arith.constant 1 : index
    %c0_185 = arith.constant 0 : index
    %c0_186 = arith.constant 0 : index
    %372 = vector.load %arg5[%c1_184, %c0_185, %c0_186] : memref<3x32x32xf32, #tpu.memory_space<vmem>>, vector<1x32x32xf32>
    %373 = vector.shape_cast %372 : vector<1x32x32xf32> to vector<32x32xf32>
    %c2_187 = arith.constant 2 : index
    %c0_188 = arith.constant 0 : index
    %c0_189 = arith.constant 0 : index
    %374 = vector.load %arg5[%c2_187, %c0_188, %c0_189] : memref<3x32x32xf32, #tpu.memory_space<vmem>>, vector<1x32x32xf32>
    %375 = vector.shape_cast %374 : vector<1x32x32xf32> to vector<32x32xf32>
    %c0_190 = arith.constant 0 : index
    %c0_191 = arith.constant 0 : index
    %c0_192 = arith.constant 0 : index
    %376 = vector.load %arg6[%c0_190, %c0_191, %c0_192] : memref<3x32x32xf32, #tpu.memory_space<vmem>>, vector<1x32x32xf32>
    %377 = vector.shape_cast %376 : vector<1x32x32xf32> to vector<32x32xf32>
    %c1_193 = arith.constant 1 : index
    %c0_194 = arith.constant 0 : index
    %c0_195 = arith.constant 0 : index
    %378 = vector.load %arg6[%c1_193, %c0_194, %c0_195] : memref<3x32x32xf32, #tpu.memory_space<vmem>>, vector<1x32x32xf32>
    %379 = vector.shape_cast %378 : vector<1x32x32xf32> to vector<32x32xf32>
    %c2_196 = arith.constant 2 : index
    %c0_197 = arith.constant 0 : index
    %c0_198 = arith.constant 0 : index
    %380 = vector.load %arg6[%c2_196, %c0_197, %c0_198] : memref<3x32x32xf32, #tpu.memory_space<vmem>>, vector<1x32x32xf32>
    %381 = vector.shape_cast %380 : vector<1x32x32xf32> to vector<32x32xf32>
    %c0_199 = arith.constant 0 : index
    %c0_200 = arith.constant 0 : index
    %382 = vector.load %arg7[%c0_199, %c0_200] : memref<4x32xf32, #tpu.memory_space<vmem>>, vector<1x32xf32>
    %c1_201 = arith.constant 1 : index
    %c0_202 = arith.constant 0 : index
    %383 = vector.load %arg7[%c1_201, %c0_202] : memref<4x32xf32, #tpu.memory_space<vmem>>, vector<1x32xf32>
    %c2_203 = arith.constant 2 : index
    %c0_204 = arith.constant 0 : index
    %384 = vector.load %arg7[%c2_203, %c0_204] : memref<4x32xf32, #tpu.memory_space<vmem>>, vector<1x32xf32>
    %c3_205 = arith.constant 3 : index
    %c0_206 = arith.constant 0 : index
    %385 = vector.load %arg7[%c3_205, %c0_206] : memref<4x32xf32, #tpu.memory_space<vmem>>, vector<1x32xf32>
    %c0_207 = arith.constant 0 : index
    %c0_208 = arith.constant 0 : index
    %c0_209 = arith.constant 0 : index
    %386 = vector.load %arg11[%c0_207, %c0_208, %c0_209] : memref<8x8x32xf32, #tpu.memory_space<vmem>>, vector<8x8x32xf32>
    %387 = vector.shape_cast %386 : vector<8x8x32xf32> to vector<64x32xf32>
    %cst_210 = arith.constant dense<0.000000e+00> : vector<64x32xf32>
    %388 = tpu.matmul %387, %371, %cst_210 {dimension_numbers = #tpu.dot_dimension_numbers<[1], [0], [0], [1], [0, 0, 1, 1], [], []>} : vector<64x32xf32>, vector<32x32xf32>, vector<64x32xf32> -> vector<64x32xf32>
    %389 = vector.broadcast %382 : vector<1x32xf32> to vector<64x32xf32>
    %390 = arith.addf %388, %389 : vector<64x32xf32>
    %391 = vector.shape_cast %390 : vector<64x32xf32> to vector<8x8x32xf32>
    %c0_211 = arith.constant 0 : index
    %c0_212 = arith.constant 0 : index
    %c0_213 = arith.constant 0 : index
    %392 = vector.load %arg12[%c0_211, %c0_212, %c0_213] : memref<8x8x32xf32, #tpu.memory_space<vmem>>, vector<8x8x32xf32>
    tpu.vector_store %arg12[%c0_211, %c0_212, %c0_213], %391 {strides = array<i32>} : memref<8x8x32xf32, #tpu.memory_space<vmem>>, vector<8x8x32xf32>,
    %cst_214 = arith.constant dense<0.000000e+00> : vector<64x32xf32>
    %393 = tpu.matmul %387, %373, %cst_214 {dimension_numbers = #tpu.dot_dimension_numbers<[1], [0], [0], [1], [0, 0, 1, 1], [], []>} : vector<64x32xf32>, vector<32x32xf32>, vector<64x32xf32> -> vector<64x32xf32>
    %394 = vector.broadcast %383 : vector<1x32xf32> to vector<64x32xf32>
    %395 = arith.addf %393, %394 : vector<64x32xf32>
    %396 = vector.shape_cast %395 : vector<64x32xf32> to vector<8x8x32xf32>
    %c0_215 = arith.constant 0 : index
    %c0_216 = arith.constant 0 : index
    %c0_217 = arith.constant 0 : index
    %397 = vector.load %arg13[%c0_215, %c0_216, %c0_217] : memref<8x8x32xf32, #tpu.memory_space<vmem>>, vector<8x8x32xf32>
    tpu.vector_store %arg13[%c0_215, %c0_216, %c0_217], %396 {strides = array<i32>} : memref<8x8x32xf32, #tpu.memory_space<vmem>>, vector<8x8x32xf32>,
    %cst_218 = arith.constant dense<0.000000e+00> : vector<64x32xf32>
    %398 = tpu.matmul %387, %375, %cst_218 {dimension_numbers = #tpu.dot_dimension_numbers<[1], [0], [0], [1], [0, 0, 1, 1], [], []>} : vector<64x32xf32>, vector<32x32xf32>, vector<64x32xf32> -> vector<64x32xf32>
    %399 = vector.broadcast %384 : vector<1x32xf32> to vector<64x32xf32>
    %400 = arith.addf %398, %399 : vector<64x32xf32>
    %401 = vector.shape_cast %400 : vector<64x32xf32> to vector<8x8x32xf32>
    %c0_219 = arith.constant 0 : index
    %c0_220 = arith.constant 0 : index
    %c0_221 = arith.constant 0 : index
    %402 = vector.load %arg14[%c0_219, %c0_220, %c0_221] : memref<8x8x32xf32, #tpu.memory_space<vmem>>, vector<8x8x32xf32>
    tpu.vector_store %arg14[%c0_219, %c0_220, %c0_221], %401 {strides = array<i32>} : memref<8x8x32xf32, #tpu.memory_space<vmem>>, vector<8x8x32xf32>,
    %cst_222 = arith.constant 0.000000e+00 : f32
    %403 = vector.broadcast %cst_222 : f32 to vector<8x32xf32>
    %c0_i32_223 = arith.constant 0 : i32
    %cst_224 = arith.constant dense<0.000000e+00> : vector<8x32xf32>
    %404 = tpu.matmul %403, %377, %cst_224 {dimension_numbers = #tpu.dot_dimension_numbers<[1], [0], [0], [1], [0, 0, 1, 1], [], []>} : vector<8x32xf32>, vector<32x32xf32>, vector<8x32xf32> -> vector<8x32xf32>
    %cst_225 = arith.constant dense<0.000000e+00> : vector<8x32xf32>
    %405 = tpu.matmul %403, %379, %cst_225 {dimension_numbers = #tpu.dot_dimension_numbers<[1], [0], [0], [1], [0, 0, 1, 1], [], []>} : vector<8x32xf32>, vector<32x32xf32>, vector<8x32xf32> -> vector<8x32xf32>
    %cst_226 = arith.constant dense<0.000000e+00> : vector<8x32xf32>
    %406 = tpu.matmul %403, %381, %cst_226 {dimension_numbers = #tpu.dot_dimension_numbers<[1], [0], [0], [1], [0, 0, 1, 1], [], []>} : vector<8x32xf32>, vector<32x32xf32>, vector<8x32xf32> -> vector<8x32xf32>
    %407 = arith.index_cast %c0_i32_223 : i32 to index
    %c0_227 = arith.constant 0 : index
    %c0_228 = arith.constant 0 : index
    %408 = vector.load %arg12[%407, %c0_227, %c0_228] : memref<8x8x32xf32, #tpu.memory_space<vmem>>, vector<1x8x32xf32>
    %409 = vector.shape_cast %408 : vector<1x8x32xf32> to vector<8x32xf32>
    %410 = arith.addf %409, %404 : vector<8x32xf32>
    %cst_229 = arith.constant 0.000000e+00 : f32
    %411 = vector.broadcast %cst_229 : f32 to vector<8x32xf32>
    %412 = arith.subf %411, %410 : vector<8x32xf32>
    %413 = math.exp %412 : vector<8x32xf32>
    %cst_230 = arith.constant 1.000000e+00 : f32
    %414 = vector.broadcast %cst_230 : f32 to vector<8x32xf32>
    %415 = arith.addf %414, %413 : vector<8x32xf32>
    %cst_231 = arith.constant 1.000000e+00 : f32
    %416 = vector.broadcast %cst_231 : f32 to vector<8x32xf32>
    %417 = arith.divf %416, %415 : vector<8x32xf32>
    %418 = arith.index_cast %c0_i32_223 : i32 to index
    %c0_232 = arith.constant 0 : index
    %c0_233 = arith.constant 0 : index
    %419 = vector.load %arg13[%418, %c0_232, %c0_233] : memref<8x8x32xf32, #tpu.memory_space<vmem>>, vector<1x8x32xf32>
    %420 = vector.shape_cast %419 : vector<1x8x32xf32> to vector<8x32xf32>
    %421 = arith.addf %420, %405 : vector<8x32xf32>
    %cst_234 = arith.constant 0.000000e+00 : f32
    %422 = vector.broadcast %cst_234 : f32 to vector<8x32xf32>
    %423 = arith.subf %422, %421 : vector<8x32xf32>
    %424 = math.exp %423 : vector<8x32xf32>
    %cst_235 = arith.constant 1.000000e+00 : f32
    %425 = vector.broadcast %cst_235 : f32 to vector<8x32xf32>
    %426 = arith.addf %425, %424 : vector<8x32xf32>
    %cst_236 = arith.constant 1.000000e+00 : f32
    %427 = vector.broadcast %cst_236 : f32 to vector<8x32xf32>
    %428 = arith.divf %427, %426 : vector<8x32xf32>
    %429 = arith.index_cast %c0_i32_223 : i32 to index
    %c0_237 = arith.constant 0 : index
    %c0_238 = arith.constant 0 : index
    %430 = vector.load %arg14[%429, %c0_237, %c0_238] : memref<8x8x32xf32, #tpu.memory_space<vmem>>, vector<1x8x32xf32>
    %431 = vector.shape_cast %430 : vector<1x8x32xf32> to vector<8x32xf32>
    %432 = vector.broadcast %385 : vector<1x32xf32> to vector<8x32xf32>
    %433 = arith.addf %406, %432 : vector<8x32xf32>
    %434 = arith.mulf %417, %433 : vector<8x32xf32>
    %435 = arith.addf %431, %434 : vector<8x32xf32>
    %436 = math.tanh %435 : vector<8x32xf32>
    %cst_239 = arith.constant 1.000000e+00 : f32
    %437 = vector.broadcast %cst_239 : f32 to vector<8x32xf32>
    %438 = arith.subf %437, %428 : vector<8x32xf32>
    %439 = arith.mulf %438, %436 : vector<8x32xf32>
    %440 = arith.mulf %428, %403 : vector<8x32xf32>
    %441 = arith.addf %439, %440 : vector<8x32xf32>
    %c1_i32_240 = arith.constant 1 : i32
    %cst_241 = arith.constant dense<0.000000e+00> : vector<8x32xf32>
    %442 = tpu.matmul %441, %377, %cst_241 {dimension_numbers = #tpu.dot_dimension_numbers<[1], [0], [0], [1], [0, 0, 1, 1], [], []>} : vector<8x32xf32>, vector<32x32xf32>, vector<8x32xf32> -> vector<8x32xf32>
    %cst_242 = arith.constant dense<0.000000e+00> : vector<8x32xf32>
    %443 = tpu.matmul %441, %379, %cst_242 {dimension_numbers = #tpu.dot_dimension_numbers<[1], [0], [0], [1], [0, 0, 1, 1], [], []>} : vector<8x32xf32>, vector<32x32xf32>, vector<8x32xf32> -> vector<8x32xf32>
    %cst_243 = arith.constant dense<0.000000e+00> : vector<8x32xf32>
    %444 = tpu.matmul %441, %381, %cst_243 {dimension_numbers = #tpu.dot_dimension_numbers<[1], [0], [0], [1], [0, 0, 1, 1], [], []>} : vector<8x32xf32>, vector<32x32xf32>, vector<8x32xf32> -> vector<8x32xf32>
    %445 = arith.index_cast %c1_i32_240 : i32 to index
    %c0_244 = arith.constant 0 : index
    %c0_245 = arith.constant 0 : index
    %446 = vector.load %arg12[%445, %c0_244, %c0_245] : memref<8x8x32xf32, #tpu.memory_space<vmem>>, vector<1x8x32xf32>
    %447 = vector.shape_cast %446 : vector<1x8x32xf32> to vector<8x32xf32>
    %448 = arith.addf %447, %442 : vector<8x32xf32>
    %cst_246 = arith.constant 0.000000e+00 : f32
    %449 = vector.broadcast %cst_246 : f32 to vector<8x32xf32>
    %450 = arith.subf %449, %448 : vector<8x32xf32>
    %451 = math.exp %450 : vector<8x32xf32>
    %cst_247 = arith.constant 1.000000e+00 : f32
    %452 = vector.broadcast %cst_247 : f32 to vector<8x32xf32>
    %453 = arith.addf %452, %451 : vector<8x32xf32>
    %cst_248 = arith.constant 1.000000e+00 : f32
    %454 = vector.broadcast %cst_248 : f32 to vector<8x32xf32>
    %455 = arith.divf %454, %453 : vector<8x32xf32>
    %456 = arith.index_cast %c1_i32_240 : i32 to index
    %c0_249 = arith.constant 0 : index
    %c0_250 = arith.constant 0 : index
    %457 = vector.load %arg13[%456, %c0_249, %c0_250] : memref<8x8x32xf32, #tpu.memory_space<vmem>>, vector<1x8x32xf32>
    %458 = vector.shape_cast %457 : vector<1x8x32xf32> to vector<8x32xf32>
    %459 = arith.addf %458, %443 : vector<8x32xf32>
    %cst_251 = arith.constant 0.000000e+00 : f32
    %460 = vector.broadcast %cst_251 : f32 to vector<8x32xf32>
    %461 = arith.subf %460, %459 : vector<8x32xf32>
    %462 = math.exp %461 : vector<8x32xf32>
    %cst_252 = arith.constant 1.000000e+00 : f32
    %463 = vector.broadcast %cst_252 : f32 to vector<8x32xf32>
    %464 = arith.addf %463, %462 : vector<8x32xf32>
    %cst_253 = arith.constant 1.000000e+00 : f32
    %465 = vector.broadcast %cst_253 : f32 to vector<8x32xf32>
    %466 = arith.divf %465, %464 : vector<8x32xf32>
    %467 = arith.index_cast %c1_i32_240 : i32 to index
    %c0_254 = arith.constant 0 : index
    %c0_255 = arith.constant 0 : index
    %468 = vector.load %arg14[%467, %c0_254, %c0_255] : memref<8x8x32xf32, #tpu.memory_space<vmem>>, vector<1x8x32xf32>
    %469 = vector.shape_cast %468 : vector<1x8x32xf32> to vector<8x32xf32>
    %470 = vector.broadcast %385 : vector<1x32xf32> to vector<8x32xf32>
    %471 = arith.addf %444, %470 : vector<8x32xf32>
    %472 = arith.mulf %455, %471 : vector<8x32xf32>
    %473 = arith.addf %469, %472 : vector<8x32xf32>
    %474 = math.tanh %473 : vector<8x32xf32>
    %cst_256 = arith.constant 1.000000e+00 : f32
    %475 = vector.broadcast %cst_256 : f32 to vector<8x32xf32>
    %476 = arith.subf %475, %466 : vector<8x32xf32>
    %477 = arith.mulf %476, %474 : vector<8x32xf32>
    %478 = arith.mulf %466, %441 : vector<8x32xf32>
    %479 = arith.addf %477, %478 : vector<8x32xf32>
    %c2_i32_257 = arith.constant 2 : i32
    %cst_258 = arith.constant dense<0.000000e+00> : vector<8x32xf32>
    %480 = tpu.matmul %479, %377, %cst_258 {dimension_numbers = #tpu.dot_dimension_numbers<[1], [0], [0], [1], [0, 0, 1, 1], [], []>} : vector<8x32xf32>, vector<32x32xf32>, vector<8x32xf32> -> vector<8x32xf32>
    %cst_259 = arith.constant dense<0.000000e+00> : vector<8x32xf32>
    %481 = tpu.matmul %479, %379, %cst_259 {dimension_numbers = #tpu.dot_dimension_numbers<[1], [0], [0], [1], [0, 0, 1, 1], [], []>} : vector<8x32xf32>, vector<32x32xf32>, vector<8x32xf32> -> vector<8x32xf32>
    %cst_260 = arith.constant dense<0.000000e+00> : vector<8x32xf32>
    %482 = tpu.matmul %479, %381, %cst_260 {dimension_numbers = #tpu.dot_dimension_numbers<[1], [0], [0], [1], [0, 0, 1, 1], [], []>} : vector<8x32xf32>, vector<32x32xf32>, vector<8x32xf32> -> vector<8x32xf32>
    %483 = arith.index_cast %c2_i32_257 : i32 to index
    %c0_261 = arith.constant 0 : index
    %c0_262 = arith.constant 0 : index
    %484 = vector.load %arg12[%483, %c0_261, %c0_262] : memref<8x8x32xf32, #tpu.memory_space<vmem>>, vector<1x8x32xf32>
    %485 = vector.shape_cast %484 : vector<1x8x32xf32> to vector<8x32xf32>
    %486 = arith.addf %485, %480 : vector<8x32xf32>
    %cst_263 = arith.constant 0.000000e+00 : f32
    %487 = vector.broadcast %cst_263 : f32 to vector<8x32xf32>
    %488 = arith.subf %487, %486 : vector<8x32xf32>
    %489 = math.exp %488 : vector<8x32xf32>
    %cst_264 = arith.constant 1.000000e+00 : f32
    %490 = vector.broadcast %cst_264 : f32 to vector<8x32xf32>
    %491 = arith.addf %490, %489 : vector<8x32xf32>
    %cst_265 = arith.constant 1.000000e+00 : f32
    %492 = vector.broadcast %cst_265 : f32 to vector<8x32xf32>
    %493 = arith.divf %492, %491 : vector<8x32xf32>
    %494 = arith.index_cast %c2_i32_257 : i32 to index
    %c0_266 = arith.constant 0 : index
    %c0_267 = arith.constant 0 : index
    %495 = vector.load %arg13[%494, %c0_266, %c0_267] : memref<8x8x32xf32, #tpu.memory_space<vmem>>, vector<1x8x32xf32>
    %496 = vector.shape_cast %495 : vector<1x8x32xf32> to vector<8x32xf32>
    %497 = arith.addf %496, %481 : vector<8x32xf32>
    %cst_268 = arith.constant 0.000000e+00 : f32
    %498 = vector.broadcast %cst_268 : f32 to vector<8x32xf32>
    %499 = arith.subf %498, %497 : vector<8x32xf32>
    %500 = math.exp %499 : vector<8x32xf32>
    %cst_269 = arith.constant 1.000000e+00 : f32
    %501 = vector.broadcast %cst_269 : f32 to vector<8x32xf32>
    %502 = arith.addf %501, %500 : vector<8x32xf32>
    %cst_270 = arith.constant 1.000000e+00 : f32
    %503 = vector.broadcast %cst_270 : f32 to vector<8x32xf32>
    %504 = arith.divf %503, %502 : vector<8x32xf32>
    %505 = arith.index_cast %c2_i32_257 : i32 to index
    %c0_271 = arith.constant 0 : index
    %c0_272 = arith.constant 0 : index
    %506 = vector.load %arg14[%505, %c0_271, %c0_272] : memref<8x8x32xf32, #tpu.memory_space<vmem>>, vector<1x8x32xf32>
    %507 = vector.shape_cast %506 : vector<1x8x32xf32> to vector<8x32xf32>
    %508 = vector.broadcast %385 : vector<1x32xf32> to vector<8x32xf32>
    %509 = arith.addf %482, %508 : vector<8x32xf32>
    %510 = arith.mulf %493, %509 : vector<8x32xf32>
    %511 = arith.addf %507, %510 : vector<8x32xf32>
    %512 = math.tanh %511 : vector<8x32xf32>
    %cst_273 = arith.constant 1.000000e+00 : f32
    %513 = vector.broadcast %cst_273 : f32 to vector<8x32xf32>
    %514 = arith.subf %513, %504 : vector<8x32xf32>
    %515 = arith.mulf %514, %512 : vector<8x32xf32>
    %516 = arith.mulf %504, %479 : vector<8x32xf32>
    %517 = arith.addf %515, %516 : vector<8x32xf32>
    %c3_i32_274 = arith.constant 3 : i32
    %cst_275 = arith.constant dense<0.000000e+00> : vector<8x32xf32>
    %518 = tpu.matmul %517, %377, %cst_275 {dimension_numbers = #tpu.dot_dimension_numbers<[1], [0], [0], [1], [0, 0, 1, 1], [], []>} : vector<8x32xf32>, vector<32x32xf32>, vector<8x32xf32> -> vector<8x32xf32>
    %cst_276 = arith.constant dense<0.000000e+00> : vector<8x32xf32>
    %519 = tpu.matmul %517, %379, %cst_276 {dimension_numbers = #tpu.dot_dimension_numbers<[1], [0], [0], [1], [0, 0, 1, 1], [], []>} : vector<8x32xf32>, vector<32x32xf32>, vector<8x32xf32> -> vector<8x32xf32>
    %cst_277 = arith.constant dense<0.000000e+00> : vector<8x32xf32>
    %520 = tpu.matmul %517, %381, %cst_277 {dimension_numbers = #tpu.dot_dimension_numbers<[1], [0], [0], [1], [0, 0, 1, 1], [], []>} : vector<8x32xf32>, vector<32x32xf32>, vector<8x32xf32> -> vector<8x32xf32>
    %521 = arith.index_cast %c3_i32_274 : i32 to index
    %c0_278 = arith.constant 0 : index
    %c0_279 = arith.constant 0 : index
    %522 = vector.load %arg12[%521, %c0_278, %c0_279] : memref<8x8x32xf32, #tpu.memory_space<vmem>>, vector<1x8x32xf32>
    %523 = vector.shape_cast %522 : vector<1x8x32xf32> to vector<8x32xf32>
    %524 = arith.addf %523, %518 : vector<8x32xf32>
    %cst_280 = arith.constant 0.000000e+00 : f32
    %525 = vector.broadcast %cst_280 : f32 to vector<8x32xf32>
    %526 = arith.subf %525, %524 : vector<8x32xf32>
    %527 = math.exp %526 : vector<8x32xf32>
    %cst_281 = arith.constant 1.000000e+00 : f32
    %528 = vector.broadcast %cst_281 : f32 to vector<8x32xf32>
    %529 = arith.addf %528, %527 : vector<8x32xf32>
    %cst_282 = arith.constant 1.000000e+00 : f32
    %530 = vector.broadcast %cst_282 : f32 to vector<8x32xf32>
    %531 = arith.divf %530, %529 : vector<8x32xf32>
    %532 = arith.index_cast %c3_i32_274 : i32 to index
    %c0_283 = arith.constant 0 : index
    %c0_284 = arith.constant 0 : index
    %533 = vector.load %arg13[%532, %c0_283, %c0_284] : memref<8x8x32xf32, #tpu.memory_space<vmem>>, vector<1x8x32xf32>
    %534 = vector.shape_cast %533 : vector<1x8x32xf32> to vector<8x32xf32>
    %535 = arith.addf %534, %519 : vector<8x32xf32>
    %cst_285 = arith.constant 0.000000e+00 : f32
    %536 = vector.broadcast %cst_285 : f32 to vector<8x32xf32>
    %537 = arith.subf %536, %535 : vector<8x32xf32>
    %538 = math.exp %537 : vector<8x32xf32>
    %cst_286 = arith.constant 1.000000e+00 : f32
    %539 = vector.broadcast %cst_286 : f32 to vector<8x32xf32>
    %540 = arith.addf %539, %538 : vector<8x32xf32>
    %cst_287 = arith.constant 1.000000e+00 : f32
    %541 = vector.broadcast %cst_287 : f32 to vector<8x32xf32>
    %542 = arith.divf %541, %540 : vector<8x32xf32>
    %543 = arith.index_cast %c3_i32_274 : i32 to index
    %c0_288 = arith.constant 0 : index
    %c0_289 = arith.constant 0 : index
    %544 = vector.load %arg14[%543, %c0_288, %c0_289] : memref<8x8x32xf32, #tpu.memory_space<vmem>>, vector<1x8x32xf32>
    %545 = vector.shape_cast %544 : vector<1x8x32xf32> to vector<8x32xf32>
    %546 = vector.broadcast %385 : vector<1x32xf32> to vector<8x32xf32>
    %547 = arith.addf %520, %546 : vector<8x32xf32>
    %548 = arith.mulf %531, %547 : vector<8x32xf32>
    %549 = arith.addf %545, %548 : vector<8x32xf32>
    %550 = math.tanh %549 : vector<8x32xf32>
    %cst_290 = arith.constant 1.000000e+00 : f32
    %551 = vector.broadcast %cst_290 : f32 to vector<8x32xf32>
    %552 = arith.subf %551, %542 : vector<8x32xf32>
    %553 = arith.mulf %552, %550 : vector<8x32xf32>
    %554 = arith.mulf %542, %517 : vector<8x32xf32>
    %555 = arith.addf %553, %554 : vector<8x32xf32>
    %c4_i32_291 = arith.constant 4 : i32
    %cst_292 = arith.constant dense<0.000000e+00> : vector<8x32xf32>
    %556 = tpu.matmul %555, %377, %cst_292 {dimension_numbers = #tpu.dot_dimension_numbers<[1], [0], [0], [1], [0, 0, 1, 1], [], []>} : vector<8x32xf32>, vector<32x32xf32>, vector<8x32xf32> -> vector<8x32xf32>
    %cst_293 = arith.constant dense<0.000000e+00> : vector<8x32xf32>
    %557 = tpu.matmul %555, %379, %cst_293 {dimension_numbers = #tpu.dot_dimension_numbers<[1], [0], [0], [1], [0, 0, 1, 1], [], []>} : vector<8x32xf32>, vector<32x32xf32>, vector<8x32xf32> -> vector<8x32xf32>
    %cst_294 = arith.constant dense<0.000000e+00> : vector<8x32xf32>
    %558 = tpu.matmul %555, %381, %cst_294 {dimension_numbers = #tpu.dot_dimension_numbers<[1], [0], [0], [1], [0, 0, 1, 1], [], []>} : vector<8x32xf32>, vector<32x32xf32>, vector<8x32xf32> -> vector<8x32xf32>
    %559 = arith.index_cast %c4_i32_291 : i32 to index
    %c0_295 = arith.constant 0 : index
    %c0_296 = arith.constant 0 : index
    %560 = vector.load %arg12[%559, %c0_295, %c0_296] : memref<8x8x32xf32, #tpu.memory_space<vmem>>, vector<1x8x32xf32>
    %561 = vector.shape_cast %560 : vector<1x8x32xf32> to vector<8x32xf32>
    %562 = arith.addf %561, %556 : vector<8x32xf32>
    %cst_297 = arith.constant 0.000000e+00 : f32
    %563 = vector.broadcast %cst_297 : f32 to vector<8x32xf32>
    %564 = arith.subf %563, %562 : vector<8x32xf32>
    %565 = math.exp %564 : vector<8x32xf32>
    %cst_298 = arith.constant 1.000000e+00 : f32
    %566 = vector.broadcast %cst_298 : f32 to vector<8x32xf32>
    %567 = arith.addf %566, %565 : vector<8x32xf32>
    %cst_299 = arith.constant 1.000000e+00 : f32
    %568 = vector.broadcast %cst_299 : f32 to vector<8x32xf32>
    %569 = arith.divf %568, %567 : vector<8x32xf32>
    %570 = arith.index_cast %c4_i32_291 : i32 to index
    %c0_300 = arith.constant 0 : index
    %c0_301 = arith.constant 0 : index
    %571 = vector.load %arg13[%570, %c0_300, %c0_301] : memref<8x8x32xf32, #tpu.memory_space<vmem>>, vector<1x8x32xf32>
    %572 = vector.shape_cast %571 : vector<1x8x32xf32> to vector<8x32xf32>
    %573 = arith.addf %572, %557 : vector<8x32xf32>
    %cst_302 = arith.constant 0.000000e+00 : f32
    %574 = vector.broadcast %cst_302 : f32 to vector<8x32xf32>
    %575 = arith.subf %574, %573 : vector<8x32xf32>
    %576 = math.exp %575 : vector<8x32xf32>
    %cst_303 = arith.constant 1.000000e+00 : f32
    %577 = vector.broadcast %cst_303 : f32 to vector<8x32xf32>
    %578 = arith.addf %577, %576 : vector<8x32xf32>
    %cst_304 = arith.constant 1.000000e+00 : f32
    %579 = vector.broadcast %cst_304 : f32 to vector<8x32xf32>
    %580 = arith.divf %579, %578 : vector<8x32xf32>
    %581 = arith.index_cast %c4_i32_291 : i32 to index
    %c0_305 = arith.constant 0 : index
    %c0_306 = arith.constant 0 : index
    %582 = vector.load %arg14[%581, %c0_305, %c0_306] : memref<8x8x32xf32, #tpu.memory_space<vmem>>, vector<1x8x32xf32>
    %583 = vector.shape_cast %582 : vector<1x8x32xf32> to vector<8x32xf32>
    %584 = vector.broadcast %385 : vector<1x32xf32> to vector<8x32xf32>
    %585 = arith.addf %558, %584 : vector<8x32xf32>
    %586 = arith.mulf %569, %585 : vector<8x32xf32>
    %587 = arith.addf %583, %586 : vector<8x32xf32>
    %588 = math.tanh %587 : vector<8x32xf32>
    %cst_307 = arith.constant 1.000000e+00 : f32
    %589 = vector.broadcast %cst_307 : f32 to vector<8x32xf32>
    %590 = arith.subf %589, %580 : vector<8x32xf32>
    %591 = arith.mulf %590, %588 : vector<8x32xf32>
    %592 = arith.mulf %580, %555 : vector<8x32xf32>
    %593 = arith.addf %591, %592 : vector<8x32xf32>
    %c5_i32_308 = arith.constant 5 : i32
    %cst_309 = arith.constant dense<0.000000e+00> : vector<8x32xf32>
    %594 = tpu.matmul %593, %377, %cst_309 {dimension_numbers = #tpu.dot_dimension_numbers<[1], [0], [0], [1], [0, 0, 1, 1], [], []>} : vector<8x32xf32>, vector<32x32xf32>, vector<8x32xf32> -> vector<8x32xf32>
    %cst_310 = arith.constant dense<0.000000e+00> : vector<8x32xf32>
    %595 = tpu.matmul %593, %379, %cst_310 {dimension_numbers = #tpu.dot_dimension_numbers<[1], [0], [0], [1], [0, 0, 1, 1], [], []>} : vector<8x32xf32>, vector<32x32xf32>, vector<8x32xf32> -> vector<8x32xf32>
    %cst_311 = arith.constant dense<0.000000e+00> : vector<8x32xf32>
    %596 = tpu.matmul %593, %381, %cst_311 {dimension_numbers = #tpu.dot_dimension_numbers<[1], [0], [0], [1], [0, 0, 1, 1], [], []>} : vector<8x32xf32>, vector<32x32xf32>, vector<8x32xf32> -> vector<8x32xf32>
    %597 = arith.index_cast %c5_i32_308 : i32 to index
    %c0_312 = arith.constant 0 : index
    %c0_313 = arith.constant 0 : index
    %598 = vector.load %arg12[%597, %c0_312, %c0_313] : memref<8x8x32xf32, #tpu.memory_space<vmem>>, vector<1x8x32xf32>
    %599 = vector.shape_cast %598 : vector<1x8x32xf32> to vector<8x32xf32>
    %600 = arith.addf %599, %594 : vector<8x32xf32>
    %cst_314 = arith.constant 0.000000e+00 : f32
    %601 = vector.broadcast %cst_314 : f32 to vector<8x32xf32>
    %602 = arith.subf %601, %600 : vector<8x32xf32>
    %603 = math.exp %602 : vector<8x32xf32>
    %cst_315 = arith.constant 1.000000e+00 : f32
    %604 = vector.broadcast %cst_315 : f32 to vector<8x32xf32>
    %605 = arith.addf %604, %603 : vector<8x32xf32>
    %cst_316 = arith.constant 1.000000e+00 : f32
    %606 = vector.broadcast %cst_316 : f32 to vector<8x32xf32>
    %607 = arith.divf %606, %605 : vector<8x32xf32>
    %608 = arith.index_cast %c5_i32_308 : i32 to index
    %c0_317 = arith.constant 0 : index
    %c0_318 = arith.constant 0 : index
    %609 = vector.load %arg13[%608, %c0_317, %c0_318] : memref<8x8x32xf32, #tpu.memory_space<vmem>>, vector<1x8x32xf32>
    %610 = vector.shape_cast %609 : vector<1x8x32xf32> to vector<8x32xf32>
    %611 = arith.addf %610, %595 : vector<8x32xf32>
    %cst_319 = arith.constant 0.000000e+00 : f32
    %612 = vector.broadcast %cst_319 : f32 to vector<8x32xf32>
    %613 = arith.subf %612, %611 : vector<8x32xf32>
    %614 = math.exp %613 : vector<8x32xf32>
    %cst_320 = arith.constant 1.000000e+00 : f32
    %615 = vector.broadcast %cst_320 : f32 to vector<8x32xf32>
    %616 = arith.addf %615, %614 : vector<8x32xf32>
    %cst_321 = arith.constant 1.000000e+00 : f32
    %617 = vector.broadcast %cst_321 : f32 to vector<8x32xf32>
    %618 = arith.divf %617, %616 : vector<8x32xf32>
    %619 = arith.index_cast %c5_i32_308 : i32 to index
    %c0_322 = arith.constant 0 : index
    %c0_323 = arith.constant 0 : index
    %620 = vector.load %arg14[%619, %c0_322, %c0_323] : memref<8x8x32xf32, #tpu.memory_space<vmem>>, vector<1x8x32xf32>
    %621 = vector.shape_cast %620 : vector<1x8x32xf32> to vector<8x32xf32>
    %622 = vector.broadcast %385 : vector<1x32xf32> to vector<8x32xf32>
    %623 = arith.addf %596, %622 : vector<8x32xf32>
    %624 = arith.mulf %607, %623 : vector<8x32xf32>
    %625 = arith.addf %621, %624 : vector<8x32xf32>
    %626 = math.tanh %625 : vector<8x32xf32>
    %cst_324 = arith.constant 1.000000e+00 : f32
    %627 = vector.broadcast %cst_324 : f32 to vector<8x32xf32>
    %628 = arith.subf %627, %618 : vector<8x32xf32>
    %629 = arith.mulf %628, %626 : vector<8x32xf32>
    %630 = arith.mulf %618, %593 : vector<8x32xf32>
    %631 = arith.addf %629, %630 : vector<8x32xf32>
    %c6_i32_325 = arith.constant 6 : i32
    %cst_326 = arith.constant dense<0.000000e+00> : vector<8x32xf32>
    %632 = tpu.matmul %631, %377, %cst_326 {dimension_numbers = #tpu.dot_dimension_numbers<[1], [0], [0], [1], [0, 0, 1, 1], [], []>} : vector<8x32xf32>, vector<32x32xf32>, vector<8x32xf32> -> vector<8x32xf32>
    %cst_327 = arith.constant dense<0.000000e+00> : vector<8x32xf32>
    %633 = tpu.matmul %631, %379, %cst_327 {dimension_numbers = #tpu.dot_dimension_numbers<[1], [0], [0], [1], [0, 0, 1, 1], [], []>} : vector<8x32xf32>, vector<32x32xf32>, vector<8x32xf32> -> vector<8x32xf32>
    %cst_328 = arith.constant dense<0.000000e+00> : vector<8x32xf32>
    %634 = tpu.matmul %631, %381, %cst_328 {dimension_numbers = #tpu.dot_dimension_numbers<[1], [0], [0], [1], [0, 0, 1, 1], [], []>} : vector<8x32xf32>, vector<32x32xf32>, vector<8x32xf32> -> vector<8x32xf32>
    %635 = arith.index_cast %c6_i32_325 : i32 to index
    %c0_329 = arith.constant 0 : index
    %c0_330 = arith.constant 0 : index
    %636 = vector.load %arg12[%635, %c0_329, %c0_330] : memref<8x8x32xf32, #tpu.memory_space<vmem>>, vector<1x8x32xf32>
    %637 = vector.shape_cast %636 : vector<1x8x32xf32> to vector<8x32xf32>
    %638 = arith.addf %637, %632 : vector<8x32xf32>
    %cst_331 = arith.constant 0.000000e+00 : f32
    %639 = vector.broadcast %cst_331 : f32 to vector<8x32xf32>
    %640 = arith.subf %639, %638 : vector<8x32xf32>
    %641 = math.exp %640 : vector<8x32xf32>
    %cst_332 = arith.constant 1.000000e+00 : f32
    %642 = vector.broadcast %cst_332 : f32 to vector<8x32xf32>
    %643 = arith.addf %642, %641 : vector<8x32xf32>
    %cst_333 = arith.constant 1.000000e+00 : f32
    %644 = vector.broadcast %cst_333 : f32 to vector<8x32xf32>
    %645 = arith.divf %644, %643 : vector<8x32xf32>
    %646 = arith.index_cast %c6_i32_325 : i32 to index
    %c0_334 = arith.constant 0 : index
    %c0_335 = arith.constant 0 : index
    %647 = vector.load %arg13[%646, %c0_334, %c0_335] : memref<8x8x32xf32, #tpu.memory_space<vmem>>, vector<1x8x32xf32>
    %648 = vector.shape_cast %647 : vector<1x8x32xf32> to vector<8x32xf32>
    %649 = arith.addf %648, %633 : vector<8x32xf32>
    %cst_336 = arith.constant 0.000000e+00 : f32
    %650 = vector.broadcast %cst_336 : f32 to vector<8x32xf32>
    %651 = arith.subf %650, %649 : vector<8x32xf32>
    %652 = math.exp %651 : vector<8x32xf32>
    %cst_337 = arith.constant 1.000000e+00 : f32
    %653 = vector.broadcast %cst_337 : f32 to vector<8x32xf32>
    %654 = arith.addf %653, %652 : vector<8x32xf32>
    %cst_338 = arith.constant 1.000000e+00 : f32
    %655 = vector.broadcast %cst_338 : f32 to vector<8x32xf32>
    %656 = arith.divf %655, %654 : vector<8x32xf32>
    %657 = arith.index_cast %c6_i32_325 : i32 to index
    %c0_339 = arith.constant 0 : index
    %c0_340 = arith.constant 0 : index
    %658 = vector.load %arg14[%657, %c0_339, %c0_340] : memref<8x8x32xf32, #tpu.memory_space<vmem>>, vector<1x8x32xf32>
    %659 = vector.shape_cast %658 : vector<1x8x32xf32> to vector<8x32xf32>
    %660 = vector.broadcast %385 : vector<1x32xf32> to vector<8x32xf32>
    %661 = arith.addf %634, %660 : vector<8x32xf32>
    %662 = arith.mulf %645, %661 : vector<8x32xf32>
    %663 = arith.addf %659, %662 : vector<8x32xf32>
    %664 = math.tanh %663 : vector<8x32xf32>
    %cst_341 = arith.constant 1.000000e+00 : f32
    %665 = vector.broadcast %cst_341 : f32 to vector<8x32xf32>
    %666 = arith.subf %665, %656 : vector<8x32xf32>
    %667 = arith.mulf %666, %664 : vector<8x32xf32>
    %668 = arith.mulf %656, %631 : vector<8x32xf32>
    %669 = arith.addf %667, %668 : vector<8x32xf32>
    %c7_i32_342 = arith.constant 7 : i32
    %cst_343 = arith.constant dense<0.000000e+00> : vector<8x32xf32>
    %670 = tpu.matmul %669, %377, %cst_343 {dimension_numbers = #tpu.dot_dimension_numbers<[1], [0], [0], [1], [0, 0, 1, 1], [], []>} : vector<8x32xf32>, vector<32x32xf32>, vector<8x32xf32> -> vector<8x32xf32>
    %cst_344 = arith.constant dense<0.000000e+00> : vector<8x32xf32>
    %671 = tpu.matmul %669, %379, %cst_344 {dimension_numbers = #tpu.dot_dimension_numbers<[1], [0], [0], [1], [0, 0, 1, 1], [], []>} : vector<8x32xf32>, vector<32x32xf32>, vector<8x32xf32> -> vector<8x32xf32>
    %cst_345 = arith.constant dense<0.000000e+00> : vector<8x32xf32>
    %672 = tpu.matmul %669, %381, %cst_345 {dimension_numbers = #tpu.dot_dimension_numbers<[1], [0], [0], [1], [0, 0, 1, 1], [], []>} : vector<8x32xf32>, vector<32x32xf32>, vector<8x32xf32> -> vector<8x32xf32>
    %673 = arith.index_cast %c7_i32_342 : i32 to index
    %c0_346 = arith.constant 0 : index
    %c0_347 = arith.constant 0 : index
    %674 = vector.load %arg12[%673, %c0_346, %c0_347] : memref<8x8x32xf32, #tpu.memory_space<vmem>>, vector<1x8x32xf32>
    %675 = vector.shape_cast %674 : vector<1x8x32xf32> to vector<8x32xf32>
    %676 = arith.addf %675, %670 : vector<8x32xf32>
    %cst_348 = arith.constant 0.000000e+00 : f32
    %677 = vector.broadcast %cst_348 : f32 to vector<8x32xf32>
    %678 = arith.subf %677, %676 : vector<8x32xf32>
    %679 = math.exp %678 : vector<8x32xf32>
    %cst_349 = arith.constant 1.000000e+00 : f32
    %680 = vector.broadcast %cst_349 : f32 to vector<8x32xf32>
    %681 = arith.addf %680, %679 : vector<8x32xf32>
    %cst_350 = arith.constant 1.000000e+00 : f32
    %682 = vector.broadcast %cst_350 : f32 to vector<8x32xf32>
    %683 = arith.divf %682, %681 : vector<8x32xf32>
    %684 = arith.index_cast %c7_i32_342 : i32 to index
    %c0_351 = arith.constant 0 : index
    %c0_352 = arith.constant 0 : index
    %685 = vector.load %arg13[%684, %c0_351, %c0_352] : memref<8x8x32xf32, #tpu.memory_space<vmem>>, vector<1x8x32xf32>
    %686 = vector.shape_cast %685 : vector<1x8x32xf32> to vector<8x32xf32>
    %687 = arith.addf %686, %671 : vector<8x32xf32>
    %cst_353 = arith.constant 0.000000e+00 : f32
    %688 = vector.broadcast %cst_353 : f32 to vector<8x32xf32>
    %689 = arith.subf %688, %687 : vector<8x32xf32>
    %690 = math.exp %689 : vector<8x32xf32>
    %cst_354 = arith.constant 1.000000e+00 : f32
    %691 = vector.broadcast %cst_354 : f32 to vector<8x32xf32>
    %692 = arith.addf %691, %690 : vector<8x32xf32>
    %cst_355 = arith.constant 1.000000e+00 : f32
    %693 = vector.broadcast %cst_355 : f32 to vector<8x32xf32>
    %694 = arith.divf %693, %692 : vector<8x32xf32>
    %695 = arith.index_cast %c7_i32_342 : i32 to index
    %c0_356 = arith.constant 0 : index
    %c0_357 = arith.constant 0 : index
    %696 = vector.load %arg14[%695, %c0_356, %c0_357] : memref<8x8x32xf32, #tpu.memory_space<vmem>>, vector<1x8x32xf32>
    %697 = vector.shape_cast %696 : vector<1x8x32xf32> to vector<8x32xf32>
    %698 = vector.broadcast %385 : vector<1x32xf32> to vector<8x32xf32>
    %699 = arith.addf %672, %698 : vector<8x32xf32>
    %700 = arith.mulf %683, %699 : vector<8x32xf32>
    %701 = arith.addf %697, %700 : vector<8x32xf32>
    %702 = math.tanh %701 : vector<8x32xf32>
    %cst_358 = arith.constant 1.000000e+00 : f32
    %703 = vector.broadcast %cst_358 : f32 to vector<8x32xf32>
    %704 = arith.subf %703, %694 : vector<8x32xf32>
    %705 = arith.mulf %704, %702 : vector<8x32xf32>
    %706 = arith.mulf %694, %669 : vector<8x32xf32>
    %707 = arith.addf %705, %706 : vector<8x32xf32>
    %c8_i32_359 = arith.constant 8 : i32
    %c0_360 = arith.constant 0 : index
    %c0_361 = arith.constant 0 : index
    %708 = vector.load %arg8[%c0_360, %c0_361] : memref<32x8xf32, #tpu.memory_space<vmem>>, vector<32x8xf32>
    %cst_362 = arith.constant dense<0.000000e+00> : vector<8x8xf32>
    %709 = tpu.matmul %707, %708, %cst_362 {dimension_numbers = #tpu.dot_dimension_numbers<[1], [0], [0], [1], [0, 0, 1, 1], [], []>} : vector<8x32xf32>, vector<32x8xf32>, vector<8x8xf32> -> vector<8x8xf32>
    %c0_363 = arith.constant 0 : index
    %c0_364 = arith.constant 0 : index
    %710 = vector.load %arg9[%c0_363, %c0_364] : memref<1x8xf32, #tpu.memory_space<vmem>>, vector<1x8xf32>
    %711 = vector.broadcast %710 : vector<1x8xf32> to vector<8x8xf32>
    %712 = arith.addf %709, %711 : vector<8x8xf32>
    %c0_365 = arith.constant 0 : index
    %c0_366 = arith.constant 0 : index
    %713 = vector.load %arg10[%c0_365, %c0_366] : memref<8x8xf32, #tpu.memory_space<vmem>>, vector<8x8xf32>
    tpu.vector_store %arg10[%c0_365, %c0_366], %712 {strides = array<i32>} : memref<8x8xf32, #tpu.memory_space<vmem>>, vector<8x8xf32>,
    return
  }
  func.func @transform_0(%arg0: i32) -> (i32, i32, i32) {
    %c0_i32 = arith.constant 0 : i32
    %c0_i32_0 = arith.constant 0 : i32
    %c0_i32_1 = arith.constant 0 : i32
    return %c0_i32, %arg0, %c0_i32_0 : i32, i32, i32
  }
  func.func @transform_1(%arg0: i32) -> (i32, i32, i32) {
    %c0_i32 = arith.constant 0 : i32
    %c0_i32_0 = arith.constant 0 : i32
    %c0_i32_1 = arith.constant 0 : i32
    %c0_i32_2 = arith.constant 0 : i32
    return %c0_i32, %c0_i32_0, %c0_i32_1 : i32, i32, i32
  }
  func.func @transform_2(%arg0: i32) -> (i32, i32, i32) {
    %c0_i32 = arith.constant 0 : i32
    %c0_i32_0 = arith.constant 0 : i32
    %c0_i32_1 = arith.constant 0 : i32
    %c0_i32_2 = arith.constant 0 : i32
    return %c0_i32, %c0_i32_0, %c0_i32_1 : i32, i32, i32
  }
  func.func @transform_3(%arg0: i32) -> (i32, i32) {
    %c0_i32 = arith.constant 0 : i32
    %c0_i32_0 = arith.constant 0 : i32
    %c0_i32_1 = arith.constant 0 : i32
    return %c0_i32, %c0_i32_0 : i32, i32
  }
  func.func @transform_4(%arg0: i32) -> (i32, i32, i32) {
    %c0_i32 = arith.constant 0 : i32
    %c0_i32_0 = arith.constant 0 : i32
    %c0_i32_1 = arith.constant 0 : i32
    %c0_i32_2 = arith.constant 0 : i32
    return %c0_i32, %c0_i32_0, %c0_i32_1 : i32, i32, i32
  }
  func.func @transform_5(%arg0: i32) -> (i32, i32, i32) {
    %c0_i32 = arith.constant 0 : i32
    %c0_i32_0 = arith.constant 0 : i32
    %c0_i32_1 = arith.constant 0 : i32
    %c0_i32_2 = arith.constant 0 : i32
    return %c0_i32, %c0_i32_0, %c0_i32_1 : i32, i32, i32
  }
  func.func @transform_6(%arg0: i32) -> (i32, i32) {
    %c0_i32 = arith.constant 0 : i32
    %c0_i32_0 = arith.constant 0 : i32
    %c0_i32_1 = arith.constant 0 : i32
    return %c0_i32, %c0_i32_0 : i32, i32
  }
  func.func @transform_7(%arg0: i32) -> (i32, i32) {
    %c0_i32 = arith.constant 0 : i32
    %c0_i32_0 = arith.constant 0 : i32
    %c0_i32_1 = arith.constant 0 : i32
    return %c0_i32, %c0_i32_0 : i32, i32
  }
  func.func @transform_8(%arg0: i32) -> (i32, i32) {
    %c0_i32 = arith.constant 0 : i32
    %c0_i32_0 = arith.constant 0 : i32
    %c0_i32_1 = arith.constant 0 : i32
    return %c0_i32, %c0_i32_0 : i32, i32
  }
  func.func @transform_9(%arg0: i32) -> (i32, i32) {
    %c0_i32 = arith.constant 0 : i32
    %c0_i32_0 = arith.constant 0 : i32
    return %arg0, %c0_i32 : i32, i32
  }
}

</mosaic_0001>

<bundles_post_ra>
// kernel: tpu_custom_call.1
= control target key start
LH: loop header
LB: loop body
LE: loop exit
PB: predicated region body
PF: predicated region fallthrough
CT: control target
= control target key end

     0   :  { %14 = vsyncpa [#allocation7], 0  ;;  %s7326_s0 = inlined_call_operand.hbm [shape: f32[8,8,16], index: 0, kind: input, shape index: {}]   ;;  %s7327_s1 = inlined_call_operand.hbm [shape: f32[3,16,32], index: 1, kind: input, shape index: {}]   ;;  %s7328_s2 = inlined_call_operand.hbm [shape: f32[3,32,32], index: 2, kind: input, shape index: {}]   ;;  %s7329_s3 = inlined_call_operand.vmem [shape: f32[4,32], index: 3, kind: input, shape index: {}]   ;;  %s7330_s4 = inlined_call_operand.hbm [shape: f32[3,32,32], index: 4, kind: input, shape index: {}]   ;;  %s7331_s5 = inlined_call_operand.hbm [shape: f32[3,32,32], index: 5, kind: input, shape index: {}]   ;;  %s7332_s6 = inlined_call_operand.vmem [shape: f32[4,32], index: 6, kind: input, shape index: {}]   ;;  %s7333_s7 = inlined_call_operand.vmem [shape: f32[32,8], index: 7, kind: input, shape index: {}]   ;;  %s7334_s8 = inlined_call_operand.vmem [shape: f32[1,8], index: 8, kind: input, shape index: {}]   ;;  %s7335_s9 = inlined_call_operand.hbm [shape: f32[8,8], index: 9, kind: output, shape index: {}]  }
   0x1   :  { %15 = vsyncpa [#allocation10], 0 }
   0x2   :  { %16 = vsyncpa [#allocation13], 0 }
   0x3   :  { %17 = vsyncpa [#allocation8], 0  ;;  %s6564_s30 = smov [#allocation9]   ;;  %s6565_s11 = smov [#allocation12]  }
   0x4   :  { %s35_s10 = sshll.u32 %s6564_s30, 4  ;;  %s61_s12 = sshll.u32 %s6565_s11, 4  ;;  %s36_s10 = int_to_ptr.vmem [resolvable:$true] %s35_s10  ;;  %s6625_s12 = int_to_ptr.vmem [resolvable:$true] %s61_s12 }
   0x5   :  { %s6424_s15 = scalar_lea.hbm %s7327_s1, 768 }
   0x6   :  { %p6425_p0 = scmp.ne.s32.totalorder %s7327_s1, %s6424_s15  ;;  %p6428_p1 = scmp.lt.u32.totalorder %s6424_s15, %s7327_s1 }
   0x8   :  { %p6430_p2 = pnand %p6428_p1, %p6425_p0 }
   0xa   :  { %6433 = shalt.err (!%p6430_p2)
}
   0xb   :  { %s6434_s20 = scalar_lea.vmem %s36_s10, 768  ;;  %p6439_p4 = scmp.lt.s32.totalorder %s36_s10, %s36_s10 }
   0xc   :  { %p6435_p3 = scmp.ne.s32.totalorder %s36_s10, %s6434_s20  ;;  %p6440_p5 = scmp.lt.s32.totalorder %s6434_s20, %s6434_s20 }
   0xe   :  { %p6441_p6 = por %p6440_p5, %p6439_p4 }
  0x10   :  { %p6442_p7 = pnand %p6441_p6, %p6435_p3 }
  0x12   :  { %6445 = shalt.err (!%p6442_p7)
}
  0x13   :  { %s6566_s21 = smov 128   ;;  %s6567_s22 = smov 8  }
  0x14   :  { %41 = dma.hbm_to_vmem [thread:$0]  %s7327_s1, 768, %s36_s10, [#allocation10], %s6566_s21, %s6566_s21, %s6567_s22  }
  0x15   :  { %s6446_s27 = scalar_lea.hbm %s7330_s4, 1536 }
  0x16   :  { %p6447_p8 = scmp.ne.s32.totalorder %s7330_s4, %s6446_s27  ;;  %p6450_p9 = scmp.lt.u32.totalorder %s6446_s27, %s7330_s4 }
  0x18   :  { %p6452_p10 = pnand %p6450_p9, %p6447_p8 }
  0x1a   :  { %6455 = shalt.err (!%p6452_p10)
}
  0x1b   :  { %s6456_s13 = scalar_lea.vmem %s6625_s12, 1536  ;;  %p6461_p12 = scmp.lt.s32.totalorder %s6625_s12, %s6625_s12 }
  0x1c   :  { %p6457_p11 = scmp.ne.s32.totalorder %s6625_s12, %s6456_s13  ;;  %p6462_p13 = scmp.lt.s32.totalorder %s6456_s13, %s6456_s13 }
  0x1e   :  { %p6463_p0 = por %p6462_p13, %p6461_p12 }
  0x20   :  { %p6464_p1 = pnand %p6463_p0, %p6457_p11 }
  0x22   :  { %6467 = shalt.err (!%p6464_p1)
}
  0x23   :  { %67 = dma.hbm_to_vmem [thread:$0]  %s7330_s4, 1536, %s6625_s12, [#allocation13], %s6566_s21, %s6566_s21, %s6567_s22  }
  0x24   :  { %s6568_s14 = smov [#allocation6]   ;;  %s6569_s16 = smov [#allocation11]  }
  0x25   :  { %s23_s15 = sshll.u32 %s6568_s14, 4  ;;  %s47_s17 = sshll.u32 %s6569_s16, 4  ;;  %s24_s15 = int_to_ptr.vmem [resolvable:$true] %s23_s15  ;;  %s6662_s17 = int_to_ptr.vmem [resolvable:$true] %s47_s17 }
  0x26   :  { %s6468_s20 = scalar_lea.hbm %s7326_s0, 1024 }
  0x27   :  { %p6469_p2 = scmp.ne.s32.totalorder %s7326_s0, %s6468_s20  ;;  %p6472_p3 = scmp.lt.u32.totalorder %s6468_s20, %s7326_s0 }
  0x29   :  { %p6474_p4 = pnand %p6472_p3, %p6469_p2 }
  0x2b   :  { %6477 = shalt.err (!%p6474_p4)
}
  0x2c   :  { %s6478_s4 = scalar_lea.vmem %s24_s15, 1024  ;;  %p6483_p6 = scmp.lt.s32.totalorder %s24_s15, %s24_s15 }
  0x2d   :  { %p6479_p5 = scmp.ne.s32.totalorder %s24_s15, %s6478_s4  ;;  %p6484_p7 = scmp.lt.s32.totalorder %s6478_s4, %s6478_s4 }
  0x2f   :  { %p6485_p8 = por %p6484_p7, %p6483_p6 }
  0x31   :  { %p6486_p9 = pnand %p6485_p8, %p6479_p5 }
  0x33   :  { %6489 = shalt.err (!%p6486_p9)
}
  0x34   :  { %29 = dma.hbm_to_vmem [thread:$0]  %s7326_s0, 1024, %s24_s15, [#allocation7], %s6566_s21, %s6566_s21, %s6567_s22  }
  0x35   :  { %s6490_s30 = scalar_lea.hbm %s7328_s2, 1536 }
  0x36   :  { %p6491_p10 = scmp.ne.s32.totalorder %s7328_s2, %s6490_s30  ;;  %p6494_p11 = scmp.lt.u32.totalorder %s6490_s30, %s7328_s2 }
  0x38   :  { %p6496_p12 = pnand %p6494_p11, %p6491_p10 }
  0x3a   :  { %6499 = shalt.err (!%p6496_p12)
}
  0x3b   :  { %s6500_s14 = scalar_lea.vmem %s6662_s17, 1536  ;;  %p6505_p0 = scmp.lt.s32.totalorder %s6662_s17, %s6662_s17 }
  0x3c   :  { %p6501_p13 = scmp.ne.s32.totalorder %s6662_s17, %s6500_s14  ;;  %p6506_p1 = scmp.lt.s32.totalorder %s6500_s14, %s6500_s14 }
  0x3e   :  { %p6507_p2 = por %p6506_p1, %p6505_p0 }
  0x40   :  { %p6508_p3 = pnand %p6507_p2, %p6501_p13 }
  0x42   :  { %6511 = shalt.err (!%p6508_p3)
}
  0x43   :  { %53 = dma.hbm_to_vmem [thread:$0]  %s7328_s2, 1536, %s6662_s17, [#allocation10], %s6566_s21, %s6566_s21, %s6567_s22  }
  0x44   :  { %s6570_s16 = smov [#allocation14]   ;;  %s6512_s23 = scalar_lea.hbm %s7331_s5, 1536 }
  0x45   :  { %s73_s18 = sshll.u32 %s6570_s16, 4  ;;  %p6513_p4 = scmp.ne.s32.totalorder %s7331_s5, %s6512_s23  ;;  %s74_s18 = int_to_ptr.vmem [resolvable:$true] %s73_s18 }
  0x46   :  { %p6516_p5 = scmp.lt.u32.totalorder %s6512_s23, %s7331_s5 }
  0x48   :  { %p6518_p6 = pnand %p6516_p5, %p6513_p4 }
  0x4a   :  { %6521 = shalt.err (!%p6518_p6)
}
  0x4b   :  { %s6522_s12 = scalar_lea.vmem %s74_s18, 1536  ;;  %p6527_p8 = scmp.lt.s32.totalorder %s74_s18, %s74_s18 }
  0x4c   :  { %p6523_p7 = scmp.ne.s32.totalorder %s74_s18, %s6522_s12  ;;  %p6528_p9 = scmp.lt.s32.totalorder %s6522_s12, %s6522_s12 }
  0x4e   :  { %p6529_p10 = por %p6528_p9, %p6527_p8 }
  0x50   :  { %p6530_p11 = pnand %p6529_p10, %p6523_p7 }
  0x52   :  { %6533 = shalt.err (!%p6530_p11)
}
  0x53   :  { %79 = dma.hbm_to_vmem [thread:$0]  %s7331_s5, 1536, %s74_s18, [#allocation13], %s6566_s21, %s6566_s21, %s6567_s22  }
  0x54   :  { %6556 = dma.done.wait [#allocation7], 1024  }
  0x55   :  { %6557 = vsyncadd [#allocation7], 4294966272 }
  0x56   :  { %6558 = dma.done.wait [#allocation10], 2304  }
  0x57   :  { %6559 = vsyncadd [#allocation10], 4294964992 }
  0x58   :  { %6560 = dma.done.wait [#allocation13], 3072  }
  0x59   :  { %6561 = vsyncadd [#allocation13], 4294964224  ;;  %vm139_vm0 = vcmask 130048   ;;  %v101_v0 = vld [vmem:[#allocation9] sm:$0xff]  ;;  %v102_v1 = vld [vmem:[#allocation9 + $0x8] sm:$0xff]  ;;  %v6571_v16 = vmov 0.0|0.0  }
  0x5a   :  { %v6714_v2 = vld [vmem:[#allocation6 + $0x30] sm:$0xff]  ;;  %v5921_v3 = vpack.c.bf16 %v102_v1, %v101_v0  ;;  %v105_v5 = vld [vmem:[#allocation9 + $0x18] sm:$0xff]  ;;  %v127_v8 = vld [vmem:[#allocation6] sm:$0xff]  ;;  %vm6572_vm1 = vmmov 0   ;;  %v6573_v32 = vmov 0.0   ;;  %vm269_vm2 = vcmask 261120  }
  0x5b   :  { %5287 = vmatprep.mubr.msk.f32.mxu1 %vm139_vm0, %v6714_v2  ;;  %v104_v4 = vld [vmem:[#allocation9 + $0x10] sm:$0xff]  ;;  %v6718_v7 = vld [vmem:[#allocation6 + $0x38] sm:$0xff]  ;;  %5278 = vmatprep.mubr.msk.f32.mxu0 %vm139_vm0, %v127_v8  ;;  %v107_v11 = vld [vmem:[#allocation9 + $0x20] sm:$0xff]  ;;  %s6574_s12 = smov [#allocation15]   ;;  %vm4844_vm3 = vcmask 64512  }
  0x5c   :  { %v5925_v6 = vpack.c.bf16 %v105_v5, %v104_v4  ;;  %6251 = vmatprep.subr.bf16.mxu1 %v5921_v3  ;;  %5922 = vmatprep.subr.bf16.mxu0 %v5921_v3  ;;  %v109_v9 = vld [vmem:[#allocation11] sm:$0xff]  ;;  %v110_v10 = vld [vmem:[#allocation11 + $0x8] sm:$0xff]  ;;  %v108_v12 = vld [vmem:[#allocation9 + $0x28] sm:$0xff]  ;;  %s4852_s2 = sshll.u32 %s6574_s12, 4  ;;  %s4853_s2 = int_to_ptr.vmem [resolvable:$true] %s4852_s2 }
  0x5d   :  { %6252 = vmatpush3.bf16.msra.mxu1 %v5921_v3  ;;  %5924 = vmatpush3.bf16.msra.mxu0 %v5921_v3  ;;  %v128_v13 = vld [vmem:[#allocation6 + $0x8] sm:$0xff]  ;;  %v5929_v14 = vpack.c.bf16 %v108_v12, %v107_v11  ;;  %v6725_v15 = vpack.c.bf16 %v110_v10, %v109_v9  ;;  %v129_v17 = vld [vmem:[#allocation6 + $0x10] sm:$0xff]  ;;  %v111_v18 = vld [vmem:[#allocation11 + $0x10] sm:$0xff]  ;;  %s6534_s17 = scalar_lea.vmem %s4853_s2, 128  ;;  %p6539_p13 = scmp.lt.s32.totalorder %s4853_s2, %s4853_s2 }
  0x5e   :  { %5926 = vmatprep.subr.bf16.mxu1 %v5925_v6  ;;  %v112_v19 = vld [vmem:[#allocation11 + $0x18] sm:$0xff]  ;;  %v130_v20 = vld [vmem:[#allocation6 + $0x18] sm:$0xff]  ;;  %v131_v21 = vld [vmem:[#allocation6 + $0x20] sm:$0xff]  ;;  %p6535_p12 = scmp.ne.s32.totalorder %s4853_s2, %s6534_s17  ;;  %p6540_p0 = scmp.lt.s32.totalorder %s6534_s17, %s6534_s17 }
  0x5f   :  { %5930 = vmatprep.subr.bf16.mxu0 %v5929_v14  ;;  %v6733_v22 = vpack.c.bf16 %v112_v19, %v111_v18  ;;  %v119_v23 = vld [vmem:[#allocation11 + $0x40] sm:$0xff]  ;;  %v120_v24 = vld [vmem:[#allocation11 + $0x48] sm:$0xff]  ;;  %v132_v25 = vld [vmem:[#allocation6 + $0x28] sm:$0xff] }
  0x60   :  { %5288 = vmatmul.mubr.msk.f32.vlgmr.msra.gmra.mrb[0].mxu1 %vm139_vm0, %v6718_v7  ;;  %5279 = vmatmul.mubr.msk.f32.vlgmr.msra.gmra.mrb[0].mxu0 %vm139_vm0, %v128_v13  ;;  %v6742_v26 = vpack.c.bf16 %v120_v24, %v119_v23  ;;  %v121_v27 = vld [vmem:[#allocation11 + $0x50] sm:$0xff]  ;;  %v122_v28 = vld [vmem:[#allocation11 + $0x58] sm:$0xff]  ;;  %v114_v29 = vld [vmem:[#allocation11 + $0x20] sm:$0xff]  ;;  %p6541_p1 = por %p6540_p0, %p6539_p13 }
  0x61   :  { %5928 = vmatpush3.bf16.msra.mxu1 %v5925_v6  ;;  %5294 = vmatprep.mubr.msk.f32.mxu1 %vm139_vm0, %v127_v8  ;;  %v115_v30 = vld [vmem:[#allocation11 + $0x28] sm:$0xff]  ;;  %v6753_v31 = vpack.c.bf16 %v122_v28, %v121_v27  ;;  %v116_v34 = vld [vmem:[#allocation11 + $0x30] sm:$0xff]  ;;  %v117_v35 = vld [vmem:[#allocation11 + $0x38] sm:$0xff] }
  0x62   :  { %5933 = vmatprep.subr.bf16.mxu1 %v6571_v16  ;;  %5932 = vmatpush3.bf16.msra.mxu0 %v5929_v14  ;;  %v6760_v33 = vpack.c.bf16 %v115_v30, %v114_v29  ;;  %v6768_v36 = vpack.c.bf16 %v117_v35, %v116_v34  ;;  %v4863_v37 = vld [vmem:[%s7329_s3] ss:$0 sm:$0xff]  ;;  %v4872_v45 = vld [vmem:[%s7329_s3 + $0x1] ss:$0 sm:$0xff]  ;;  %v4881_v63 = vld [vmem:[%s7329_s3 + $0x2] ss:$0 sm:$0xff]  ;;  %p6542_p2 = pnand %p6541_p1, %p6535_p12 }
  0x63   :  { %5281 = vmatprep.mubr.msk.f32.mxu0 %vm139_vm0, %v129_v17  ;;  %5945 = vmatprep.subr.bf16.mxu0 %v6571_v16 }
  0x64   :  { %5295 = vmatmul.mubr.msk.f32.vlgmr.msra.gmra.mrb[2].mxu1 %vm139_vm0, %v128_v13  ;;  %5282 = vmatmul.mubr.msk.f32.gmra.mrb[2].mxu0 %vm139_vm0, %v130_v20 }
  0x65   :  { %5935 = vmatpush3.bf16.msra.mxu1 %v6725_v15  ;;  %5297 = vmatprep.mubr.msk.f32.mxu1 %vm139_vm0, %v129_v17 }
  0x66   :  { %5936 = vmatprep.subr.bf16.mxu1 %v6571_v16  ;;  %5284 = vmatprep.mubr.msk.f32.mxu0 %vm139_vm0, %v131_v21 }
  0x68   :  { %5298 = vmatmul.mubr.msk.f32.gmra.mrb[4].mxu1 %vm139_vm0, %v130_v20  ;;  %5285 = vmatmul.mubr.msk.f32.gmra.mrb[4].mxu0 %vm139_vm0, %v132_v25 }
  0x69   :  { %5300 = vmatprep.mubr.msk.f32.mxu1 %vm139_vm0, %v131_v21  ;;  %5938 = vmatpush3.bf16.msra.mxu1 %v6733_v22 }
  0x6a   :  { %5939 = vmatprep.subr.bf16.mxu1 %v6571_v16  ;;  %5310 = vmatprep.mubr.msk.f32.mxu0 %vm139_vm0, %v127_v8 }
  0x6c   :  { %5301 = vmatmul.mubr.msk.f32.gmra.mrb[6].mxu1 %vm139_vm0, %v132_v25  ;;  %5311 = vmatmul.mubr.msk.f32.vlgmr.msra.gmra.mrb[6].mxu0 %vm139_vm0, %v128_v13 }
  0x6d   :  { %5303 = vmatprep.mubr.msk.f32.mxu1 %vm139_vm0, %v6714_v2  ;;  %5947 = vmatpush3.bf16.msra.mxu0 %v6742_v26 }
  0x6e   :  { %5313 = vmatprep.mubr.msk.f32.mxu0 %vm139_vm0, %v129_v17  ;;  %5948 = vmatprep.subr.bf16.mxu0 %v6571_v16 }
  0x70   :  { %5304 = vmatmul.mubr.msk.f32.gmra.mrb[8].mxu1 %vm139_vm0, %v6718_v7  ;;  %5314 = vmatmul.mubr.msk.f32.gmra.mrb[8].mxu0 %vm139_vm0, %v130_v20 }
  0x71   :  { %5330 = vmatprep.mubr.msk.f32.mxu1 %vm6572_vm1, %v6573_v32  ;;  %5316 = vmatprep.mubr.msk.f32.mxu0 %vm139_vm0, %v131_v21 }
  0x72   :  { %5950 = vmatpush3.bf16.msra.mxu0 %v6753_v31 }
  0x73   :  { %5957 = vmatprep.subr.bf16.mxu0 %v6571_v16 }
  0x74   :  { %5331 = vmatmul.mubr.f32.vlgmr.msra.gmra.mrb[10].mxu1 %v6573_v32  ;;  %5317 = vmatmul.mubr.msk.f32.gmra.mrb[10].mxu0 %vm139_vm0, %v132_v25 }
  0x75   :  { %5941 = vmatpush3.bf16.msra.mxu1 %v6760_v33  ;;  %5341 = vmatprep.mubr.msk.f32.mxu1 %vm6572_vm1, %v6573_v32 }
  0x76   :  { %5942 = vmatprep.subr.bf16.mxu1 %v6571_v16  ;;  %5319 = vmatprep.mubr.msk.f32.mxu0 %vm139_vm0, %v6714_v2 }
  0x78   :  { %5320 = vmatmul.mubr.msk.f32.gmra.mrb[12].mxu0 %vm139_vm0, %v6718_v7 }
  0x79   :  { %5944 = vmatpush3.bf16.msra.mxu1 %v6768_v36  ;;  %5352 = vmatprep.mubr.msk.f32.mxu0 %vm6572_vm1, %v6573_v32 }
  0x7a   :  { %5951 = vmatprep.subr.bf16.mxu1 %v6571_v16 }
  0x7c   :  { %5342 = vmatmul.mubr.f32.vlgmr.msra.gmra.mrb[12].mxu1 %v6573_v32  ;;  %5353 = vmatmul.mubr.f32.vlgmr.msra.gmra.mrb[14].mxu0 %v6573_v32 }
  0x7d   :  { %5953 = vmatpush3.bf16.msra.mxu1 %v6725_v15  ;;  %5959 = vmatpush3.bf16.msra.mxu0 %v6760_v33 }
  0x7e   :  { %5954 = vmatprep.subr.bf16.mxu1 %v6571_v16  ;;  %5960 = vmatprep.subr.bf16.mxu0 %v6571_v16 }
  0x7f   :  { %5363 = vmatprep.mubr.msk.f32.mxu1 %vm6572_vm1, %v6573_v32  ;;  %5374 = vmatprep.mubr.msk.f32.mxu0 %vm6572_vm1, %v6573_v32 }
  0x81   :  { %5956 = vmatpush3.bf16.msra.mxu1 %v6733_v22  ;;  %5962 = vmatpush3.bf16.msra.mxu0 %v6768_v36 }
  0x82   :  { %5963 = vmatprep.subr.bf16.mxu1 %v6571_v16  ;;  %5969 = vmatprep.subr.bf16.mxu0 %v6571_v16 }
 0x133   :  { %v5289_v38 = vpop.f32.mrb[0].mxu1  ;;  %v5280_v39 = vpop.f32.mrb[0].mxu0 }
 0x134   :  { %v266_v40 = vadd.f32 %v5289_v38, %v4863_v37  ;;  %v260_v41 = vpop.f32.mrb[1].mxu1  ;;  %v236_v42 = vadd.f32 %v5280_v39, %v4863_v37  ;;  %v230_v43 = vpop.f32.mrb[1].mxu0 }
 0x135   :  { %v261_v44 = vadd.f32 %v4863_v37, %v260_v41  ;;  %v231_v46 = vadd.f32 %v4863_v37, %v230_v43 }
 0x136   :  { %277 = vst.msk [vmem:[#allocation3 + $0x38] sm:$0xff] %vm269_vm2, %v266_v40  ;;  %271 = vst.msk [vmem:[#allocation3 + $0x8] sm:$0xff] %vm269_vm2, %v236_v42 }
 0x137   :  { %276 = vst.msk [vmem:[#allocation3 + $0x30] sm:$0xff] %vm269_vm2, %v261_v44  ;;  %v5296_v47 = vpop.f32.mrb[2].mxu1  ;;  %270 = vst.msk [vmem:[#allocation3] sm:$0xff] %vm269_vm2, %v231_v46  ;;  %v5283_v48 = vpop.f32.mrb[2].mxu0 }
 0x138   :  { %v354_v49 = vadd.f32 %v5296_v47, %v4872_v45  ;;  %v348_v50 = vpop.f32.mrb[3].mxu1  ;;  %v246_v51 = vadd.f32 %v5283_v48, %v4863_v37  ;;  %v240_v52 = vpop.f32.mrb[3].mxu0  ;;  %v6831_v48 = vld [vmem:[%s7329_s3 + $0x3] ss:$0 sm:$0xff] }
 0x139   :  { %v349_v53 = vadd.f32 %v4872_v45, %v348_v50  ;;  %v241_v54 = vadd.f32 %v4863_v37, %v240_v52 }
 0x13a   :  { %388 = vst.msk [vmem:[#allocation4 + $0x8] sm:$0xff] %vm269_vm2, %v354_v49  ;;  %273 = vst.msk [vmem:[#allocation3 + $0x18] sm:$0xff] %vm269_vm2, %v246_v51 }
 0x13b   :  { %387 = vst.msk [vmem:[#allocation4] sm:$0xff] %vm269_vm2, %v349_v53  ;;  %v5299_v55 = vpop.f32.mrb[4].mxu1  ;;  %272 = vst.msk [vmem:[#allocation3 + $0x10] sm:$0xff] %vm269_vm2, %v241_v54  ;;  %v5286_v56 = vpop.f32.mrb[4].mxu0 }
 0x13c   :  { %v364_v57 = vadd.f32 %v5299_v55, %v4872_v45  ;;  %v358_v58 = vpop.f32.mrb[5].mxu1  ;;  %v256_v59 = vadd.f32 %v5286_v56, %v4863_v37  ;;  %v250_v60 = vpop.f32.mrb[5].mxu0 }
 0x13d   :  { %v359_v61 = vadd.f32 %v4872_v45, %v358_v58  ;;  %v251_v62 = vadd.f32 %v4863_v37, %v250_v60 }
 0x13e   :  { %390 = vst.msk [vmem:[#allocation4 + $0x18] sm:$0xff] %vm269_vm2, %v364_v57  ;;  %275 = vst.msk [vmem:[#allocation3 + $0x28] sm:$0xff] %vm269_vm2, %v256_v59  ;;  %v655_v17 = vld [vmem:[#allocation3] sm:$0xff] }
 0x13f   :  { %389 = vst.msk [vmem:[#allocation4 + $0x10] sm:$0xff] %vm269_vm2, %v359_v61  ;;  %v5302_v0 = vpop.f32.mrb[6].mxu1  ;;  %274 = vst.msk [vmem:[#allocation3 + $0x20] sm:$0xff] %vm269_vm2, %v251_v62  ;;  %v5312_v1 = vpop.f32.mrb[6].mxu0 }
 0x140   :  { %v374_v2 = vadd.f32 %v5302_v0, %v4872_v45  ;;  %v368_v3 = vpop.f32.mrb[7].mxu1  ;;  %v471_v4 = vadd.f32 %v5312_v1, %v4881_v63  ;;  %v465_v5 = vpop.f32.mrb[7].mxu0 }
 0x141   :  { %v369_v6 = vadd.f32 %v4872_v45, %v368_v3  ;;  %v466_v7 = vadd.f32 %v4881_v63, %v465_v5 }
 0x142   :  { %392 = vst.msk [vmem:[#allocation4 + $0x28] sm:$0xff] %vm269_vm2, %v374_v2  ;;  %505 = vst.msk [vmem:[#allocation5 + $0x8] sm:$0xff] %vm269_vm2, %v471_v4  ;;  %v663_v39 = vld [vmem:[#allocation4] sm:$0xff]  ;;  %v907_v2 = vld [vmem:[#allocation4 + $0x8] sm:$0xff] }
 0x143   :  { %391 = vst.msk [vmem:[#allocation4 + $0x20] sm:$0xff] %vm269_vm2, %v369_v6  ;;  %v5305_v8 = vpop.f32.mrb[8].mxu1  ;;  %504 = vst.msk [vmem:[#allocation5] sm:$0xff] %vm269_vm2, %v466_v7  ;;  %v5315_v9 = vpop.f32.mrb[8].mxu0 }
 0x144   :  { %v384_v10 = vadd.f32 %v5305_v8, %v4872_v45  ;;  %v378_v11 = vpop.f32.mrb[9].mxu1  ;;  %v481_v12 = vadd.f32 %v5315_v9, %v4881_v63  ;;  %v475_v13 = vpop.f32.mrb[9].mxu0 }
 0x145   :  { %v379_v14 = vadd.f32 %v4872_v45, %v378_v11  ;;  %v476_v18 = vadd.f32 %v4881_v63, %v475_v13 }
 0x146   :  { %394 = vst.msk [vmem:[#allocation4 + $0x38] sm:$0xff] %vm269_vm2, %v384_v10  ;;  %507 = vst.msk [vmem:[#allocation5 + $0x18] sm:$0xff] %vm269_vm2, %v481_v12 }
 0x147   :  { %393 = vst.msk [vmem:[#allocation4 + $0x30] sm:$0xff] %vm269_vm2, %v379_v14  ;;  %v581_v19 = vpop.f32.mrb[10].mxu1  ;;  %506 = vst.msk [vmem:[#allocation5 + $0x10] sm:$0xff] %vm269_vm2, %v476_v18  ;;  %v5318_v20 = vpop.f32.mrb[10].mxu0 }
 0x148   :  { %v656_v21 = vadd.f32 %v655_v17, %v581_v19  ;;  %v5332_v23 = vpop.f32.mrb[11].mxu1  ;;  %v491_v24 = vadd.f32 %v5318_v20, %v4881_v63  ;;  %v485_v25 = vpop.f32.mrb[11].mxu0 }
 0x149   :  { %v486_v27 = vadd.f32 %v4881_v63, %v485_v25 }
 0x14a   :  { %v657_v28 = vsub.f32 0.0, %v656_v21  ;;  %509 = vst.msk [vmem:[#allocation5 + $0x28] sm:$0xff] %vm269_vm2, %v491_v24  ;;  %v671_v54 = vld [vmem:[#allocation5] sm:$0xff]  ;;  %v916_v21 = vld [vmem:[#allocation5 + $0x8] sm:$0xff] }
 0x14b   :  { %508 = vst.msk [vmem:[#allocation5 + $0x20] sm:$0xff] %vm269_vm2, %v486_v27  ;;  %v5321_v29 = vpop.f32.mrb[12].mxu0 }
 0x14c   :  { %v658_v30 = vmul.f32 1.442695, %v657_v28  ;;  %v501_v34 = vadd.f32 %v5321_v29, %v4881_v63  ;;  %v495_v35 = vpop.f32.mrb[13].mxu0 }
 0x14d   :  { %v496_v37 = vadd.f32 %v4881_v63, %v495_v35  ;;  %v898_v63 = vld [vmem:[#allocation3 + $0x8] sm:$0xff]  ;;  %v1140_v35 = vld [vmem:[#allocation3 + $0x10] sm:$0xff] }
 0x14e   :  { %6264 = vpow2.f32 %v658_v30  ;;  %511 = vst.msk [vmem:[#allocation5 + $0x38] sm:$0xff] %vm269_vm2, %v501_v34 }
 0x14f   :  { %v651_v38 = vpop.f32.mrb[12].mxu1  ;;  %510 = vst.msk [vmem:[#allocation5 + $0x30] sm:$0xff] %vm269_vm2, %v496_v37  ;;  %v742_v40 = vpop.f32.mrb[14].mxu0 }
 0x150   :  { %v664_v41 = vadd.f32 %v663_v39, %v651_v38  ;;  %v5343_v42 = vpop.f32.mrb[13].mxu1  ;;  %v5354_v43 = vpop.f32.mrb[15].mxu0  ;;  %v743_v51 = vadd.f32 %v6831_v48, %v742_v40  ;;  %v1149_v39 = vld [vmem:[#allocation4 + $0x10] sm:$0xff] }
 0x152   :  { %v665_v44 = vsub.f32 0.0, %v664_v41 }
 0x154   :  { %v666_v45 = vmul.f32 1.442695, %v665_v44 }
 0x156   :  { %6266 = vpow2.f32 %v666_v45 }
 0x158   :  { %v6265_v46 = vpop.eup %6264 }
 0x159   :  { %v660_v47 = vadd.f32 1.0, %v6265_v46 }
 0x15b   :  { %6268 = vrcp.f32 %v660_v47 }
 0x160   :  { %v6267_v49 = vpop.eup %6266 }
 0x161   :  { %v668_v50 = vadd.f32 1.0, %v6267_v49 }
 0x163   :  { %6270 = vrcp.f32 %v668_v50 }
 0x165   :  { %v6269_v52 = vpop.eup %6268 }
 0x166   :  { %v746_v53 = vmul.f32 %v6269_v52, %v743_v51 }
 0x168   :  { %v747_v55 = vadd.f32 %v746_v53, %v671_v54 }
 0x16a   :  { %6272 = vtanh.f32 %v747_v55 }
 0x16d   :  { %v6271_v56 = vpop.eup %6270 }
 0x16e   :  { %v749_v57 = vsub.f32 1.0, %v6271_v56  ;;  %v751_v60 = vmul.f32 0.0, %v6271_v56 }
 0x174   :  { %v6273_v58 = vpop.eup %6272 }
 0x175   :  { %v750_v59 = vmul.f32 %v6273_v58, %v749_v57  ;;  %v1158_v57 = vld [vmem:[#allocation5 + $0x10] sm:$0xff] }
 0x177   :  { %v752_v61 = vadd.f32 %v751_v60, %v750_v59 }
 0x179   :  { %753 = vst.msk [vmem:[#allocation2] sm:$0xff] %vm269_vm2, %v752_v61  ;;  %5364 = vmatmul.mubr.msk.f32.vlgmr.msra.gmra.mrb[14].mxu1 %vm269_vm2, %v752_v61  ;;  %5375 = vmatmul.mubr.msk.f32.vlgmr.msra.gmra.mrb[16].mxu0 %vm269_vm2, %v752_v61 }
 0x17a   :  { %5965 = vmatpush3.bf16.msra.mxu1 %v6742_v26  ;;  %5385 = vmatprep.mubr.msk.f32.mxu1 %vm6572_vm1, %v6573_v32 }
 0x17b   :  { %5966 = vmatprep.subr.bf16.mxu1 %v6571_v16  ;;  %5971 = vmatpush3.bf16.msra.mxu0 %v6725_v15 }
 0x17c   :  { %5972 = vmatprep.subr.bf16.mxu0 %v6571_v16  ;;  %5396 = vmatprep.mubr.msk.f32.mxu0 %vm6572_vm1, %v6573_v32 }
 0x17e   :  { %5968 = vmatpush3.bf16.msra.mxu1 %v6753_v31 }
 0x17f   :  { %5975 = vmatprep.subr.bf16.mxu1 %v6571_v16  ;;  %5974 = vmatpush3.bf16.msra.mxu0 %v6733_v22 }
 0x180   :  { %5981 = vmatprep.subr.bf16.mxu0 %v6571_v16 }
 0x181   :  { %5386 = vmatmul.mubr.msk.f32.vlgmr.msra.gmra.mrb[16].mxu1 %vm269_vm2, %v752_v61 }
 0x182   :  { %5977 = vmatpush3.bf16.msra.mxu1 %v6760_v33  ;;  %5407 = vmatprep.mubr.msk.f32.mxu1 %vm6572_vm1, %v6573_v32 }
 0x183   :  { %5978 = vmatprep.subr.bf16.mxu1 %v6571_v16 }
 0x186   :  { %5980 = vmatpush3.bf16.msra.mxu1 %v6768_v36 }
 0x187   :  { %5987 = vmatprep.subr.bf16.mxu1 %v6571_v16 }
 0x24c   :  { %v823_v62 = vpop.f32.mrb[14].mxu1  ;;  %v893_v0 = vpop.f32.mrb[16].mxu0 }
 0x24d   :  { %v899_v1 = vadd.f32 %v898_v63, %v823_v62  ;;  %v5365_v3 = vpop.f32.mrb[15].mxu1  ;;  %v5376_v4 = vpop.f32.mrb[17].mxu0  ;;  %v908_v5 = vadd.f32 %v907_v2, %v893_v0  ;;  %v1382_v2 = vld [vmem:[#allocation3 + $0x18] sm:$0xff] }
 0x24f   :  { %v900_v6 = vsub.f32 0.0, %v899_v1  ;;  %v909_v8 = vsub.f32 0.0, %v908_v5  ;;  %v1391_v5 = vld [vmem:[#allocation4 + $0x18] sm:$0xff] }
 0x251   :  { %v901_v7 = vmul.f32 1.442695, %v900_v6  ;;  %v910_v11 = vmul.f32 1.442695, %v909_v8 }
 0x253   :  { %6274 = vpow2.f32 %v901_v7 }
 0x254   :  { %v983_v9 = vpop.f32.mrb[16].mxu1  ;;  %6276 = vpow2.f32 %v910_v11 }
 0x255   :  { %v5387_v10 = vpop.f32.mrb[17].mxu1  ;;  %v984_v18 = vadd.f32 %v6831_v48, %v983_v9 }
 0x25d   :  { %v6275_v12 = vpop.eup %6274 }
 0x25e   :  { %v903_v13 = vadd.f32 1.0, %v6275_v12  ;;  %v6277_v14 = vpop.eup %6276 }
 0x25f   :  { %v912_v17 = vadd.f32 1.0, %v6277_v14 }
 0x260   :  { %6278 = vrcp.f32 %v903_v13 }
 0x261   :  { %6280 = vrcp.f32 %v912_v17 }
 0x26a   :  { %v6279_v19 = vpop.eup %6278 }
 0x26b   :  { %v987_v20 = vmul.f32 %v6279_v19, %v984_v18  ;;  %v6281_v24 = vpop.eup %6280 }
 0x26c   :  { %v990_v25 = vsub.f32 1.0, %v6281_v24  ;;  %v992_v29 = vmul.f32 %v6281_v24, %v752_v61 }
 0x26d   :  { %v988_v23 = vadd.f32 %v987_v20, %v916_v21 }
 0x26f   :  { %6282 = vtanh.f32 %v988_v23 }
 0x279   :  { %v6283_v27 = vpop.eup %6282 }
 0x27a   :  { %v991_v28 = vmul.f32 %v6283_v27, %v990_v25  ;;  %v1400_v25 = vld [vmem:[#allocation5 + $0x18] sm:$0xff] }
 0x27c   :  { %v993_v30 = vadd.f32 %v992_v29, %v991_v28 }
 0x27e   :  { %995 = vst.msk [vmem:[#allocation2 + $0x8] sm:$0xff] %vm269_vm2, %v993_v30  ;;  %5397 = vmatmul.mubr.msk.f32.vlgmr.msra.gmra.mrb[18].mxu0 %vm269_vm2, %v993_v30  ;;  %5408 = vmatmul.mubr.msk.f32.vlgmr.msra.gmra.mrb[18].mxu1 %vm269_vm2, %v993_v30 }
 0x27f   :  { %5983 = vmatpush3.bf16.msra.mxu0 %v6742_v26  ;;  %5418 = vmatprep.mubr.msk.f32.mxu0 %vm6572_vm1, %v6573_v32 }
 0x280   :  { %5984 = vmatprep.subr.bf16.mxu0 %v6571_v16  ;;  %5989 = vmatpush3.bf16.msra.mxu1 %v6725_v15 }
 0x281   :  { %5990 = vmatprep.subr.bf16.mxu1 %v6571_v16  ;;  %5429 = vmatprep.mubr.msk.f32.mxu1 %vm6572_vm1, %v6573_v32 }
 0x283   :  { %5986 = vmatpush3.bf16.msra.mxu0 %v6753_v31 }
 0x284   :  { %5993 = vmatprep.subr.bf16.mxu0 %v6571_v16  ;;  %5992 = vmatpush3.bf16.msra.mxu1 %v6733_v22 }
 0x285   :  { %5999 = vmatprep.subr.bf16.mxu1 %v6571_v16 }
 0x286   :  { %5419 = vmatmul.mubr.msk.f32.vlgmr.msra.gmra.mrb[20].mxu0 %vm269_vm2, %v993_v30 }
 0x287   :  { %5995 = vmatpush3.bf16.msra.mxu0 %v6760_v33  ;;  %5440 = vmatprep.mubr.msk.f32.mxu0 %vm6572_vm1, %v6573_v32 }
 0x288   :  { %5996 = vmatprep.subr.bf16.mxu0 %v6571_v16 }
 0x28b   :  { %5998 = vmatpush3.bf16.msra.mxu0 %v6768_v36 }
 0x28c   :  { %6005 = vmatprep.subr.bf16.mxu0 %v6571_v16 }
 0x351   :  { %v1065_v34 = vpop.f32.mrb[18].mxu0  ;;  %v1135_v37 = vpop.f32.mrb[18].mxu1 }
 0x352   :  { %v1141_v38 = vadd.f32 %v1140_v35, %v1065_v34  ;;  %v5398_v40 = vpop.f32.mrb[19].mxu0  ;;  %v5409_v41 = vpop.f32.mrb[19].mxu1  ;;  %v1150_v42 = vadd.f32 %v1149_v39, %v1135_v37  ;;  %v1624_v39 = vld [vmem:[#allocation3 + $0x20] sm:$0xff] }
 0x354   :  { %v1142_v43 = vsub.f32 0.0, %v1141_v38  ;;  %v1151_v45 = vsub.f32 0.0, %v1150_v42  ;;  %v1633_v42 = vld [vmem:[#allocation4 + $0x20] sm:$0xff] }
 0x356   :  { %v1143_v44 = vmul.f32 1.442695, %v1142_v43  ;;  %v1152_v49 = vmul.f32 1.442695, %v1151_v45 }
 0x358   :  { %6284 = vpow2.f32 %v1143_v44 }
 0x359   :  { %v1225_v46 = vpop.f32.mrb[20].mxu0  ;;  %6286 = vpow2.f32 %v1152_v49 }
 0x35a   :  { %v5420_v47 = vpop.f32.mrb[21].mxu0  ;;  %v1226_v54 = vadd.f32 %v6831_v48, %v1225_v46 }
 0x362   :  { %v6285_v50 = vpop.eup %6284 }
 0x363   :  { %v1145_v51 = vadd.f32 1.0, %v6285_v50  ;;  %v6287_v52 = vpop.eup %6286 }
 0x364   :  { %v1154_v53 = vadd.f32 1.0, %v6287_v52 }
 0x365   :  { %6288 = vrcp.f32 %v1145_v51 }
 0x366   :  { %6290 = vrcp.f32 %v1154_v53 }
 0x36f   :  { %v6289_v55 = vpop.eup %6288 }
 0x370   :  { %v1229_v56 = vmul.f32 %v6289_v55, %v1226_v54  ;;  %v6291_v59 = vpop.eup %6290 }
 0x371   :  { %v1232_v60 = vsub.f32 1.0, %v6291_v59  ;;  %v1234_v63 = vmul.f32 %v6291_v59, %v993_v30 }
 0x372   :  { %v1230_v58 = vadd.f32 %v1229_v56, %v1158_v57 }
 0x374   :  { %6292 = vtanh.f32 %v1230_v58 }
 0x37e   :  { %v6293_v61 = vpop.eup %6292 }
 0x37f   :  { %v1233_v62 = vmul.f32 %v6293_v61, %v1232_v60  ;;  %v1642_v60 = vld [vmem:[#allocation5 + $0x20] sm:$0xff] }
 0x381   :  { %v1235_v0 = vadd.f32 %v1234_v63, %v1233_v62 }
 0x383   :  { %1237 = vst.msk [vmem:[#allocation2 + $0x10] sm:$0xff] %vm269_vm2, %v1235_v0  ;;  %5430 = vmatmul.mubr.msk.f32.vlgmr.msra.gmra.mrb[20].mxu1 %vm269_vm2, %v1235_v0  ;;  %5441 = vmatmul.mubr.msk.f32.vlgmr.msra.gmra.mrb[22].mxu0 %vm269_vm2, %v1235_v0 }
 0x384   :  { %6001 = vmatpush3.bf16.msra.mxu1 %v6742_v26  ;;  %5451 = vmatprep.mubr.msk.f32.mxu1 %vm6572_vm1, %v6573_v32 }
 0x385   :  { %6002 = vmatprep.subr.bf16.mxu1 %v6571_v16  ;;  %6007 = vmatpush3.bf16.msra.mxu0 %v6725_v15 }
 0x386   :  { %6008 = vmatprep.subr.bf16.mxu0 %v6571_v16  ;;  %5462 = vmatprep.mubr.msk.f32.mxu0 %vm6572_vm1, %v6573_v32 }
 0x388   :  { %6004 = vmatpush3.bf16.msra.mxu1 %v6753_v31 }
 0x389   :  { %6011 = vmatprep.subr.bf16.mxu1 %v6571_v16  ;;  %6010 = vmatpush3.bf16.msra.mxu0 %v6733_v22 }
 0x38a   :  { %6017 = vmatprep.subr.bf16.mxu0 %v6571_v16 }
 0x38b   :  { %5452 = vmatmul.mubr.msk.f32.vlgmr.msra.gmra.mrb[22].mxu1 %vm269_vm2, %v1235_v0 }
 0x38c   :  { %6013 = vmatpush3.bf16.msra.mxu1 %v6760_v33  ;;  %5473 = vmatprep.mubr.msk.f32.mxu1 %vm6572_vm1, %v6573_v32 }
 0x38d   :  { %6014 = vmatprep.subr.bf16.mxu1 %v6571_v16 }
 0x390   :  { %6016 = vmatpush3.bf16.msra.mxu1 %v6768_v36 }
 0x391   :  { %6023 = vmatprep.subr.bf16.mxu1 %v6571_v16 }
 0x456   :  { %v1307_v1 = vpop.f32.mrb[20].mxu1  ;;  %v1377_v3 = vpop.f32.mrb[22].mxu0 }
 0x457   :  { %v1383_v4 = vadd.f32 %v1382_v2, %v1307_v1  ;;  %v5431_v6 = vpop.f32.mrb[21].mxu1  ;;  %v5442_v7 = vpop.f32.mrb[23].mxu0  ;;  %v1392_v8 = vadd.f32 %v1391_v5, %v1377_v3  ;;  %v1866_v5 = vld [vmem:[#allocation3 + $0x28] sm:$0xff] }
 0x459   :  { %v1384_v9 = vsub.f32 0.0, %v1383_v4  ;;  %v1393_v11 = vsub.f32 0.0, %v1392_v8  ;;  %v1875_v8 = vld [vmem:[#allocation4 + $0x28] sm:$0xff] }
 0x45b   :  { %v1385_v10 = vmul.f32 1.442695, %v1384_v9  ;;  %v1394_v14 = vmul.f32 1.442695, %v1393_v11 }
 0x45d   :  { %6294 = vpow2.f32 %v1385_v10 }
 0x45e   :  { %v1467_v12 = vpop.f32.mrb[22].mxu1  ;;  %6296 = vpow2.f32 %v1394_v14 }
 0x45f   :  { %v5453_v13 = vpop.f32.mrb[23].mxu1  ;;  %v1468_v21 = vadd.f32 %v6831_v48, %v1467_v12 }
 0x467   :  { %v6295_v17 = vpop.eup %6294 }
 0x468   :  { %v1387_v18 = vadd.f32 1.0, %v6295_v17  ;;  %v6297_v19 = vpop.eup %6296 }
 0x469   :  { %v1396_v20 = vadd.f32 1.0, %v6297_v19 }
 0x46a   :  { %6298 = vrcp.f32 %v1387_v18 }
 0x46b   :  { %6300 = vrcp.f32 %v1396_v20 }
 0x474   :  { %v6299_v23 = vpop.eup %6298 }
 0x475   :  { %v1471_v24 = vmul.f32 %v6299_v23, %v1468_v21  ;;  %v6301_v28 = vpop.eup %6300 }
 0x476   :  { %v1474_v29 = vsub.f32 1.0, %v6301_v28  ;;  %v1476_v35 = vmul.f32 %v6301_v28, %v1235_v0 }
 0x477   :  { %v1472_v27 = vadd.f32 %v1471_v24, %v1400_v25 }
 0x479   :  { %6302 = vtanh.f32 %v1472_v27 }
 0x483   :  { %v6303_v30 = vpop.eup %6302 }
 0x484   :  { %v1475_v34 = vmul.f32 %v6303_v30, %v1474_v29  ;;  %v1884_v29 = vld [vmem:[#allocation5 + $0x28] sm:$0xff] }
 0x486   :  { %v1477_v37 = vadd.f32 %v1476_v35, %v1475_v34 }
 0x488   :  { %1479 = vst.msk [vmem:[#allocation2 + $0x18] sm:$0xff] %vm269_vm2, %v1477_v37  ;;  %5463 = vmatmul.mubr.msk.f32.vlgmr.msra.gmra.mrb[24].mxu0 %vm269_vm2, %v1477_v37  ;;  %5474 = vmatmul.mubr.msk.f32.vlgmr.msra.gmra.mrb[24].mxu1 %vm269_vm2, %v1477_v37 }
 0x489   :  { %6019 = vmatpush3.bf16.msra.mxu0 %v6742_v26  ;;  %5484 = vmatprep.mubr.msk.f32.mxu0 %vm6572_vm1, %v6573_v32 }
 0x48a   :  { %6020 = vmatprep.subr.bf16.mxu0 %v6571_v16  ;;  %6025 = vmatpush3.bf16.msra.mxu1 %v6725_v15 }
 0x48b   :  { %6026 = vmatprep.subr.bf16.mxu1 %v6571_v16  ;;  %5495 = vmatprep.mubr.msk.f32.mxu1 %vm6572_vm1, %v6573_v32 }
 0x48d   :  { %6022 = vmatpush3.bf16.msra.mxu0 %v6753_v31 }
 0x48e   :  { %6029 = vmatprep.subr.bf16.mxu0 %v6571_v16  ;;  %6028 = vmatpush3.bf16.msra.mxu1 %v6733_v22 }
 0x48f   :  { %6035 = vmatprep.subr.bf16.mxu1 %v6571_v16 }
 0x490   :  { %5485 = vmatmul.mubr.msk.f32.vlgmr.msra.gmra.mrb[26].mxu0 %vm269_vm2, %v1477_v37 }
 0x491   :  { %6031 = vmatpush3.bf16.msra.mxu0 %v6760_v33  ;;  %5506 = vmatprep.mubr.msk.f32.mxu0 %vm6572_vm1, %v6573_v32 }
 0x492   :  { %6032 = vmatprep.subr.bf16.mxu0 %v6571_v16 }
 0x495   :  { %6034 = vmatpush3.bf16.msra.mxu0 %v6768_v36 }
 0x496   :  { %6041 = vmatprep.subr.bf16.mxu0 %v6571_v16 }
 0x55b   :  { %v1549_v38 = vpop.f32.mrb[24].mxu0  ;;  %v1619_v40 = vpop.f32.mrb[24].mxu1 }
 0x55c   :  { %v1625_v41 = vadd.f32 %v1624_v39, %v1549_v38  ;;  %v5464_v43 = vpop.f32.mrb[25].mxu0  ;;  %v5475_v44 = vpop.f32.mrb[25].mxu1  ;;  %v1634_v45 = vadd.f32 %v1633_v42, %v1619_v40 }
 0x55d   :  { %v2108_v44 = vld [vmem:[#allocation3 + $0x30] sm:$0xff] }
 0x55e   :  { %v1626_v46 = vsub.f32 0.0, %v1625_v41  ;;  %v1635_v49 = vsub.f32 0.0, %v1634_v45  ;;  %v2449_v41 = vld [vmem:[#allocation12 + $0x8] sm:$0xff] }
 0x560   :  { %v1627_v47 = vmul.f32 1.442695, %v1626_v46  ;;  %v1636_v52 = vmul.f32 1.442695, %v1635_v49  ;;  %v2117_v46 = vld [vmem:[#allocation4 + $0x30] sm:$0xff] }
 0x562   :  { %6304 = vpow2.f32 %v1627_v47 }
 0x563   :  { %v1709_v50 = vpop.f32.mrb[26].mxu0  ;;  %6306 = vpow2.f32 %v1636_v52 }
 0x564   :  { %v5486_v51 = vpop.f32.mrb[27].mxu0  ;;  %v1710_v57 = vadd.f32 %v6831_v48, %v1709_v50 }
 0x56c   :  { %v6305_v53 = vpop.eup %6304 }
 0x56d   :  { %v1629_v54 = vadd.f32 1.0, %v6305_v53  ;;  %v6307_v55 = vpop.eup %6306 }
 0x56e   :  { %v1638_v56 = vadd.f32 1.0, %v6307_v55 }
 0x56f   :  { %6308 = vrcp.f32 %v1629_v54 }
 0x570   :  { %6310 = vrcp.f32 %v1638_v56 }
 0x579   :  { %v6309_v58 = vpop.eup %6308 }
 0x57a   :  { %v1713_v59 = vmul.f32 %v6309_v58, %v1710_v57  ;;  %v6311_v62 = vpop.eup %6310 }
 0x57b   :  { %v1716_v63 = vsub.f32 1.0, %v6311_v62  ;;  %v1718_v2 = vmul.f32 %v6311_v62, %v1477_v37  ;;  %v2126_v62 = vld [vmem:[#allocation5 + $0x30] sm:$0xff] }
 0x57c   :  { %v1714_v61 = vadd.f32 %v1713_v59, %v1642_v60 }
 0x57e   :  { %6312 = vtanh.f32 %v1714_v61 }
 0x588   :  { %v6313_v0 = vpop.eup %6312 }
 0x589   :  { %v1717_v1 = vmul.f32 %v6313_v0, %v1716_v63 }
 0x58b   :  { %v1719_v3 = vadd.f32 %v1718_v2, %v1717_v1 }
 0x58d   :  { %1721 = vst.msk [vmem:[#allocation2 + $0x20] sm:$0xff] %vm269_vm2, %v1719_v3  ;;  %5496 = vmatmul.mubr.msk.f32.vlgmr.msra.gmra.mrb[26].mxu1 %vm269_vm2, %v1719_v3  ;;  %5507 = vmatmul.mubr.msk.f32.vlgmr.msra.gmra.mrb[28].mxu0 %vm269_vm2, %v1719_v3 }
 0x58e   :  { %6037 = vmatpush3.bf16.msra.mxu1 %v6742_v26  ;;  %5517 = vmatprep.mubr.msk.f32.mxu1 %vm6572_vm1, %v6573_v32 }
 0x58f   :  { %6038 = vmatprep.subr.bf16.mxu1 %v6571_v16  ;;  %6043 = vmatpush3.bf16.msra.mxu0 %v6725_v15 }
 0x590   :  { %6044 = vmatprep.subr.bf16.mxu0 %v6571_v16  ;;  %5528 = vmatprep.mubr.msk.f32.mxu0 %vm6572_vm1, %v6573_v32 }
 0x592   :  { %6040 = vmatpush3.bf16.msra.mxu1 %v6753_v31 }
 0x593   :  { %6047 = vmatprep.subr.bf16.mxu1 %v6571_v16  ;;  %6046 = vmatpush3.bf16.msra.mxu0 %v6733_v22 }
 0x594   :  { %6053 = vmatprep.subr.bf16.mxu0 %v6571_v16 }
 0x595   :  { %5518 = vmatmul.mubr.msk.f32.vlgmr.msra.gmra.mrb[28].mxu1 %vm269_vm2, %v1719_v3 }
 0x596   :  { %6049 = vmatpush3.bf16.msra.mxu1 %v6760_v33  ;;  %5539 = vmatprep.mubr.msk.f32.mxu1 %vm6572_vm1, %v6573_v32 }
 0x597   :  { %6050 = vmatprep.subr.bf16.mxu1 %v6571_v16 }
 0x59a   :  { %6052 = vmatpush3.bf16.msra.mxu1 %v6768_v36 }
 0x59b   :  { %6059 = vmatprep.subr.bf16.mxu1 %v6571_v16 }
 0x660   :  { %v1791_v4 = vpop.f32.mrb[26].mxu1  ;;  %v1861_v6 = vpop.f32.mrb[28].mxu0 }
 0x661   :  { %v1867_v7 = vadd.f32 %v1866_v5, %v1791_v4  ;;  %v5497_v9 = vpop.f32.mrb[27].mxu1  ;;  %v5508_v10 = vpop.f32.mrb[29].mxu0  ;;  %v1876_v11 = vadd.f32 %v1875_v8, %v1861_v6  ;;  %v2450_v5 = vld [vmem:[#allocation12 + $0x10] sm:$0xff]  ;;  %v2451_v6 = vld [vmem:[#allocation12 + $0x18] sm:$0xff] }
 0x662   :  { %v6081_v8 = vpack.c.bf16 %v2451_v6, %v2450_v5  ;;  %v2453_v9 = vld [vmem:[#allocation12 + $0x20] sm:$0xff]  ;;  %v2454_v10 = vld [vmem:[#allocation12 + $0x28] sm:$0xff] }
 0x663   :  { %v1868_v12 = vsub.f32 0.0, %v1867_v7  ;;  %v1877_v14 = vsub.f32 0.0, %v1876_v11  ;;  %v6980_v11 = vld [vmem:[#allocation2] sm:$0xff] }
 0x665   :  { %v1869_v13 = vmul.f32 1.442695, %v1868_v12  ;;  %v1878_v19 = vmul.f32 1.442695, %v1877_v14  ;;  %v6085_v12 = vpack.c.bf16 %v2454_v10, %v2453_v9  ;;  %v2456_v14 = vld [vmem:[#allocation12 + $0x38] sm:$0xff] }
 0x667   :  { %6314 = vpow2.f32 %v1869_v13  ;;  %v2455_v13 = vld [vmem:[#allocation12 + $0x30] sm:$0xff] }
 0x668   :  { %v1951_v17 = vpop.f32.mrb[28].mxu1  ;;  %6316 = vpow2.f32 %v1878_v19  ;;  %v7004_v19 = vld [vmem:[#allocation2 + $0x20] sm:$0xff] }
 0x669   :  { %v5519_v18 = vpop.f32.mrb[29].mxu1  ;;  %v1952_v25 = vadd.f32 %v6831_v48, %v1951_v17  ;;  %v6988_v17 = vld [vmem:[#allocation2 + $0x8] sm:$0xff] }
 0x66a   :  { %v6994_v18 = vld [vmem:[#allocation2 + $0x10] sm:$0xff] }
 0x671   :  { %v6315_v20 = vpop.eup %6314 }
 0x672   :  { %v1871_v21 = vadd.f32 1.0, %v6315_v20  ;;  %v6317_v23 = vpop.eup %6316 }
 0x673   :  { %v1880_v24 = vadd.f32 1.0, %v6317_v23  ;;  %v2462_v23 = vld [vmem:[#allocation14] sm:$0xff] }
 0x674   :  { %6318 = vrcp.f32 %v1871_v21 }
 0x675   :  { %6320 = vrcp.f32 %v1880_v24  ;;  %v2463_v24 = vld [vmem:[#allocation14 + $0x8] sm:$0xff] }
 0x67e   :  { %v6319_v27 = vpop.eup %6318 }
 0x67f   :  { %v1955_v28 = vmul.f32 %v6319_v27, %v1952_v25  ;;  %v6321_v34 = vpop.eup %6320  ;;  %v2458_v25 = vld [vmem:[#allocation12 + $0x40] sm:$0xff]  ;;  %v7029_v27 = vpack.c.bf16 %v2463_v24, %v2462_v23 }
 0x680   :  { %v1958_v35 = vsub.f32 1.0, %v6321_v34  ;;  %v1960_v39 = vmul.f32 %v6321_v34, %v1719_v3 }
 0x681   :  { %v1956_v30 = vadd.f32 %v1955_v28, %v1884_v29  ;;  %v2459_v28 = vld [vmem:[#allocation12 + $0x48] sm:$0xff]  ;;  %v2464_v29 = vld [vmem:[#allocation14 + $0x10] sm:$0xff] }
 0x682   :  { %v6093_v34 = vpack.c.bf16 %v2459_v28, %v2458_v25 }
 0x683   :  { %6322 = vtanh.f32 %v1956_v30  ;;  %v2465_v30 = vld [vmem:[#allocation14 + $0x18] sm:$0xff] }
 0x68d   :  { %v6323_v37 = vpop.eup %6322 }
 0x68e   :  { %v1959_v38 = vmul.f32 %v6323_v37, %v1958_v35  ;;  %v7032_v35 = vpack.c.bf16 %v2465_v30, %v2464_v29  ;;  %v2460_v37 = vld [vmem:[#allocation12 + $0x50] sm:$0xff] }
 0x690   :  { %v1961_v40 = vadd.f32 %v1960_v39, %v1959_v38  ;;  %v2461_v38 = vld [vmem:[#allocation12 + $0x58] sm:$0xff] }
 0x691   :  { %v6097_v39 = vpack.c.bf16 %v2461_v38, %v2460_v37 }
 0x692   :  { %1963 = vst.msk [vmem:[#allocation2 + $0x28] sm:$0xff] %vm269_vm2, %v1961_v40  ;;  %5529 = vmatmul.mubr.msk.f32.vlgmr.msra.gmra.mrb[30].mxu0 %vm269_vm2, %v1961_v40  ;;  %5540 = vmatmul.mubr.msk.f32.vlgmr.msra.gmra.mrb[30].mxu1 %vm269_vm2, %v1961_v40 }
 0x693   :  { %6055 = vmatpush3.bf16.msra.mxu0 %v6742_v26  ;;  %5550 = vmatprep.mubr.msk.f32.mxu0 %vm6572_vm1, %v6573_v32 }
 0x694   :  { %6056 = vmatprep.subr.bf16.mxu0 %v6571_v16  ;;  %6061 = vmatpush3.bf16.msra.mxu1 %v6725_v15  ;;  %v2448_v15 = vld [vmem:[#allocation12] sm:$0xff] }
 0x695   :  { %6062 = vmatprep.subr.bf16.mxu1 %v6571_v16  ;;  %5561 = vmatprep.mubr.msk.f32.mxu1 %vm6572_vm1, %v6573_v32  ;;  %v6077_v42 = vpack.c.bf16 %v2449_v41, %v2448_v15  ;;  %v2350_v15 = vld [vmem:[#allocation3 + $0x38] sm:$0xff] }
 0x697   :  { %6058 = vmatpush3.bf16.msra.mxu0 %v6753_v31 }
 0x698   :  { %6065 = vmatprep.subr.bf16.mxu0 %v6571_v16  ;;  %6064 = vmatpush3.bf16.msra.mxu1 %v6733_v22 }
 0x699   :  { %6071 = vmatprep.subr.bf16.mxu1 %v6571_v16  ;;  %v7009_v20 = vld [vmem:[#allocation2 + $0x28] sm:$0xff] }
 0x69a   :  { %5551 = vmatmul.mubr.msk.f32.vlgmr.msra.gmra.mrb[32].mxu0 %vm269_vm2, %v1961_v40 }
 0x69b   :  { %6067 = vmatpush3.bf16.msra.mxu0 %v6760_v33  ;;  %5572 = vmatprep.mubr.msk.f32.mxu0 %vm6572_vm1, %v6573_v32 }
 0x69c   :  { %6068 = vmatprep.subr.bf16.mxu0 %v6571_v16 }
 0x69f   :  { %6070 = vmatpush3.bf16.msra.mxu0 %v6768_v36 }
 0x6a0   :  { %6078 = vmatprep.subr.bf16.mxu0 %v6077_v42 }
 0x765   :  { %v2033_v43 = vpop.f32.mrb[30].mxu0  ;;  %v2103_v22 = vpop.f32.mrb[30].mxu1 }
 0x766   :  { %v2109_v45 = vadd.f32 %v2108_v44, %v2033_v43  ;;  %v5530_v47 = vpop.f32.mrb[31].mxu0  ;;  %v5541_v49 = vpop.f32.mrb[31].mxu1  ;;  %v2118_v50 = vadd.f32 %v2117_v46, %v2103_v22  ;;  %v2359_v43 = vld [vmem:[#allocation4 + $0x38] sm:$0xff] }
 0x768   :  { %v2110_v33 = vsub.f32 0.0, %v2109_v45  ;;  %v2119_v52 = vsub.f32 0.0, %v2118_v50  ;;  %v7041_v50 = vld [vmem:[%s7332_s6] ss:$0 sm:$0xff] }
 0x76a   :  { %v2111_v51 = vmul.f32 1.442695, %v2110_v33  ;;  %v2120_v55 = vmul.f32 1.442695, %v2119_v52 }
 0x76c   :  { %6324 = vpow2.f32 %v2111_v51 }
 0x76d   :  { %v2193_v53 = vpop.f32.mrb[32].mxu0  ;;  %6326 = vpow2.f32 %v2120_v55 }
 0x76e   :  { %v5552_v54 = vpop.f32.mrb[33].mxu0  ;;  %v2194_v59 = vadd.f32 %v6831_v48, %v2193_v53 }
 0x776   :  { %v6325_v36 = vpop.eup %6324 }
 0x777   :  { %v2113_v56 = vadd.f32 1.0, %v6325_v36  ;;  %v6327_v57 = vpop.eup %6326 }
 0x778   :  { %v2122_v58 = vadd.f32 1.0, %v6327_v57 }
 0x779   :  { %6328 = vrcp.f32 %v2113_v56 }
 0x77a   :  { %6330 = vrcp.f32 %v2122_v58 }
 0x783   :  { %v6329_v60 = vpop.eup %6328 }
 0x784   :  { %v2197_v61 = vmul.f32 %v6329_v60, %v2194_v59  ;;  %v6331_v0 = vpop.eup %6330  ;;  %v7052_v60 = vld [vmem:[%s7332_s6 + $0x1] ss:$0 sm:$0xff] }
 0x785   :  { %v2200_v1 = vsub.f32 1.0, %v6331_v0  ;;  %v2202_v4 = vmul.f32 %v6331_v0, %v1961_v40 }
 0x786   :  { %v2198_v63 = vadd.f32 %v2197_v61, %v2126_v62 }
 0x788   :  { %6332 = vtanh.f32 %v2198_v63 }
 0x792   :  { %v6333_v2 = vpop.eup %6332 }
 0x793   :  { %v2201_v3 = vmul.f32 %v6333_v2, %v2200_v1 }
 0x795   :  { %v6971_v7 = vadd.f32 %v2202_v4, %v2201_v3 }
 0x797   :  { %2205 = vst.msk [vmem:[#allocation2 + $0x30] sm:$0xff] %vm269_vm2, %v6971_v7  ;;  %5562 = vmatmul.mubr.msk.f32.vlgmr.msra.gmra.mrb[32].mxu1 %vm269_vm2, %v6971_v7  ;;  %5573 = vmatmul.mubr.msk.f32.vlgmr.msra.gmra.mrb[34].mxu0 %vm269_vm2, %v6971_v7 }
 0x798   :  { %6073 = vmatpush3.bf16.msra.mxu1 %v6742_v26  ;;  %6080 = vmatpush3.bf16.msra.mxu0 %v6077_v42  ;;  %v6089_v26 = vpack.c.bf16 %v2456_v14, %v2455_v13 }
 0x799   :  { %5594 = vmatprep.mubr.msk.f32.mxu0 %vm269_vm2, %v6980_v11  ;;  %6074 = vmatprep.subr.bf16.mxu1 %v6571_v16 }
 0x79a   :  { %6082 = vmatprep.subr.bf16.mxu0 %v6081_v8  ;;  %5583 = vmatprep.mubr.msk.f32.mxu1 %vm6572_vm1, %v6573_v32 }
 0x79c   :  { %6076 = vmatpush3.bf16.msra.mxu1 %v6753_v31  ;;  %6084 = vmatpush3.bf16.msra.mxu0 %v6081_v8  ;;  %v7000_v31 = vld [vmem:[#allocation2 + $0x18] sm:$0xff] }
 0x79d   :  { %6086 = vmatprep.subr.bf16.mxu1 %v6085_v12  ;;  %6094 = vmatprep.subr.bf16.mxu0 %v6093_v34 }
 0x79e   :  { %v7015_v21 = vld [vmem:[#allocation2 + $0x30] sm:$0xff] }
 0x79f   :  { %5584 = vmatmul.mubr.msk.f32.vlgmr.msra.gmra.mrb[34].mxu1 %vm269_vm2, %v6971_v7  ;;  %5595 = vmatmul.mubr.msk.f32.vlgmr.msra.gmra.mrb[36].mxu0 %vm269_vm2, %v6988_v17 }
 0x7a0   :  { %5597 = vmatprep.mubr.msk.f32.mxu0 %vm269_vm2, %v6994_v18  ;;  %6088 = vmatpush3.bf16.msra.mxu1 %v6085_v12 }
 0x7a1   :  { %5614 = vmatprep.mubr.msk.f32.mxu1 %vm269_vm2, %v6980_v11  ;;  %6090 = vmatprep.subr.bf16.mxu1 %v6089_v26 }
 0x7a2   :  { %6096 = vmatpush3.bf16.msra.mxu0 %v6093_v34  ;;  %v2368_v34 = vld [vmem:[#allocation5 + $0x38] sm:$0xff] }
 0x7a3   :  { %5598 = vmatmul.mubr.msk.f32.gmra.mrb[38].mxu0 %vm269_vm2, %v7000_v31  ;;  %6098 = vmatprep.subr.bf16.mxu0 %v6097_v39 }
 0x7a4   :  { %5600 = vmatprep.mubr.msk.f32.mxu0 %vm269_vm2, %v7004_v19  ;;  %6092 = vmatpush3.bf16.msra.mxu1 %v6089_v26 }
 0x7a5   :  { %6101 = vmatprep.subr.bf16.mxu1 %v6571_v16 }
 0x7a6   :  { %6100 = vmatpush3.bf16.msra.mxu0 %v6097_v39 }
 0x7a7   :  { %5601 = vmatmul.mubr.msk.f32.gmra.mrb[40].mxu0 %vm269_vm2, %v7009_v20  ;;  %5615 = vmatmul.mubr.msk.f32.vlgmr.msra.gmra.mrb[36].mxu1 %vm269_vm2, %v6988_v17 }
 0x7a8   :  { %5603 = vmatprep.mubr.msk.f32.mxu0 %vm269_vm2, %v7015_v21  ;;  %5617 = vmatprep.mubr.msk.f32.mxu1 %vm269_vm2, %v6994_v18 }
 0x7a9   :  { %6103 = vmatpush3.bf16.msra.mxu1 %v7029_v27  ;;  %6113 = vmatprep.subr.bf16.mxu0 %v6571_v16 }
 0x7aa   :  { %6104 = vmatprep.subr.bf16.mxu1 %v6571_v16 }
 0x7ab   :  { %5618 = vmatmul.mubr.msk.f32.gmra.mrb[38].mxu1 %vm269_vm2, %v7000_v31 }
 0x7ac   :  { %5620 = vmatprep.mubr.msk.f32.mxu1 %vm269_vm2, %v7004_v19 }
 0x7ad   :  { %6106 = vmatpush3.bf16.msra.mxu1 %v7032_v35 }
 0x7ae   :  { %6107 = vmatprep.subr.bf16.mxu1 %v6571_v16 }
 0x7af   :  { %5621 = vmatmul.mubr.msk.f32.gmra.mrb[40].mxu1 %vm269_vm2, %v7009_v20 }
 0x7b0   :  { %5623 = vmatprep.mubr.msk.f32.mxu1 %vm269_vm2, %v7015_v21 }
 0x86a   :  { %v2275_v40 = vpop.f32.mrb[32].mxu1  ;;  %v2345_v41 = vpop.f32.mrb[34].mxu0 }
 0x86b   :  { %v2351_v42 = vadd.f32 %v2350_v15, %v2275_v40  ;;  %v5563_v44 = vpop.f32.mrb[33].mxu1  ;;  %v5574_v22 = vpop.f32.mrb[35].mxu0  ;;  %v2360_v45 = vadd.f32 %v2359_v43, %v2345_v41  ;;  %v2467_v43 = vld [vmem:[#allocation14 + $0x20] sm:$0xff] }
 0x86c   :  { %v2468_v44 = vld [vmem:[#allocation14 + $0x28] sm:$0xff] }
 0x86d   :  { %v2352_v46 = vsub.f32 0.0, %v2351_v42  ;;  %v2361_v49 = vsub.f32 0.0, %v2360_v45  ;;  %v2473_v45 = vld [vmem:[#allocation14 + $0x48] sm:$0xff] }
 0x86f   :  { %v2353_v47 = vmul.f32 1.442695, %v2352_v46  ;;  %v2362_v55 = vmul.f32 1.442695, %v2361_v49  ;;  %v2469_v46 = vld [vmem:[#allocation14 + $0x30] sm:$0xff] }
 0x871   :  { %6334 = vpow2.f32 %v2353_v47  ;;  %v2470_v47 = vld [vmem:[#allocation14 + $0x38] sm:$0xff] }
 0x872   :  { %v2435_v33 = vpop.f32.mrb[34].mxu1  ;;  %v5596_v51 = vpop.f32.mrb[36].mxu0  ;;  %6336 = vpow2.f32 %v2362_v55  ;;  %v4930_v55 = vld [vmem:[%s7332_s6 + $0x2] ss:$0 sm:$0xff] }
 0x873   :  { %v2588_v52 = vadd.f32 %v5596_v51, %v7041_v50  ;;  %v5585_v53 = vpop.f32.mrb[35].mxu1  ;;  %v2582_v54 = vpop.f32.mrb[37].mxu0  ;;  %v2436_v28 = vadd.f32 %v6831_v48, %v2435_v33  ;;  %v2472_v48 = vld [vmem:[#allocation14 + $0x40] sm:$0xff]  ;;  %v2474_v33 = vld [vmem:[#allocation14 + $0x50] sm:$0xff]  ;;  %v2475_v51 = vld [vmem:[#allocation14 + $0x58] sm:$0xff] }
 0x874   :  { %v2583_v36 = vadd.f32 %v7041_v50, %v2582_v54  ;;  %v7083_v49 = vpack.c.bf16 %v2473_v45, %v2472_v48 }
 0x875   :  { %2622 = vst.msk [vmem:[#allocation3 + $0x8] sm:$0xff] %vm269_vm2, %v2588_v52  ;;  %v7097_v52 = vpack.c.bf16 %v2475_v51, %v2474_v33 }
 0x876   :  { %2621 = vst.msk [vmem:[#allocation3] sm:$0xff] %vm269_vm2, %v2583_v36  ;;  %v5599_v56 = vpop.f32.mrb[38].mxu0 }
 0x877   :  { %v2598_v57 = vadd.f32 %v5599_v56, %v7041_v50  ;;  %v2592_v58 = vpop.f32.mrb[39].mxu0 }
 0x878   :  { %v2593_v59 = vadd.f32 %v7041_v50, %v2592_v58 }
 0x879   :  { %2624 = vst.msk [vmem:[#allocation3 + $0x18] sm:$0xff] %vm269_vm2, %v2598_v57 }
 0x87a   :  { %2623 = vst.msk [vmem:[#allocation3 + $0x10] sm:$0xff] %vm269_vm2, %v2593_v59  ;;  %v5602_v61 = vpop.f32.mrb[40].mxu0  ;;  %v5616_v62 = vpop.f32.mrb[36].mxu1 }
 0x87b   :  { %v6335_v63 = vpop.eup %6334  ;;  %v2608_v0 = vadd.f32 %v5602_v61, %v7041_v50  ;;  %v2705_v1 = vadd.f32 %v5616_v62, %v7052_v60  ;;  %v2602_v2 = vpop.f32.mrb[41].mxu0 }
 0x87c   :  { %v2699_v3 = vpop.f32.mrb[37].mxu1  ;;  %v2355_v4 = vadd.f32 1.0, %v6335_v63  ;;  %v2603_v5 = vadd.f32 %v7041_v50, %v2602_v2  ;;  %v6337_v13 = vpop.eup %6336 }
 0x87d   :  { %v2700_v6 = vadd.f32 %v7052_v60, %v2699_v3  ;;  %2626 = vst.msk [vmem:[#allocation3 + $0x28] sm:$0xff] %vm269_vm2, %v2608_v0  ;;  %2739 = vst.msk [vmem:[#allocation4 + $0x8] sm:$0xff] %vm269_vm2, %v2705_v1  ;;  %v2364_v25 = vadd.f32 1.0, %v6337_v13  ;;  %v3003_v57 = vld [vmem:[#allocation3] sm:$0xff] }
 0x87e   :  { %6338 = vrcp.f32 %v2355_v4  ;;  %2625 = vst.msk [vmem:[#allocation3 + $0x20] sm:$0xff] %vm269_vm2, %v2603_v5  ;;  %v5619_v8 = vpop.f32.mrb[38].mxu1 }
 0x87f   :  { %2738 = vst.msk [vmem:[#allocation4] sm:$0xff] %vm269_vm2, %v2700_v6  ;;  %v2715_v9 = vadd.f32 %v5619_v8, %v7052_v60  ;;  %v2709_v10 = vpop.f32.mrb[39].mxu1  ;;  %6340 = vrcp.f32 %v2364_v25 }
 0x880   :  { %v2710_v12 = vadd.f32 %v7052_v60, %v2709_v10 }
 0x881   :  { %2741 = vst.msk [vmem:[#allocation4 + $0x18] sm:$0xff] %vm269_vm2, %v2715_v9 }
 0x882   :  { %2740 = vst.msk [vmem:[#allocation4 + $0x10] sm:$0xff] %vm269_vm2, %v2710_v12  ;;  %v5622_v14 = vpop.f32.mrb[40].mxu1 }
 0x883   :  { %v2725_v26 = vadd.f32 %v5622_v14, %v7052_v60  ;;  %v2719_v23 = vpop.f32.mrb[41].mxu1 }
 0x884   :  { %v2720_v24 = vadd.f32 %v7052_v60, %v2719_v23 }
 0x885   :  { %2743 = vst.msk [vmem:[#allocation4 + $0x28] sm:$0xff] %vm269_vm2, %v2725_v26 }
 0x886   :  { %2742 = vst.msk [vmem:[#allocation4 + $0x20] sm:$0xff] %vm269_vm2, %v2720_v24  ;;  %v3011_v5 = vld [vmem:[#allocation4] sm:$0xff] }
 0x888   :  { %v6339_v29 = vpop.eup %6338 }
 0x889   :  { %v2439_v30 = vmul.f32 %v6339_v29, %v2436_v28  ;;  %v6341_v38 = vpop.eup %6340 }
 0x88a   :  { %v2442_v39 = vsub.f32 1.0, %v6341_v38  ;;  %v2444_v15 = vmul.f32 %v6341_v38, %v6971_v7  ;;  %v7081_v7 = vpack.c.bf16 %v2468_v44, %v2467_v43  ;;  %v7151_v38 = vld [vmem:[%s7332_s6 + $0x3] ss:$0 sm:$0xff] }
 0x88b   :  { %v2440_v37 = vadd.f32 %v2439_v30, %v2368_v34 }
 0x88d   :  { %6342 = vtanh.f32 %v2440_v37 }
 0x897   :  { %v6343_v40 = vpop.eup %6342 }
 0x898   :  { %v2443_v41 = vmul.f32 %v6343_v40, %v2442_v39 }
 0x89a   :  { %v2445_v42 = vadd.f32 %v2444_v15, %v2443_v41 }
 0x89c   :  { %2447 = vst.msk [vmem:[#allocation2 + $0x38] sm:$0xff] %vm269_vm2, %v2445_v42 }
 0x8a3   :  { %v2487_v22 = vld [vmem:[#allocation2 + $0x38] sm:$0xff] }
 0x8a4   :  { %5604 = vmatmul.mubr.msk.f32.gmra.mrb[42].mxu0 %vm269_vm2, %v2487_v22  ;;  %5624 = vmatmul.mubr.msk.f32.gmra.mrb[42].mxu1 %vm269_vm2, %v2487_v22 }
 0x8a5   :  { %5634 = vmatprep.mubr.msk.f32.mxu0 %vm269_vm2, %v6980_v11  ;;  %5654 = vmatprep.mubr.msk.f32.mxu1 %vm6572_vm1, %v6573_v32  ;;  %v7091_v11 = vpack.c.bf16 %v2470_v47, %v2469_v46 }
 0x8a8   :  { %5635 = vmatmul.mubr.msk.f32.vlgmr.msra.gmra.mrb[44].mxu0 %vm269_vm2, %v6988_v17  ;;  %5655 = vmatmul.mubr.f32.vlgmr.msra.gmra.mrb[44].mxu1 %v6573_v32 }
 0x8a9   :  { %6109 = vmatpush3.bf16.msra.mxu1 %v7081_v7  ;;  %5637 = vmatprep.mubr.msk.f32.mxu0 %vm269_vm2, %v6994_v18 }
 0x8aa   :  { %6110 = vmatprep.subr.bf16.mxu1 %v6571_v16  ;;  %5665 = vmatprep.mubr.msk.f32.mxu1 %vm6572_vm1, %v6573_v32 }
 0x8ab   :  { %6115 = vmatpush3.bf16.msra.mxu0 %v7083_v49 }
 0x8ac   :  { %5638 = vmatmul.mubr.msk.f32.gmra.mrb[46].mxu0 %vm269_vm2, %v7000_v31  ;;  %6116 = vmatprep.subr.bf16.mxu0 %v6571_v16 }
 0x8ad   :  { %6112 = vmatpush3.bf16.msra.mxu1 %v7091_v11  ;;  %5640 = vmatprep.mubr.msk.f32.mxu0 %vm269_vm2, %v7004_v19 }
 0x8ae   :  { %6119 = vmatprep.subr.bf16.mxu1 %v6571_v16 }
 0x8af   :  { %6118 = vmatpush3.bf16.msra.mxu0 %v7097_v52 }
 0x8b0   :  { %5666 = vmatmul.mubr.f32.vlgmr.msra.gmra.mrb[46].mxu1 %v6573_v32  ;;  %5641 = vmatmul.mubr.msk.f32.gmra.mrb[48].mxu0 %vm269_vm2, %v7009_v20 }
 0x8b1   :  { %5643 = vmatprep.mubr.msk.f32.mxu0 %vm269_vm2, %v7015_v21  ;;  %6121 = vmatpush3.bf16.msra.mxu1 %v7029_v27 }
 0x8b2   :  { %6125 = vmatprep.subr.bf16.mxu0 %v6571_v16  ;;  %6122 = vmatprep.subr.bf16.mxu1 %v6571_v16 }
 0x8b3   :  { %5687 = vmatprep.mubr.msk.f32.mxu1 %vm6572_vm1, %v6573_v32 }
 0x8b4   :  { %5644 = vmatmul.mubr.msk.f32.gmra.mrb[50].mxu0 %vm269_vm2, %v2487_v22 }
 0x8b5   :  { %5676 = vmatprep.mubr.msk.f32.mxu0 %vm6572_vm1, %v6573_v32  ;;  %6124 = vmatpush3.bf16.msra.mxu1 %v7032_v35 }
 0x8b6   :  { %6131 = vmatprep.subr.bf16.mxu1 %v6571_v16 }
 0x8b8   :  { %5677 = vmatmul.mubr.f32.vlgmr.msra.gmra.mrb[52].mxu0 %v6573_v32 }
 0x8b9   :  { %6127 = vmatpush3.bf16.msra.mxu0 %v7081_v7  ;;  %5698 = vmatprep.mubr.msk.f32.mxu0 %vm6572_vm1, %v6573_v32 }
 0x8ba   :  { %6128 = vmatprep.subr.bf16.mxu0 %v6571_v16 }
 0x8bd   :  { %6130 = vmatpush3.bf16.msra.mxu0 %v7091_v11 }
 0x8be   :  { %6137 = vmatprep.subr.bf16.mxu0 %v6571_v16 }
 0x977   :  { %v5605_v17 = vpop.f32.mrb[42].mxu0  ;;  %v5625_v18 = vpop.f32.mrb[42].mxu1 }
 0x978   :  { %v2618_v31 = vadd.f32 %v5605_v17, %v7041_v50  ;;  %v2735_v19 = vadd.f32 %v5625_v18, %v7052_v60  ;;  %v2612_v20 = vpop.f32.mrb[43].mxu0  ;;  %v2729_v21 = vpop.f32.mrb[43].mxu1  ;;  %v3244_v17 = vld [vmem:[#allocation3 + $0x8] sm:$0xff] }
 0x979   :  { %v2613_v53 = vadd.f32 %v7041_v50, %v2612_v20  ;;  %v2730_v54 = vadd.f32 %v7052_v60, %v2729_v21 }
 0x97a   :  { %2628 = vst.msk [vmem:[#allocation3 + $0x38] sm:$0xff] %vm269_vm2, %v2618_v31  ;;  %2745 = vst.msk [vmem:[#allocation4 + $0x38] sm:$0xff] %vm269_vm2, %v2735_v19  ;;  %v3252_v19 = vld [vmem:[#allocation4 + $0x8] sm:$0xff] }
 0x97b   :  { %2627 = vst.msk [vmem:[#allocation3 + $0x30] sm:$0xff] %vm269_vm2, %v2613_v53  ;;  %2744 = vst.msk [vmem:[#allocation4 + $0x30] sm:$0xff] %vm269_vm2, %v2730_v54  ;;  %v5636_v36 = vpop.f32.mrb[44].mxu0  ;;  %v2929_v56 = vpop.f32.mrb[44].mxu1 }
 0x97c   :  { %v2822_v58 = vadd.f32 %v5636_v36, %v4930_v55  ;;  %v3004_v59 = vadd.f32 %v3003_v57, %v2929_v56  ;;  %v2816_v50 = vpop.f32.mrb[45].mxu0  ;;  %v5656_v61 = vpop.f32.mrb[45].mxu1 }
 0x97d   :  { %v2817_v60 = vadd.f32 %v4930_v55, %v2816_v50 }
 0x97e   :  { %2856 = vst.msk [vmem:[#allocation5 + $0x8] sm:$0xff] %vm269_vm2, %v2822_v58  ;;  %v3005_v62 = vsub.f32 0.0, %v3004_v59 }
 0x97f   :  { %2855 = vst.msk [vmem:[#allocation5] sm:$0xff] %vm269_vm2, %v2817_v60  ;;  %v5639_v63 = vpop.f32.mrb[46].mxu0 }
 0x980   :  { %v3006_v0 = vmul.f32 1.442695, %v3005_v62  ;;  %v2832_v1 = vadd.f32 %v5639_v63, %v4930_v55  ;;  %v2826_v2 = vpop.f32.mrb[47].mxu0 }
 0x981   :  { %v2827_v3 = vadd.f32 %v4930_v55, %v2826_v2 }
 0x982   :  { %6344 = vpow2.f32 %v3006_v0  ;;  %2858 = vst.msk [vmem:[#allocation5 + $0x18] sm:$0xff] %vm269_vm2, %v2832_v1 }
 0x983   :  { %2857 = vst.msk [vmem:[#allocation5 + $0x10] sm:$0xff] %vm269_vm2, %v2827_v3  ;;  %v2999_v4 = vpop.f32.mrb[46].mxu1  ;;  %v5642_v6 = vpop.f32.mrb[48].mxu0 }
 0x984   :  { %v3012_v8 = vadd.f32 %v3011_v5, %v2999_v4  ;;  %v2842_v9 = vadd.f32 %v5642_v6, %v4930_v55  ;;  %v2836_v10 = vpop.f32.mrb[49].mxu0  ;;  %v5667_v12 = vpop.f32.mrb[47].mxu1 }
 0x985   :  { %v2837_v13 = vadd.f32 %v4930_v55, %v2836_v10  ;;  %v3260_v1 = vld [vmem:[#allocation5 + $0x8] sm:$0xff]  ;;  %v3481_v12 = vld [vmem:[#allocation3 + $0x10] sm:$0xff] }
 0x986   :  { %v3013_v14 = vsub.f32 0.0, %v3012_v8  ;;  %2860 = vst.msk [vmem:[#allocation5 + $0x28] sm:$0xff] %vm269_vm2, %v2842_v9  ;;  %v3019_v43 = vld [vmem:[#allocation5] sm:$0xff] }
 0x987   :  { %2859 = vst.msk [vmem:[#allocation5 + $0x20] sm:$0xff] %vm269_vm2, %v2837_v13  ;;  %v5645_v26 = vpop.f32.mrb[50].mxu0 }
 0x988   :  { %v3014_v23 = vmul.f32 1.442695, %v3013_v14  ;;  %v2852_v24 = vadd.f32 %v5645_v26, %v4930_v55  ;;  %v2846_v25 = vpop.f32.mrb[51].mxu0  ;;  %v3489_v26 = vld [vmem:[#allocation4 + $0x10] sm:$0xff] }
 0x989   :  { %v2847_v28 = vadd.f32 %v4930_v55, %v2846_v25 }
 0x98a   :  { %6346 = vpow2.f32 %v3014_v23  ;;  %2862 = vst.msk [vmem:[#allocation5 + $0x38] sm:$0xff] %vm269_vm2, %v2852_v24 }
 0x98b   :  { %2861 = vst.msk [vmem:[#allocation5 + $0x30] sm:$0xff] %vm269_vm2, %v2847_v28  ;;  %v3090_v29 = vpop.f32.mrb[52].mxu0 }
 0x98c   :  { %v6345_v30 = vpop.eup %6344  ;;  %v5678_v34 = vpop.f32.mrb[53].mxu0  ;;  %v3091_v15 = vadd.f32 %v7151_v38, %v3090_v29 }
 0x98d   :  { %v3008_v37 = vadd.f32 1.0, %v6345_v30 }
 0x98f   :  { %6348 = vrcp.f32 %v3008_v37 }
 0x994   :  { %v6347_v39 = vpop.eup %6346 }
 0x995   :  { %v3016_v40 = vadd.f32 1.0, %v6347_v39 }
 0x997   :  { %6350 = vrcp.f32 %v3016_v40 }
 0x999   :  { %v6349_v41 = vpop.eup %6348 }
 0x99a   :  { %v3094_v42 = vmul.f32 %v6349_v41, %v3091_v15 }
 0x99c   :  { %v3095_v44 = vadd.f32 %v3094_v42, %v3019_v43 }
 0x99e   :  { %6352 = vtanh.f32 %v3095_v44 }
 0x9a1   :  { %v6351_v22 = vpop.eup %6350 }
 0x9a2   :  { %v3097_v48 = vsub.f32 1.0, %v6351_v22  ;;  %v3099_v47 = vmul.f32 0.0, %v6351_v22 }
 0x9a8   :  { %v6353_v45 = vpop.eup %6352 }
 0x9a9   :  { %v3098_v46 = vmul.f32 %v6353_v45, %v3097_v48  ;;  %v3497_v48 = vld [vmem:[#allocation5 + $0x10] sm:$0xff] }
 0x9ab   :  { %v3100_v33 = vadd.f32 %v3099_v47, %v3098_v46 }
 0x9ad   :  { %5688 = vmatmul.mubr.msk.f32.vlgmr.msra.gmra.mrb[48].mxu1 %vm269_vm2, %v3100_v33  ;;  %5699 = vmatmul.mubr.msk.f32.vlgmr.msra.gmra.mrb[54].mxu0 %vm269_vm2, %v3100_v33 }
 0x9ae   :  { %6133 = vmatpush3.bf16.msra.mxu1 %v7083_v49  ;;  %5709 = vmatprep.mubr.msk.f32.mxu1 %vm6572_vm1, %v6573_v32 }
 0x9af   :  { %6134 = vmatprep.subr.bf16.mxu1 %v6571_v16  ;;  %6139 = vmatpush3.bf16.msra.mxu0 %v7029_v27 }
 0x9b0   :  { %6140 = vmatprep.subr.bf16.mxu0 %v6571_v16  ;;  %5720 = vmatprep.mubr.msk.f32.mxu0 %vm6572_vm1, %v6573_v32 }
 0x9b2   :  { %6136 = vmatpush3.bf16.msra.mxu1 %v7097_v52 }
 0x9b3   :  { %6143 = vmatprep.subr.bf16.mxu1 %v6571_v16  ;;  %6142 = vmatpush3.bf16.msra.mxu0 %v7032_v35 }
 0x9b4   :  { %6149 = vmatprep.subr.bf16.mxu0 %v6571_v16 }
 0x9b5   :  { %5710 = vmatmul.mubr.msk.f32.vlgmr.msra.gmra.mrb[50].mxu1 %vm269_vm2, %v3100_v33 }
 0x9b6   :  { %6145 = vmatpush3.bf16.msra.mxu1 %v7081_v7  ;;  %5731 = vmatprep.mubr.msk.f32.mxu1 %vm6572_vm1, %v6573_v32 }
 0x9b7   :  { %6146 = vmatprep.subr.bf16.mxu1 %v6571_v16 }
 0x9ba   :  { %6148 = vmatpush3.bf16.msra.mxu1 %v7091_v11 }
 0x9bb   :  { %6155 = vmatprep.subr.bf16.mxu1 %v6571_v16 }
 0xa80   :  { %v3170_v51 = vpop.f32.mrb[48].mxu1  ;;  %v3240_v18 = vpop.f32.mrb[54].mxu0 }
 0xa81   :  { %v3245_v31 = vadd.f32 %v3244_v17, %v3170_v51  ;;  %v5689_v20 = vpop.f32.mrb[49].mxu1  ;;  %v5700_v21 = vpop.f32.mrb[55].mxu0  ;;  %v3253_v53 = vadd.f32 %v3252_v19, %v3240_v18  ;;  %v3718_v19 = vld [vmem:[#allocation3 + $0x18] sm:$0xff] }
 0xa83   :  { %v3246_v54 = vsub.f32 0.0, %v3245_v31  ;;  %v3254_v36 = vsub.f32 0.0, %v3253_v53  ;;  %v3726_v53 = vld [vmem:[#allocation4 + $0x18] sm:$0xff] }
 0xa85   :  { %v3247_v55 = vmul.f32 1.442695, %v3246_v54  ;;  %v3255_v58 = vmul.f32 1.442695, %v3254_v36 }
 0xa87   :  { %6354 = vpow2.f32 %v3247_v55 }
 0xa88   :  { %v3327_v56 = vpop.f32.mrb[50].mxu1  ;;  %6356 = vpow2.f32 %v3255_v58 }
 0xa89   :  { %v5711_v57 = vpop.f32.mrb[51].mxu1  ;;  %v3328_v62 = vadd.f32 %v7151_v38, %v3327_v56 }
 0xa91   :  { %v6355_v59 = vpop.eup %6354 }
 0xa92   :  { %v3249_v50 = vadd.f32 1.0, %v6355_v59  ;;  %v6357_v61 = vpop.eup %6356 }
 0xa93   :  { %v3257_v60 = vadd.f32 1.0, %v6357_v61 }
 0xa94   :  { %6358 = vrcp.f32 %v3249_v50 }
 0xa95   :  { %6360 = vrcp.f32 %v3257_v60 }
 0xa9e   :  { %v6359_v63 = vpop.eup %6358 }
 0xa9f   :  { %v3331_v0 = vmul.f32 %v6359_v63, %v3328_v62  ;;  %v6361_v3 = vpop.eup %6360 }
 0xaa0   :  { %v3334_v4 = vsub.f32 1.0, %v6361_v3  ;;  %v3336_v8 = vmul.f32 %v6361_v3, %v3100_v33 }
 0xaa1   :  { %v3332_v2 = vadd.f32 %v3331_v0, %v3260_v1 }
 0xaa3   :  { %6362 = vtanh.f32 %v3332_v2 }
 0xaad   :  { %v6363_v5 = vpop.eup %6362 }
 0xaae   :  { %v3335_v6 = vmul.f32 %v6363_v5, %v3334_v4  ;;  %v3734_v4 = vld [vmem:[#allocation5 + $0x18] sm:$0xff] }
 0xab0   :  { %v3337_v9 = vadd.f32 %v3336_v8, %v3335_v6 }
 0xab2   :  { %5721 = vmatmul.mubr.msk.f32.vlgmr.msra.gmra.mrb[56].mxu0 %vm269_vm2, %v3337_v9  ;;  %5732 = vmatmul.mubr.msk.f32.vlgmr.msra.gmra.mrb[52].mxu1 %vm269_vm2, %v3337_v9 }
 0xab3   :  { %6151 = vmatpush3.bf16.msra.mxu0 %v7083_v49  ;;  %5742 = vmatprep.mubr.msk.f32.mxu0 %vm6572_vm1, %v6573_v32 }
 0xab4   :  { %6152 = vmatprep.subr.bf16.mxu0 %v6571_v16  ;;  %6157 = vmatpush3.bf16.msra.mxu1 %v7029_v27 }
 0xab5   :  { %6158 = vmatprep.subr.bf16.mxu1 %v6571_v16  ;;  %5753 = vmatprep.mubr.msk.f32.mxu1 %vm6572_vm1, %v6573_v32 }
 0xab7   :  { %6154 = vmatpush3.bf16.msra.mxu0 %v7097_v52 }
 0xab8   :  { %6161 = vmatprep.subr.bf16.mxu0 %v6571_v16  ;;  %6160 = vmatpush3.bf16.msra.mxu1 %v7032_v35 }
 0xab9   :  { %6167 = vmatprep.subr.bf16.mxu1 %v6571_v16 }
 0xaba   :  { %5743 = vmatmul.mubr.msk.f32.vlgmr.msra.gmra.mrb[58].mxu0 %vm269_vm2, %v3337_v9 }
 0xabb   :  { %6163 = vmatpush3.bf16.msra.mxu0 %v7081_v7  ;;  %5764 = vmatprep.mubr.msk.f32.mxu0 %vm6572_vm1, %v6573_v32 }
 0xabc   :  { %6164 = vmatprep.subr.bf16.mxu0 %v6571_v16 }
 0xabf   :  { %6166 = vmatpush3.bf16.msra.mxu0 %v7091_v11 }
 0xac0   :  { %6173 = vmatprep.subr.bf16.mxu0 %v6571_v16 }
 0xb85   :  { %v3407_v10 = vpop.f32.mrb[56].mxu0  ;;  %v3477_v13 = vpop.f32.mrb[52].mxu1 }
 0xb86   :  { %v3482_v14 = vadd.f32 %v3481_v12, %v3407_v10  ;;  %v5722_v23 = vpop.f32.mrb[57].mxu0  ;;  %v5733_v24 = vpop.f32.mrb[53].mxu1  ;;  %v3490_v25 = vadd.f32 %v3489_v26, %v3477_v13  ;;  %v3955_v26 = vld [vmem:[#allocation3 + $0x20] sm:$0xff] }
 0xb88   :  { %v3483_v28 = vsub.f32 0.0, %v3482_v14  ;;  %v3491_v30 = vsub.f32 0.0, %v3490_v25  ;;  %v3963_v25 = vld [vmem:[#allocation4 + $0x20] sm:$0xff] }
 0xb8a   :  { %v3484_v29 = vmul.f32 1.442695, %v3483_v28  ;;  %v3492_v39 = vmul.f32 1.442695, %v3491_v30 }
 0xb8c   :  { %6364 = vpow2.f32 %v3484_v29 }
 0xb8d   :  { %v3564_v34 = vpop.f32.mrb[58].mxu0  ;;  %6366 = vpow2.f32 %v3492_v39 }
 0xb8e   :  { %v5744_v37 = vpop.f32.mrb[59].mxu0  ;;  %v3565_v43 = vadd.f32 %v7151_v38, %v3564_v34 }
 0xb96   :  { %v6365_v40 = vpop.eup %6364 }
 0xb97   :  { %v3486_v15 = vadd.f32 1.0, %v6365_v40  ;;  %v6367_v41 = vpop.eup %6366 }
 0xb98   :  { %v3494_v42 = vadd.f32 1.0, %v6367_v41 }
 0xb99   :  { %6368 = vrcp.f32 %v3486_v15 }
 0xb9a   :  { %6370 = vrcp.f32 %v3494_v42 }
 0xba3   :  { %v6369_v44 = vpop.eup %6368 }
 0xba4   :  { %v3568_v22 = vmul.f32 %v6369_v44, %v3565_v43  ;;  %v6371_v46 = vpop.eup %6370 }
 0xba5   :  { %v3571_v47 = vsub.f32 1.0, %v6371_v46  ;;  %v3573_v17 = vmul.f32 %v6371_v46, %v3337_v9 }
 0xba6   :  { %v3569_v45 = vadd.f32 %v3568_v22, %v3497_v48 }
 0xba8   :  { %6372 = vtanh.f32 %v3569_v45 }
 0xbb2   :  { %v6373_v33 = vpop.eup %6372 }
 0xbb3   :  { %v3572_v51 = vmul.f32 %v6373_v33, %v3571_v47  ;;  %v3971_v47 = vld [vmem:[#allocation5 + $0x20] sm:$0xff] }
 0xbb5   :  { %v3574_v18 = vadd.f32 %v3573_v17, %v3572_v51 }
 0xbb7   :  { %5754 = vmatmul.mubr.msk.f32.vlgmr.msra.gmra.mrb[54].mxu1 %vm269_vm2, %v3574_v18  ;;  %5765 = vmatmul.mubr.msk.f32.vlgmr.msra.gmra.mrb[60].mxu0 %vm269_vm2, %v3574_v18 }
 0xbb8   :  { %6169 = vmatpush3.bf16.msra.mxu1 %v7083_v49  ;;  %5775 = vmatprep.mubr.msk.f32.mxu1 %vm6572_vm1, %v6573_v32 }
 0xbb9   :  { %6170 = vmatprep.subr.bf16.mxu1 %v6571_v16  ;;  %6175 = vmatpush3.bf16.msra.mxu0 %v7029_v27 }
 0xbba   :  { %6176 = vmatprep.subr.bf16.mxu0 %v6571_v16  ;;  %5786 = vmatprep.mubr.msk.f32.mxu0 %vm6572_vm1, %v6573_v32 }
 0xbbc   :  { %6172 = vmatpush3.bf16.msra.mxu1 %v7097_v52 }
 0xbbd   :  { %6179 = vmatprep.subr.bf16.mxu1 %v6571_v16  ;;  %6178 = vmatpush3.bf16.msra.mxu0 %v7032_v35 }
 0xbbe   :  { %6185 = vmatprep.subr.bf16.mxu0 %v6571_v16 }
 0xbbf   :  { %5776 = vmatmul.mubr.msk.f32.vlgmr.msra.gmra.mrb[56].mxu1 %vm269_vm2, %v3574_v18 }
 0xbc0   :  { %6181 = vmatpush3.bf16.msra.mxu1 %v7081_v7  ;;  %5797 = vmatprep.mubr.msk.f32.mxu1 %vm6572_vm1, %v6573_v32 }
 0xbc1   :  { %6182 = vmatprep.subr.bf16.mxu1 %v6571_v16 }
 0xbc4   :  { %6184 = vmatpush3.bf16.msra.mxu1 %v7091_v11 }
 0xbc5   :  { %6191 = vmatprep.subr.bf16.mxu1 %v6571_v16 }
 0xc8a   :  { %v3644_v31 = vpop.f32.mrb[54].mxu1  ;;  %v3714_v20 = vpop.f32.mrb[60].mxu0 }
 0xc8b   :  { %v3719_v21 = vadd.f32 %v3718_v19, %v3644_v31  ;;  %v5755_v54 = vpop.f32.mrb[55].mxu1  ;;  %v5766_v55 = vpop.f32.mrb[61].mxu0  ;;  %v3727_v36 = vadd.f32 %v3726_v53, %v3714_v20  ;;  %v4192_v53 = vld [vmem:[#allocation3 + $0x28] sm:$0xff] }
 0xc8d   :  { %v3720_v56 = vsub.f32 0.0, %v3719_v21  ;;  %v3728_v58 = vsub.f32 0.0, %v3727_v36  ;;  %v4200_v36 = vld [vmem:[#allocation4 + $0x28] sm:$0xff] }
 0xc8f   :  { %v3721_v57 = vmul.f32 1.442695, %v3720_v56  ;;  %v3729_v61 = vmul.f32 1.442695, %v3728_v58 }
 0xc91   :  { %6374 = vpow2.f32 %v3721_v57 }
 0xc92   :  { %v3801_v59 = vpop.f32.mrb[56].mxu1  ;;  %6376 = vpow2.f32 %v3729_v61 }
 0xc93   :  { %v5777_v50 = vpop.f32.mrb[57].mxu1  ;;  %v3802_v1 = vadd.f32 %v7151_v38, %v3801_v59 }
 0xc9b   :  { %v6375_v60 = vpop.eup %6374 }
 0xc9c   :  { %v3723_v62 = vadd.f32 1.0, %v6375_v60  ;;  %v6377_v63 = vpop.eup %6376 }
 0xc9d   :  { %v3731_v0 = vadd.f32 1.0, %v6377_v63 }
 0xc9e   :  { %6378 = vrcp.f32 %v3723_v62 }
 0xc9f   :  { %6380 = vrcp.f32 %v3731_v0 }
 0xca8   :  { %v6379_v2 = vpop.eup %6378 }
 0xca9   :  { %v3805_v3 = vmul.f32 %v6379_v2, %v3802_v1  ;;  %v6381_v6 = vpop.eup %6380 }
 0xcaa   :  { %v3808_v8 = vsub.f32 1.0, %v6381_v6  ;;  %v3810_v12 = vmul.f32 %v6381_v6, %v3574_v18 }
 0xcab   :  { %v3806_v5 = vadd.f32 %v3805_v3, %v3734_v4 }
 0xcad   :  { %6382 = vtanh.f32 %v3806_v5 }
 0xcb7   :  { %v6383_v9 = vpop.eup %6382 }
 0xcb8   :  { %v3809_v10 = vmul.f32 %v6383_v9, %v3808_v8  ;;  %v4208_v8 = vld [vmem:[#allocation5 + $0x28] sm:$0xff] }
 0xcba   :  { %v3811_v13 = vadd.f32 %v3810_v12, %v3809_v10 }
 0xcbc   :  { %5787 = vmatmul.mubr.msk.f32.vlgmr.msra.gmra.mrb[62].mxu0 %vm269_vm2, %v3811_v13  ;;  %5798 = vmatmul.mubr.msk.f32.vlgmr.msra.gmra.mrb[58].mxu1 %vm269_vm2, %v3811_v13 }
 0xcbd   :  { %6187 = vmatpush3.bf16.msra.mxu0 %v7083_v49  ;;  %5808 = vmatprep.mubr.msk.f32.mxu0 %vm6572_vm1, %v6573_v32 }
 0xcbe   :  { %6188 = vmatprep.subr.bf16.mxu0 %v6571_v16  ;;  %6193 = vmatpush3.bf16.msra.mxu1 %v7029_v27 }
 0xcbf   :  { %6194 = vmatprep.subr.bf16.mxu1 %v6571_v16  ;;  %5819 = vmatprep.mubr.msk.f32.mxu1 %vm6572_vm1, %v6573_v32 }
 0xcc1   :  { %6190 = vmatpush3.bf16.msra.mxu0 %v7097_v52 }
 0xcc2   :  { %6197 = vmatprep.subr.bf16.mxu0 %v6571_v16  ;;  %6196 = vmatpush3.bf16.msra.mxu1 %v7032_v35 }
 0xcc3   :  { %6203 = vmatprep.subr.bf16.mxu1 %v6571_v16 }
 0xcc4   :  { %5809 = vmatmul.mubr.msk.f32.vlgmr.msra.gmra.mrb[64].mxu0 %vm269_vm2, %v3811_v13 }
 0xcc5   :  { %6199 = vmatpush3.bf16.msra.mxu0 %v7081_v7  ;;  %5830 = vmatprep.mubr.msk.f32.mxu0 %vm6572_vm1, %v6573_v32 }
 0xcc6   :  { %6200 = vmatprep.subr.bf16.mxu0 %v6571_v16 }
 0xcc9   :  { %6202 = vmatpush3.bf16.msra.mxu0 %v7091_v11 }
 0xcca   :  { %6209 = vmatprep.subr.bf16.mxu0 %v6571_v16 }
 0xd8f   :  { %v3881_v14 = vpop.f32.mrb[62].mxu0  ;;  %v3951_v23 = vpop.f32.mrb[58].mxu1 }
 0xd90   :  { %v3956_v24 = vadd.f32 %v3955_v26, %v3881_v14  ;;  %v5788_v28 = vpop.f32.mrb[63].mxu0  ;;  %v5799_v29 = vpop.f32.mrb[59].mxu1  ;;  %v3964_v30 = vadd.f32 %v3963_v25, %v3951_v23 }
 0xd92   :  { %v3957_v34 = vsub.f32 0.0, %v3956_v24  ;;  %v3965_v39 = vsub.f32 0.0, %v3964_v30  ;;  %v4429_v24 = vld [vmem:[#allocation3 + $0x30] sm:$0xff] }
 0xd94   :  { %v3958_v37 = vmul.f32 1.442695, %v3957_v34  ;;  %v3966_v41 = vmul.f32 1.442695, %v3965_v39 }
 0xd96   :  { %6384 = vpow2.f32 %v3958_v37 }
 0xd97   :  { %v4038_v40 = vpop.f32.mrb[64].mxu0  ;;  %6386 = vpow2.f32 %v3966_v41 }
 0xd98   :  { %v5810_v15 = vpop.f32.mrb[65].mxu0  ;;  %v4039_v48 = vadd.f32 %v7151_v38, %v4038_v40 }
 0xda0   :  { %v6385_v42 = vpop.eup %6384 }
 0xda1   :  { %v3960_v43 = vadd.f32 1.0, %v6385_v42  ;;  %v6387_v44 = vpop.eup %6386 }
 0xda2   :  { %v3968_v22 = vadd.f32 1.0, %v6387_v44 }
 0xda3   :  { %6388 = vrcp.f32 %v3960_v43 }
 0xda4   :  { %6390 = vrcp.f32 %v3968_v22 }
 0xdad   :  { %v6389_v45 = vpop.eup %6388 }
 0xdae   :  { %v4042_v46 = vmul.f32 %v6389_v45, %v4039_v48  ;;  %v6391_v51 = vpop.eup %6390 }
 0xdaf   :  { %v4045_v17 = vsub.f32 1.0, %v6391_v51  ;;  %v4047_v19 = vmul.f32 %v6391_v51, %v3811_v13 }
 0xdb0   :  { %v4043_v33 = vadd.f32 %v4042_v46, %v3971_v47  ;;  %v4445_v46 = vld [vmem:[#allocation5 + $0x30] sm:$0xff] }
 0xdb2   :  { %6392 = vtanh.f32 %v4043_v33 }
 0xdbc   :  { %v6393_v18 = vpop.eup %6392 }
 0xdbd   :  { %v4046_v31 = vmul.f32 %v6393_v18, %v4045_v17 }
 0xdbf   :  { %v4048_v20 = vadd.f32 %v4047_v19, %v4046_v31 }
 0xdc1   :  { %5820 = vmatmul.mubr.msk.f32.vlgmr.msra.gmra.mrb[60].mxu1 %vm269_vm2, %v4048_v20  ;;  %5831 = vmatmul.mubr.msk.f32.vlgmr.msra.gmra.mrb[66].mxu0 %vm269_vm2, %v4048_v20 }
 0xdc2   :  { %6205 = vmatpush3.bf16.msra.mxu1 %v7083_v49  ;;  %5841 = vmatprep.mubr.msk.f32.mxu1 %vm6572_vm1, %v6573_v32 }
 0xdc3   :  { %6206 = vmatprep.subr.bf16.mxu1 %v6571_v16  ;;  %6211 = vmatpush3.bf16.msra.mxu0 %v7029_v27 }
 0xdc4   :  { %6212 = vmatprep.subr.bf16.mxu0 %v6571_v16  ;;  %5852 = vmatprep.mubr.msk.f32.mxu0 %vm6572_vm1, %v6573_v32 }
 0xdc6   :  { %6208 = vmatpush3.bf16.msra.mxu1 %v7097_v52 }
 0xdc7   :  { %6215 = vmatprep.subr.bf16.mxu1 %v6571_v16  ;;  %6214 = vmatpush3.bf16.msra.mxu0 %v7032_v35 }
 0xdc8   :  { %6221 = vmatprep.subr.bf16.mxu0 %v6571_v16 }
 0xdc9   :  { %5842 = vmatmul.mubr.msk.f32.vlgmr.msra.gmra.mrb[62].mxu1 %vm269_vm2, %v4048_v20 }
 0xdca   :  { %6217 = vmatpush3.bf16.msra.mxu1 %v7081_v7  ;;  %5863 = vmatprep.mubr.msk.f32.mxu1 %vm6572_vm1, %v6573_v32 }
 0xdcb   :  { %6218 = vmatprep.subr.bf16.mxu1 %v6571_v16 }
 0xdce   :  { %6220 = vmatpush3.bf16.msra.mxu1 %v7091_v11 }
 0xdcf   :  { %6227 = vmatprep.subr.bf16.mxu1 %v6571_v16 }
 0xe94   :  { %v4118_v21 = vpop.f32.mrb[60].mxu1  ;;  %v4188_v54 = vpop.f32.mrb[66].mxu0 }
 0xe95   :  { %v4193_v55 = vadd.f32 %v4192_v53, %v4118_v21  ;;  %v5821_v56 = vpop.f32.mrb[61].mxu1  ;;  %v5832_v57 = vpop.f32.mrb[67].mxu0  ;;  %v4201_v58 = vadd.f32 %v4200_v36, %v4188_v54  ;;  %v4762_v21 = vld [vmem:[%s7333_s7 + $0x10] sm:$0xff] }
 0xe96   :  { %v4674_v57 = vld [vmem:[#allocation4 + $0x38] sm:$0xff] }
 0xe97   :  { %v4194_v59 = vsub.f32 0.0, %v4193_v55  ;;  %v4202_v61 = vsub.f32 0.0, %v4201_v58  ;;  %v4666_v55 = vld [vmem:[#allocation3 + $0x38] sm:$0xff] }
 0xe99   :  { %v4195_v50 = vmul.f32 1.442695, %v4194_v59  ;;  %v4203_v63 = vmul.f32 1.442695, %v4202_v61 }
 0xe9b   :  { %6394 = vpow2.f32 %v4195_v50 }
 0xe9c   :  { %v4275_v60 = vpop.f32.mrb[62].mxu1  ;;  %6396 = vpow2.f32 %v4203_v63 }
 0xe9d   :  { %v5843_v62 = vpop.f32.mrb[63].mxu1  ;;  %v4276_v4 = vadd.f32 %v7151_v38, %v4275_v60 }
 0xea5   :  { %v6395_v0 = vpop.eup %6394 }
 0xea6   :  { %v4197_v1 = vadd.f32 1.0, %v6395_v0  ;;  %v6397_v2 = vpop.eup %6396 }
 0xea7   :  { %v4205_v3 = vadd.f32 1.0, %v6397_v2 }
 0xea8   :  { %6398 = vrcp.f32 %v4197_v1 }
 0xea9   :  { %6400 = vrcp.f32 %v4205_v3 }
 0xeb2   :  { %v6399_v5 = vpop.eup %6398 }
 0xeb3   :  { %v4279_v6 = vmul.f32 %v6399_v5, %v4276_v4  ;;  %v6401_v10 = vpop.eup %6400 }
 0xeb4   :  { %v4282_v12 = vsub.f32 1.0, %v6401_v10  ;;  %v4284_v26 = vmul.f32 %v6401_v10, %v4048_v20  ;;  %v4760_v20 = vld [vmem:[%s7333_s7] sm:$0xff] }
 0xeb5   :  { %v4280_v9 = vadd.f32 %v4279_v6, %v4208_v8 }
 0xeb7   :  { %6402 = vtanh.f32 %v4280_v9  ;;  %v4682_v9 = vld [vmem:[#allocation5 + $0x38] sm:$0xff] }
 0xec1   :  { %v6403_v13 = vpop.eup %6402 }
 0xec2   :  { %v4283_v14 = vmul.f32 %v6403_v13, %v4282_v12 }
 0xec4   :  { %v4285_v23 = vadd.f32 %v4284_v26, %v4283_v14 }
 0xec6   :  { %5853 = vmatmul.mubr.msk.f32.vlgmr.msra.gmra.mrb[68].mxu0 %vm269_vm2, %v4285_v23  ;;  %5864 = vmatmul.mubr.msk.f32.vlgmr.msra.gmra.mrb[64].mxu1 %vm269_vm2, %v4285_v23 }
 0xec7   :  { %6223 = vmatpush3.bf16.msra.mxu0 %v7083_v49  ;;  %5874 = vmatprep.mubr.msk.f32.mxu0 %vm6572_vm1, %v6573_v32 }
 0xec8   :  { %6224 = vmatprep.subr.bf16.mxu0 %v6571_v16  ;;  %6229 = vmatpush3.bf16.msra.mxu1 %v7029_v27 }
 0xec9   :  { %6230 = vmatprep.subr.bf16.mxu1 %v6571_v16  ;;  %5885 = vmatprep.mubr.msk.f32.mxu1 %vm6572_vm1, %v6573_v32 }
 0xecb   :  { %6226 = vmatpush3.bf16.msra.mxu0 %v7097_v52 }
 0xecc   :  { %6233 = vmatprep.subr.bf16.mxu0 %v6571_v16  ;;  %6232 = vmatpush3.bf16.msra.mxu1 %v7032_v35  ;;  %v4437_v35 = vld [vmem:[#allocation4 + $0x30] sm:$0xff] }
 0xecd   :  { %6239 = vmatprep.subr.bf16.mxu1 %v6571_v16 }
 0xece   :  { %5875 = vmatmul.mubr.msk.f32.vlgmr.msra.gmra.mrb[70].mxu0 %vm269_vm2, %v4285_v23 }
 0xecf   :  { %6235 = vmatpush3.bf16.msra.mxu0 %v7081_v7  ;;  %5896 = vmatprep.mubr.msk.f32.mxu0 %vm6572_vm1, %v6573_v32 }
 0xed0   :  { %6236 = vmatprep.subr.bf16.mxu0 %v6571_v16 }
 0xed3   :  { %6238 = vmatpush3.bf16.msra.mxu0 %v7091_v11 }
 0xed4   :  { %6245 = vmatprep.subr.bf16.mxu0 %v6571_v16 }
 0xf99   :  { %v4355_v27 = vpop.f32.mrb[68].mxu0  ;;  %v4425_v25 = vpop.f32.mrb[64].mxu1 }
 0xf9a   :  { %v4430_v28 = vadd.f32 %v4429_v24, %v4355_v27  ;;  %v5854_v29 = vpop.f32.mrb[69].mxu0  ;;  %v5865_v30 = vpop.f32.mrb[65].mxu1  ;;  %v4438_v34 = vadd.f32 %v4437_v35, %v4425_v25  ;;  %v4961_v24 = vld [vmem:[%s7334_s8] ss:$0 sm:$0xff] }
 0xf9c   :  { %v4431_v37 = vsub.f32 0.0, %v4430_v28  ;;  %v4439_v7 = vsub.f32 0.0, %v4438_v34 }
 0xf9e   :  { %v4432_v39 = vmul.f32 1.442695, %v4431_v37  ;;  %v4440_v41 = vmul.f32 1.442695, %v4439_v7 }
 0xfa0   :  { %6404 = vpow2.f32 %v4432_v39 }
 0xfa1   :  { %v4512_v40 = vpop.f32.mrb[70].mxu0  ;;  %6406 = vpow2.f32 %v4440_v41 }
 0xfa2   :  { %v5876_v15 = vpop.f32.mrb[71].mxu0  ;;  %v4513_v22 = vadd.f32 %v7151_v38, %v4512_v40 }
 0xfaa   :  { %v6405_v42 = vpop.eup %6404 }
 0xfab   :  { %v4434_v11 = vadd.f32 1.0, %v6405_v42  ;;  %v6407_v43 = vpop.eup %6406 }
 0xfac   :  { %v4442_v44 = vadd.f32 1.0, %v6407_v43 }
 0xfad   :  { %6408 = vrcp.f32 %v4434_v11 }
 0xfae   :  { %6410 = vrcp.f32 %v4442_v44 }
 0xfb7   :  { %v6409_v48 = vpop.eup %6408 }
 0xfb8   :  { %v4516_v45 = vmul.f32 %v6409_v48, %v4513_v22  ;;  %v6411_v33 = vpop.eup %6410 }
 0xfb9   :  { %v4519_v51 = vsub.f32 1.0, %v6411_v33  ;;  %v4521_v31 = vmul.f32 %v6411_v33, %v4285_v23 }
 0xfba   :  { %v4517_v47 = vadd.f32 %v4516_v45, %v4445_v46 }
 0xfbc   :  { %6412 = vtanh.f32 %v4517_v47 }
 0xfc6   :  { %v6413_v17 = vpop.eup %6412 }
 0xfc7   :  { %v4520_v18 = vmul.f32 %v6413_v17, %v4519_v51 }
 0xfc9   :  { %v4522_v19 = vadd.f32 %v4521_v31, %v4520_v18 }
 0xfcb   :  { %5886 = vmatmul.mubr.msk.f32.vlgmr.msra.gmra.mrb[66].mxu1 %vm269_vm2, %v4522_v19  ;;  %5897 = vmatmul.mubr.msk.f32.vlgmr.msra.gmra.mrb[72].mxu0 %vm269_vm2, %v4522_v19 }
 0xfcc   :  { %6241 = vmatpush3.bf16.msra.mxu1 %v7083_v49  ;;  %5907 = vmatprep.mubr.msk.f32.mxu1 %vm6572_vm1, %v6573_v32  ;;  %v4761_v49 = vld [vmem:[%s7333_s7 + $0x8] sm:$0xff] }
 0xfcd   :  { %6242 = vmatprep.subr.bf16.mxu1 %v6571_v16  ;;  %5918 = vmatprep.mubr.msk.f32.mxu0 %vm6572_vm1, %v6573_v32  ;;  %v6246_v53 = vpack.c.bf16 %v4761_v49, %v4760_v20  ;;  %v4763_v32 = vld [vmem:[%s7333_s7 + $0x18] sm:$0xff] }
 0xfcf   :  { %6247 = vmatpush3.bf16.msra.mxu0 %v6246_v53 }
 0xfd0   :  { %6244 = vmatpush3.bf16.msra.mxu1 %v7097_v52  ;;  %v6249_v52 = vpack.c.bf16 %v4763_v32, %v4762_v21  ;;  %6248 = vmatprep.subr.bf16.mxu0 %v6571_v16 }
 0xfd3   :  { %5908 = vmatmul.mubr.msk.f32.vlgmr.msra.gmra.mrb[68].mxu1 %vm269_vm2, %v4522_v19  ;;  %6250 = vmatpush3.bf16.msra.mxu0 %v6249_v52 }
0x109e   :  { %v4592_v54 = vpop.f32.mrb[66].mxu1  ;;  %v4662_v36 = vpop.f32.mrb[72].mxu0 }
0x109f   :  { %v4667_v56 = vadd.f32 %v4666_v55, %v4592_v54  ;;  %v5887_v58 = vpop.f32.mrb[67].mxu1  ;;  %v5898_v59 = vpop.f32.mrb[73].mxu0  ;;  %v4675_v50 = vadd.f32 %v4674_v57, %v4662_v36 }
0x10a1   :  { %v4668_v61 = vsub.f32 0.0, %v4667_v56  ;;  %v4676_v62 = vsub.f32 0.0, %v4675_v50 }
0x10a3   :  { %v4669_v60 = vmul.f32 1.442695, %v4668_v61  ;;  %v4677_v1 = vmul.f32 1.442695, %v4676_v62 }
0x10a5   :  { %6414 = vpow2.f32 %v4669_v60 }
0x10a6   :  { %v4749_v63 = vpop.f32.mrb[68].mxu1  ;;  %6416 = vpow2.f32 %v4677_v1 }
0x10a7   :  { %v5909_v0 = vpop.f32.mrb[69].mxu1  ;;  %v4750_v5 = vadd.f32 %v7151_v38, %v4749_v63 }
0x10af   :  { %v6415_v2 = vpop.eup %6414 }
0x10b0   :  { %v4671_v3 = vadd.f32 1.0, %v6415_v2  ;;  %v6417_v16 = vpop.eup %6416 }
0x10b1   :  { %v4679_v4 = vadd.f32 1.0, %v6417_v16 }
0x10b2   :  { %6418 = vrcp.f32 %v4671_v3 }
0x10b3   :  { %6420 = vrcp.f32 %v4679_v4 }
0x10bc   :  { %v6419_v6 = vpop.eup %6418 }
0x10bd   :  { %v4753_v8 = vmul.f32 %v6419_v6, %v4750_v5  ;;  %v6421_v12 = vpop.eup %6420 }
0x10be   :  { %v4756_v13 = vsub.f32 1.0, %v6421_v12  ;;  %v4758_v23 = vmul.f32 %v6421_v12, %v4522_v19 }
0x10bf   :  { %v4754_v10 = vadd.f32 %v4753_v8, %v4682_v9 }
0x10c1   :  { %6422 = vtanh.f32 %v4754_v10 }
0x10cb   :  { %v6423_v14 = vpop.eup %6422 }
0x10cc   :  { %v4757_v26 = vmul.f32 %v6423_v14, %v4756_v13 }
0x10ce   :  { %v4759_v27 = vadd.f32 %v4758_v23, %v4757_v26 }
0x10d0   :  { %5919 = vmatmul.mubr.msk.f32.vlgmr.msra.gmra.mrb[74].mxu0 %vm269_vm2, %v4759_v27 }
0x11a3   :  { %v4840_v38 = vpop.f32.mrb[74].mxu0 }
0x11a4   :  { %v4841_v25 = vadd.f32 %v4961_v24, %v4840_v38  ;;  %v5920_v28 = vpop.f32.mrb[75].mxu0 }
0x11a6   :  { %4845 = vst.msk [vmem:[#allocation15] sm:$0xff] %vm4844_vm3, %v4841_v25 }
0x11a7   :  { %6545 = shalt.err (!%p6542_p2)
}
0x11a8   :  { %s6546_s22 = scalar_lea.hbm %s7335_s9, 128 }
0x11a9   :  { %p6547_p3 = scmp.ne.s32.totalorder %s7335_s9, %s6546_s22  ;;  %p6550_p4 = scmp.lt.u32.totalorder %s6546_s22, %s7335_s9 }
0x11ab   :  { %p6552_p5 = pnand %p6550_p4, %p6547_p3 }
0x11ad   :  { %6555 = shalt.err (!%p6552_p5)
}
0x11ae   :  { %4855 = dma.vmem_to_hbm [thread:$0]  %s4853_s2, 128, %s7335_s9, [#allocation8]  }
0x11af   :  { %6562 = dma.done.wait [#allocation8], 128  }
0x11b0   :  { %6563 = vsyncadd [#allocation8], 4294967168 }
0x11b1   :  { %4859 = vsyncpa [#allocation7], 1 }
0x11b2   :  { %4860 = vsyncpa [#allocation10], 1 }
0x11b3   :  { %4861 = vsyncpa [#allocation13], 1 }
0x11b4   :  { %4862 = vsyncpa [#allocation8], 1 }

</bundles_post_ra>
